<compile_context>
chip_gen: v7x
topology: tpu7x:2x2x1
jax: 0.10.0
libtpu: 0.0.40
codegen_flags: <defaults>
</compile_context>

<pallas_src>
import functools

import jax
import jax.numpy as jnp
import numpy as np
from jax import lax
from jax.experimental import pallas as pl
from jax.experimental.pallas import tpu as pltpu

LANES = 128      # ids per sub-chunk (MXU N-dim per push)
SUBLANES = 8     # sublane rows per grid-step block -> 8 * 128 = 1024 rows/step


def _mf_kernel(uid_ref, iid_ref, diff_ref,   # (SUBLANES, LANES) VMEM blocks
               tbl_ref,                      # (2D, U+I) VMEM-resident block-diag table
               params_ref,                   # (2,) SMEM: [w, b] of the 1->1 Linear
               out_ref,                      # (SUBLANES, LANES) VMEM block
               *, user_num, latent_dim):
    D = latent_dim
    UI = tbl_ref.shape[1]

    uid = uid_ref[...]                       # (8, 128) int32
    iid = iid_ref[...]                       # (8, 128) int32
    diff = diff_ref[...]                     # (8, 128) f32
    tbl = tbl_ref[...]                       # (2D, U+I) f32

    w = params_ref[0]                        # scalar (SMEM)
    b = params_ref[1]                        # scalar (SMEM)

    # Hoisted: JAX does not CSE broadcast_in_dim, so build the iota once.
    iota = lax.broadcasted_iota(jnp.int32, (UI, LANES), 0)

    rows = []
    # Static (trace-time unrolled) loop over 128-lane sub-chunks so the
    # (U+I, 128) one-hot intermediate stays within vreg budget per iteration.
    for r in range(SUBLANES):
        uid_r = uid[r:r + 1, :]                                   # (1, 128)
        iid_r = iid[r:r + 1, :] + user_num                        # (1, 128), block-diag column offset
        onehot = ((iota == uid_r) | (iota == iid_r)).astype(jnp.float32)  # (U+I, 128)

        # Single fused gather matmul on the MXU:
        #   rows [0:D)  -> user embedding (batch on lanes)
        #   rows [D:2D) -> item embedding (batch on lanes)
        both = jnp.dot(tbl, onehot, preferred_element_type=jnp.float32)   # (2D, 128)

        # scores[b] = sum_d user[b, d] * item[b, d]  (sublane reduce, batch on lanes)
        scores = jnp.sum(both[:D, :] * both[D:, :], axis=0, keepdims=True)  # (1, 128)

        # NOTE: the PyTorch reference computes `_scores = ELU(scores) + 1` but
        # never uses it for the returned value, so it is omitted here.
        scores = jax.nn.sigmoid(scores)                                    # (1, 128)
        swd = scores * diff[r:r + 1, :]                                    # (1, 128)
        rows.append(jax.nn.sigmoid(swd * w + b))                           # (1, 128)

    # One full (8, 128) unmasked lane-dense store per grid step.
    out_ref[...] = jnp.concatenate(rows, axis=0)


def mfnet_forward(user_id, item_id, diff, user_emb, item_emb, lin_w, lin_b):
    """Pallas implementation of MFNet.forward(user_id, item_id, diff)."""
    B = user_id.shape[0]
    U, D = user_emb.shape
    I = item_emb.shape[0]
    UI = U + I

    TB = SUBLANES * LANES                    # 1024 rows per grid step
    n_steps = pl.cdiv(B, TB)
    B_pad = n_steps * TB
    pad = B_pad - B

    # Pad the batch (index 0 is a valid gather target; padded outputs are
    # sliced off) and lay it out as (n_steps * 8, 128): batch on lanes,
    # block second-minor dim a multiple of 8.
    uid = jnp.pad(user_id.astype(jnp.int32), (0, pad)).reshape(n_steps * SUBLANES, LANES)
    iid = jnp.pad(item_id.astype(jnp.int32), (0, pad)).reshape(n_steps * SUBLANES, LANES)
    dpad = jnp.pad(diff.astype(jnp.float32), (0, pad)).reshape(n_steps * SUBLANES, LANES)

    # Block-diagonal, pre-transposed table (2D, U+I): one fused one-hot matmul
    # gathers both user (top D rows) and item (bottom D rows) embeddings.
    tbl = jnp.zeros((2 * D, UI), jnp.float32)
    tbl = tbl.at[:D, :U].set(user_emb.astype(jnp.float32).T)
    tbl = tbl.at[D:, U:].set(item_emb.astype(jnp.float32).T)

    params = jnp.array([lin_w, lin_b], dtype=jnp.float32)        # (2,) -> SMEM

    kernel = functools.partial(_mf_kernel, user_num=U, latent_dim=D)

    grid_spec = pltpu.PrefetchScalarGridSpec(
        num_scalar_prefetch=0,
        grid=(n_steps,),
        in_specs=[
            pl.BlockSpec((SUBLANES, LANES), lambda t: (t, 0)),    # user ids
            pl.BlockSpec((SUBLANES, LANES), lambda t: (t, 0)),    # item ids
            pl.BlockSpec((SUBLANES, LANES), lambda t: (t, 0)),    # diff
            pl.BlockSpec((2 * D, UI), lambda t: (0, 0)),          # block-diag table (VMEM-resident)
            pl.BlockSpec(memory_space=pltpu.MemorySpace.SMEM),    # [w, b]
        ],
        out_specs=pl.BlockSpec((SUBLANES, LANES), lambda t: (t, 0)),
    )

    out = pl.pallas_call(
        kernel,
        out_shape=jax.ShapeDtypeStruct((n_steps * SUBLANES, LANES), jnp.float32),
        grid_spec=grid_spec,
        compiler_params=pltpu.CompilerParams(
            dimension_semantics=("parallel",)),   # disjoint output blocks -> megacore-shardable
    )(uid, iid, dpad, tbl, params)

    return out.reshape(B_pad)[:B]   # torch.squeeze(torch.sigmoid(out), dim=-1)


def mfnet_reference(user_id, item_id, diff, user_emb, item_emb, lin_w, lin_b):
    """Pure-JAX reference mirroring the PyTorch forward."""
    u = user_emb[user_id]                               # (B, D)
    it = item_emb[item_id]                              # (B, D)
    scores = jnp.sum(u * it, axis=-1)                   # (B,)
    scores = jax.nn.sigmoid(scores)                     # (B,)
    scores_with_diff = scores[:, None] * diff[:, None]  # (B, 1)
    out = jax.nn.sigmoid(scores_with_diff * lin_w + lin_b)
    return out[:, 0]


if __name__ == "__main__":
    user_num, item_num, latent_dim = 64, 128, 32
    B = 1200   # spans 2 grid steps (tests padding + the multi-step / 2-TC path)

    key = jax.random.PRNGKey(0)
    k_ue, k_ie, k_w, k_b, k_uid, k_iid, k_diff = jax.random.split(key, 7)

    # xavier_uniform_ init for the embedding tables
    bound_u = float(np.sqrt(6.0 / (user_num + latent_dim)))
    bound_i = float(np.sqrt(6.0 / (item_num + latent_dim)))
    user_emb = jax.random.uniform(k_ue, (user_num, latent_dim),
                                  minval=-bound_u, maxval=bound_u,
                                  dtype=jnp.float32)
    item_emb = jax.random.uniform(k_ie, (item_num, latent_dim),
                                  minval=-bound_i, maxval=bound_i,
                                  dtype=jnp.float32)

    # nn.Linear(1, 1): weight, bias ~ U(-1, 1)
    lin_w = float(jax.random.uniform(k_w, (), minval=-1.0, maxval=1.0))
    lin_b = float(jax.random.uniform(k_b, (), minval=-1.0, maxval=1.0))

    user_id = jax.random.randint(k_uid, (B,), 0, user_num, dtype=jnp.int32)
    item_id = jax.random.randint(k_iid, (B,), 0, item_num, dtype=jnp.int32)
    diff = jax.random.uniform(k_diff, (B,), dtype=jnp.float32)

    out = mfnet_forward(user_id, item_id, diff, user_emb, item_emb, lin_w, lin_b)
    out = jax.block_until_ready(out)

    ref = mfnet_reference(user_id, item_id, diff, user_emb, item_emb, lin_w, lin_b)
    np.testing.assert_allclose(np.asarray(out), np.asarray(ref),
                               rtol=1e-5, atol=1e-5)

    print("KERNEL_OK")
</pallas_src>

<mosaic_0001>
module attributes {stable_mosaic.version = 11 : i64} {
  func.func @_mf_kernel(%arg0: i32, %arg1: memref<8x128xi32, #tpu.memory_space<vmem>>, %arg2: memref<8x128xi32, #tpu.memory_space<vmem>>, %arg3: memref<8x128xf32, #tpu.memory_space<vmem>>, %arg4: memref<64x192xf32, #tpu.memory_space<vmem>>, %arg5: memref<2xf32, #tpu.memory_space<smem>>, %arg6: memref<8x128xf32, #tpu.memory_space<vmem>>) attributes {dimension_semantics = [#tpu.dimension_semantics<parallel>], iteration_bounds = array<i64: 2>, scalar_prefetch = 0 : i64, scratch_operands = 0 : i64, tpu.core_type = #tpu.core_type<tc>, window_params = [{transform_indices = @transform_0, window_bounds = array<i64: 8, 128>}, {transform_indices = @transform_1, window_bounds = array<i64: 8, 128>}, {transform_indices = @transform_2, window_bounds = array<i64: 8, 128>}, {pipeline_mode = #tpu.pipeline_mode<synchronous>, transform_indices = @transform_3, window_bounds = array<i64: 64, 192>}, {transform_indices = @transform_4, window_bounds = array<i64: 2>}, {transform_indices = @transform_5, window_bounds = array<i64: 8, 128>}]} {
    %c0 = arith.constant 0 : index
    %c0_0 = arith.constant 0 : index
    %0 = vector.load %arg1[%c0, %c0_0] : memref<8x128xi32, #tpu.memory_space<vmem>>, vector<8x128xi32>
    %c0_1 = arith.constant 0 : index
    %c0_2 = arith.constant 0 : index
    %1 = vector.load %arg2[%c0_1, %c0_2] : memref<8x128xi32, #tpu.memory_space<vmem>>, vector<8x128xi32>
    %c0_3 = arith.constant 0 : index
    %c0_4 = arith.constant 0 : index
    %2 = vector.load %arg3[%c0_3, %c0_4] : memref<8x128xf32, #tpu.memory_space<vmem>>, vector<8x128xf32>
    %c0_5 = arith.constant 0 : index
    %c0_6 = arith.constant 0 : index
    %3 = vector.load %arg4[%c0_5, %c0_6] : memref<64x192xf32, #tpu.memory_space<vmem>>, vector<64x192xf32>
    %c0_7 = arith.constant 0 : index
    %4 = memref.load %arg5[%c0_7] : memref<2xf32, #tpu.memory_space<smem>>
    %c1 = arith.constant 1 : index
    %5 = memref.load %arg5[%c1] : memref<2xf32, #tpu.memory_space<smem>>
    %6 = tpu.iota {dimensions = array<i32: 0>} : vector<192x128xi32>
    %7 = vector.extract_strided_slice %0 {offsets = [0, 0], sizes = [1, 128], strides = [1, 1]} : vector<8x128xi32> to vector<1x128xi32>
    %8 = vector.extract_strided_slice %1 {offsets = [0, 0], sizes = [1, 128], strides = [1, 1]} : vector<8x128xi32> to vector<1x128xi32>
    %c64_i32 = arith.constant 64 : i32
    %9 = vector.broadcast %c64_i32 : i32 to vector<1x128xi32>
    %10 = arith.addi %8, %9 : vector<1x128xi32>
    %11 = vector.broadcast %7 : vector<1x128xi32> to vector<192x128xi32>
    %12 = arith.cmpi eq, %6, %11 : vector<192x128xi32>
    %13 = vector.broadcast %10 : vector<1x128xi32> to vector<192x128xi32>
    %14 = arith.cmpi eq, %6, %13 : vector<192x128xi32>
    %15 = arith.ori %12, %14 : vector<192x128xi1>
    %16 = arith.extui %15 : vector<192x128xi1> to vector<192x128xi32>
    %17 = arith.sitofp %16 : vector<192x128xi32> to vector<192x128xf32>
    %cst = arith.constant dense<0.000000e+00> : vector<64x128xf32>
    %18 = tpu.matmul %3, %17, %cst {dimension_numbers = #tpu.dot_dimension_numbers<[1], [0], [0], [1], [0, 0, 1, 1], [], []>} : vector<64x192xf32>, vector<192x128xf32>, vector<64x128xf32> -> vector<64x128xf32>
    %19 = vector.extract_strided_slice %18 {offsets = [0, 0], sizes = [32, 128], strides = [1, 1]} : vector<64x128xf32> to vector<32x128xf32>
    %20 = vector.extract_strided_slice %18 {offsets = [32, 0], sizes = [32, 128], strides = [1, 1]} : vector<64x128xf32> to vector<32x128xf32>
    %21 = arith.mulf %19, %20 : vector<32x128xf32>
    %cst_8 = arith.constant dense<0.000000e+00> : vector<128xf32>
    %22 = vector.multi_reduction <add>, %21, %cst_8 [0] : vector<32x128xf32> to vector<128xf32>
    %23 = vector.shape_cast %22 : vector<128xf32> to vector<1x128xf32>
    %24 = arith.negf %23 : vector<1x128xf32>
    %25 = math.exp %24 : vector<1x128xf32>
    %cst_9 = arith.constant 1.000000e+00 : f32
    %26 = vector.broadcast %cst_9 : f32 to vector<1x128xf32>
    %27 = arith.addf %26, %25 : vector<1x128xf32>
    %28 = arith.divf %26, %27 : vector<1x128xf32>
    %29 = vector.extract_strided_slice %2 {offsets = [0, 0], sizes = [1, 128], strides = [1, 1]} : vector<8x128xf32> to vector<1x128xf32>
    %30 = arith.mulf %28, %29 : vector<1x128xf32>
    %31 = vector.broadcast %4 : f32 to vector<1x128xf32>
    %32 = arith.mulf %30, %31 : vector<1x128xf32>
    %33 = vector.broadcast %5 : f32 to vector<1x128xf32>
    %34 = arith.addf %32, %33 : vector<1x128xf32>
    %35 = arith.negf %34 : vector<1x128xf32>
    %36 = math.exp %35 : vector<1x128xf32>
    %cst_10 = arith.constant 1.000000e+00 : f32
    %37 = vector.broadcast %cst_10 : f32 to vector<1x128xf32>
    %38 = arith.addf %37, %36 : vector<1x128xf32>
    %39 = arith.divf %37, %38 : vector<1x128xf32>
    %40 = vector.extract_strided_slice %0 {offsets = [1, 0], sizes = [1, 128], strides = [1, 1]} : vector<8x128xi32> to vector<1x128xi32>
    %41 = vector.extract_strided_slice %1 {offsets = [1, 0], sizes = [1, 128], strides = [1, 1]} : vector<8x128xi32> to vector<1x128xi32>
    %c64_i32_11 = arith.constant 64 : i32
    %42 = vector.broadcast %c64_i32_11 : i32 to vector<1x128xi32>
    %43 = arith.addi %41, %42 : vector<1x128xi32>
    %44 = vector.broadcast %40 : vector<1x128xi32> to vector<192x128xi32>
    %45 = arith.cmpi eq, %6, %44 : vector<192x128xi32>
    %46 = vector.broadcast %43 : vector<1x128xi32> to vector<192x128xi32>
    %47 = arith.cmpi eq, %6, %46 : vector<192x128xi32>
    %48 = arith.ori %45, %47 : vector<192x128xi1>
    %49 = arith.extui %48 : vector<192x128xi1> to vector<192x128xi32>
    %50 = arith.sitofp %49 : vector<192x128xi32> to vector<192x128xf32>
    %cst_12 = arith.constant dense<0.000000e+00> : vector<64x128xf32>
    %51 = tpu.matmul %3, %50, %cst_12 {dimension_numbers = #tpu.dot_dimension_numbers<[1], [0], [0], [1], [0, 0, 1, 1], [], []>} : vector<64x192xf32>, vector<192x128xf32>, vector<64x128xf32> -> vector<64x128xf32>
    %52 = vector.extract_strided_slice %51 {offsets = [0, 0], sizes = [32, 128], strides = [1, 1]} : vector<64x128xf32> to vector<32x128xf32>
    %53 = vector.extract_strided_slice %51 {offsets = [32, 0], sizes = [32, 128], strides = [1, 1]} : vector<64x128xf32> to vector<32x128xf32>
    %54 = arith.mulf %52, %53 : vector<32x128xf32>
    %cst_13 = arith.constant dense<0.000000e+00> : vector<128xf32>
    %55 = vector.multi_reduction <add>, %54, %cst_13 [0] : vector<32x128xf32> to vector<128xf32>
    %56 = vector.shape_cast %55 : vector<128xf32> to vector<1x128xf32>
    %57 = arith.negf %56 : vector<1x128xf32>
    %58 = math.exp %57 : vector<1x128xf32>
    %cst_14 = arith.constant 1.000000e+00 : f32
    %59 = vector.broadcast %cst_14 : f32 to vector<1x128xf32>
    %60 = arith.addf %59, %58 : vector<1x128xf32>
    %61 = arith.divf %59, %60 : vector<1x128xf32>
    %62 = vector.extract_strided_slice %2 {offsets = [1, 0], sizes = [1, 128], strides = [1, 1]} : vector<8x128xf32> to vector<1x128xf32>
    %63 = arith.mulf %61, %62 : vector<1x128xf32>
    %64 = vector.broadcast %4 : f32 to vector<1x128xf32>
    %65 = arith.mulf %63, %64 : vector<1x128xf32>
    %66 = vector.broadcast %5 : f32 to vector<1x128xf32>
    %67 = arith.addf %65, %66 : vector<1x128xf32>
    %68 = arith.negf %67 : vector<1x128xf32>
    %69 = math.exp %68 : vector<1x128xf32>
    %cst_15 = arith.constant 1.000000e+00 : f32
    %70 = vector.broadcast %cst_15 : f32 to vector<1x128xf32>
    %71 = arith.addf %70, %69 : vector<1x128xf32>
    %72 = arith.divf %70, %71 : vector<1x128xf32>
    %73 = vector.extract_strided_slice %0 {offsets = [2, 0], sizes = [1, 128], strides = [1, 1]} : vector<8x128xi32> to vector<1x128xi32>
    %74 = vector.extract_strided_slice %1 {offsets = [2, 0], sizes = [1, 128], strides = [1, 1]} : vector<8x128xi32> to vector<1x128xi32>
    %c64_i32_16 = arith.constant 64 : i32
    %75 = vector.broadcast %c64_i32_16 : i32 to vector<1x128xi32>
    %76 = arith.addi %74, %75 : vector<1x128xi32>
    %77 = vector.broadcast %73 : vector<1x128xi32> to vector<192x128xi32>
    %78 = arith.cmpi eq, %6, %77 : vector<192x128xi32>
    %79 = vector.broadcast %76 : vector<1x128xi32> to vector<192x128xi32>
    %80 = arith.cmpi eq, %6, %79 : vector<192x128xi32>
    %81 = arith.ori %78, %80 : vector<192x128xi1>
    %82 = arith.extui %81 : vector<192x128xi1> to vector<192x128xi32>
    %83 = arith.sitofp %82 : vector<192x128xi32> to vector<192x128xf32>
    %cst_17 = arith.constant dense<0.000000e+00> : vector<64x128xf32>
    %84 = tpu.matmul %3, %83, %cst_17 {dimension_numbers = #tpu.dot_dimension_numbers<[1], [0], [0], [1], [0, 0, 1, 1], [], []>} : vector<64x192xf32>, vector<192x128xf32>, vector<64x128xf32> -> vector<64x128xf32>
    %85 = vector.extract_strided_slice %84 {offsets = [0, 0], sizes = [32, 128], strides = [1, 1]} : vector<64x128xf32> to vector<32x128xf32>
    %86 = vector.extract_strided_slice %84 {offsets = [32, 0], sizes = [32, 128], strides = [1, 1]} : vector<64x128xf32> to vector<32x128xf32>
    %87 = arith.mulf %85, %86 : vector<32x128xf32>
    %cst_18 = arith.constant dense<0.000000e+00> : vector<128xf32>
    %88 = vector.multi_reduction <add>, %87, %cst_18 [0] : vector<32x128xf32> to vector<128xf32>
    %89 = vector.shape_cast %88 : vector<128xf32> to vector<1x128xf32>
    %90 = arith.negf %89 : vector<1x128xf32>
    %91 = math.exp %90 : vector<1x128xf32>
    %cst_19 = arith.constant 1.000000e+00 : f32
    %92 = vector.broadcast %cst_19 : f32 to vector<1x128xf32>
    %93 = arith.addf %92, %91 : vector<1x128xf32>
    %94 = arith.divf %92, %93 : vector<1x128xf32>
    %95 = vector.extract_strided_slice %2 {offsets = [2, 0], sizes = [1, 128], strides = [1, 1]} : vector<8x128xf32> to vector<1x128xf32>
    %96 = arith.mulf %94, %95 : vector<1x128xf32>
    %97 = vector.broadcast %4 : f32 to vector<1x128xf32>
    %98 = arith.mulf %96, %97 : vector<1x128xf32>
    %99 = vector.broadcast %5 : f32 to vector<1x128xf32>
    %100 = arith.addf %98, %99 : vector<1x128xf32>
    %101 = arith.negf %100 : vector<1x128xf32>
    %102 = math.exp %101 : vector<1x128xf32>
    %cst_20 = arith.constant 1.000000e+00 : f32
    %103 = vector.broadcast %cst_20 : f32 to vector<1x128xf32>
    %104 = arith.addf %103, %102 : vector<1x128xf32>
    %105 = arith.divf %103, %104 : vector<1x128xf32>
    %106 = vector.extract_strided_slice %0 {offsets = [3, 0], sizes = [1, 128], strides = [1, 1]} : vector<8x128xi32> to vector<1x128xi32>
    %107 = vector.extract_strided_slice %1 {offsets = [3, 0], sizes = [1, 128], strides = [1, 1]} : vector<8x128xi32> to vector<1x128xi32>
    %c64_i32_21 = arith.constant 64 : i32
    %108 = vector.broadcast %c64_i32_21 : i32 to vector<1x128xi32>
    %109 = arith.addi %107, %108 : vector<1x128xi32>
    %110 = vector.broadcast %106 : vector<1x128xi32> to vector<192x128xi32>
    %111 = arith.cmpi eq, %6, %110 : vector<192x128xi32>
    %112 = vector.broadcast %109 : vector<1x128xi32> to vector<192x128xi32>
    %113 = arith.cmpi eq, %6, %112 : vector<192x128xi32>
    %114 = arith.ori %111, %113 : vector<192x128xi1>
    %115 = arith.extui %114 : vector<192x128xi1> to vector<192x128xi32>
    %116 = arith.sitofp %115 : vector<192x128xi32> to vector<192x128xf32>
    %cst_22 = arith.constant dense<0.000000e+00> : vector<64x128xf32>
    %117 = tpu.matmul %3, %116, %cst_22 {dimension_numbers = #tpu.dot_dimension_numbers<[1], [0], [0], [1], [0, 0, 1, 1], [], []>} : vector<64x192xf32>, vector<192x128xf32>, vector<64x128xf32> -> vector<64x128xf32>
    %118 = vector.extract_strided_slice %117 {offsets = [0, 0], sizes = [32, 128], strides = [1, 1]} : vector<64x128xf32> to vector<32x128xf32>
    %119 = vector.extract_strided_slice %117 {offsets = [32, 0], sizes = [32, 128], strides = [1, 1]} : vector<64x128xf32> to vector<32x128xf32>
    %120 = arith.mulf %118, %119 : vector<32x128xf32>
    %cst_23 = arith.constant dense<0.000000e+00> : vector<128xf32>
    %121 = vector.multi_reduction <add>, %120, %cst_23 [0] : vector<32x128xf32> to vector<128xf32>
    %122 = vector.shape_cast %121 : vector<128xf32> to vector<1x128xf32>
    %123 = arith.negf %122 : vector<1x128xf32>
    %124 = math.exp %123 : vector<1x128xf32>
    %cst_24 = arith.constant 1.000000e+00 : f32
    %125 = vector.broadcast %cst_24 : f32 to vector<1x128xf32>
    %126 = arith.addf %125, %124 : vector<1x128xf32>
    %127 = arith.divf %125, %126 : vector<1x128xf32>
    %128 = vector.extract_strided_slice %2 {offsets = [3, 0], sizes = [1, 128], strides = [1, 1]} : vector<8x128xf32> to vector<1x128xf32>
    %129 = arith.mulf %127, %128 : vector<1x128xf32>
    %130 = vector.broadcast %4 : f32 to vector<1x128xf32>
    %131 = arith.mulf %129, %130 : vector<1x128xf32>
    %132 = vector.broadcast %5 : f32 to vector<1x128xf32>
    %133 = arith.addf %131, %132 : vector<1x128xf32>
    %134 = arith.negf %133 : vector<1x128xf32>
    %135 = math.exp %134 : vector<1x128xf32>
    %cst_25 = arith.constant 1.000000e+00 : f32
    %136 = vector.broadcast %cst_25 : f32 to vector<1x128xf32>
    %137 = arith.addf %136, %135 : vector<1x128xf32>
    %138 = arith.divf %136, %137 : vector<1x128xf32>
    %139 = vector.extract_strided_slice %0 {offsets = [4, 0], sizes = [1, 128], strides = [1, 1]} : vector<8x128xi32> to vector<1x128xi32>
    %140 = vector.extract_strided_slice %1 {offsets = [4, 0], sizes = [1, 128], strides = [1, 1]} : vector<8x128xi32> to vector<1x128xi32>
    %c64_i32_26 = arith.constant 64 : i32
    %141 = vector.broadcast %c64_i32_26 : i32 to vector<1x128xi32>
    %142 = arith.addi %140, %141 : vector<1x128xi32>
    %143 = vector.broadcast %139 : vector<1x128xi32> to vector<192x128xi32>
    %144 = arith.cmpi eq, %6, %143 : vector<192x128xi32>
    %145 = vector.broadcast %142 : vector<1x128xi32> to vector<192x128xi32>
    %146 = arith.cmpi eq, %6, %145 : vector<192x128xi32>
    %147 = arith.ori %144, %146 : vector<192x128xi1>
    %148 = arith.extui %147 : vector<192x128xi1> to vector<192x128xi32>
    %149 = arith.sitofp %148 : vector<192x128xi32> to vector<192x128xf32>
    %cst_27 = arith.constant dense<0.000000e+00> : vector<64x128xf32>
    %150 = tpu.matmul %3, %149, %cst_27 {dimension_numbers = #tpu.dot_dimension_numbers<[1], [0], [0], [1], [0, 0, 1, 1], [], []>} : vector<64x192xf32>, vector<192x128xf32>, vector<64x128xf32> -> vector<64x128xf32>
    %151 = vector.extract_strided_slice %150 {offsets = [0, 0], sizes = [32, 128], strides = [1, 1]} : vector<64x128xf32> to vector<32x128xf32>
    %152 = vector.extract_strided_slice %150 {offsets = [32, 0], sizes = [32, 128], strides = [1, 1]} : vector<64x128xf32> to vector<32x128xf32>
    %153 = arith.mulf %151, %152 : vector<32x128xf32>
    %cst_28 = arith.constant dense<0.000000e+00> : vector<128xf32>
    %154 = vector.multi_reduction <add>, %153, %cst_28 [0] : vector<32x128xf32> to vector<128xf32>
    %155 = vector.shape_cast %154 : vector<128xf32> to vector<1x128xf32>
    %156 = arith.negf %155 : vector<1x128xf32>
    %157 = math.exp %156 : vector<1x128xf32>
    %cst_29 = arith.constant 1.000000e+00 : f32
    %158 = vector.broadcast %cst_29 : f32 to vector<1x128xf32>
    %159 = arith.addf %158, %157 : vector<1x128xf32>
    %160 = arith.divf %158, %159 : vector<1x128xf32>
    %161 = vector.extract_strided_slice %2 {offsets = [4, 0], sizes = [1, 128], strides = [1, 1]} : vector<8x128xf32> to vector<1x128xf32>
    %162 = arith.mulf %160, %161 : vector<1x128xf32>
    %163 = vector.broadcast %4 : f32 to vector<1x128xf32>
    %164 = arith.mulf %162, %163 : vector<1x128xf32>
    %165 = vector.broadcast %5 : f32 to vector<1x128xf32>
    %166 = arith.addf %164, %165 : vector<1x128xf32>
    %167 = arith.negf %166 : vector<1x128xf32>
    %168 = math.exp %167 : vector<1x128xf32>
    %cst_30 = arith.constant 1.000000e+00 : f32
    %169 = vector.broadcast %cst_30 : f32 to vector<1x128xf32>
    %170 = arith.addf %169, %168 : vector<1x128xf32>
    %171 = arith.divf %169, %170 : vector<1x128xf32>
    %172 = vector.extract_strided_slice %0 {offsets = [5, 0], sizes = [1, 128], strides = [1, 1]} : vector<8x128xi32> to vector<1x128xi32>
    %173 = vector.extract_strided_slice %1 {offsets = [5, 0], sizes = [1, 128], strides = [1, 1]} : vector<8x128xi32> to vector<1x128xi32>
    %c64_i32_31 = arith.constant 64 : i32
    %174 = vector.broadcast %c64_i32_31 : i32 to vector<1x128xi32>
    %175 = arith.addi %173, %174 : vector<1x128xi32>
    %176 = vector.broadcast %172 : vector<1x128xi32> to vector<192x128xi32>
    %177 = arith.cmpi eq, %6, %176 : vector<192x128xi32>
    %178 = vector.broadcast %175 : vector<1x128xi32> to vector<192x128xi32>
    %179 = arith.cmpi eq, %6, %178 : vector<192x128xi32>
    %180 = arith.ori %177, %179 : vector<192x128xi1>
    %181 = arith.extui %180 : vector<192x128xi1> to vector<192x128xi32>
    %182 = arith.sitofp %181 : vector<192x128xi32> to vector<192x128xf32>
    %cst_32 = arith.constant dense<0.000000e+00> : vector<64x128xf32>
    %183 = tpu.matmul %3, %182, %cst_32 {dimension_numbers = #tpu.dot_dimension_numbers<[1], [0], [0], [1], [0, 0, 1, 1], [], []>} : vector<64x192xf32>, vector<192x128xf32>, vector<64x128xf32> -> vector<64x128xf32>
    %184 = vector.extract_strided_slice %183 {offsets = [0, 0], sizes = [32, 128], strides = [1, 1]} : vector<64x128xf32> to vector<32x128xf32>
    %185 = vector.extract_strided_slice %183 {offsets = [32, 0], sizes = [32, 128], strides = [1, 1]} : vector<64x128xf32> to vector<32x128xf32>
    %186 = arith.mulf %184, %185 : vector<32x128xf32>
    %cst_33 = arith.constant dense<0.000000e+00> : vector<128xf32>
    %187 = vector.multi_reduction <add>, %186, %cst_33 [0] : vector<32x128xf32> to vector<128xf32>
    %188 = vector.shape_cast %187 : vector<128xf32> to vector<1x128xf32>
    %189 = arith.negf %188 : vector<1x128xf32>
    %190 = math.exp %189 : vector<1x128xf32>
    %cst_34 = arith.constant 1.000000e+00 : f32
    %191 = vector.broadcast %cst_34 : f32 to vector<1x128xf32>
    %192 = arith.addf %191, %190 : vector<1x128xf32>
    %193 = arith.divf %191, %192 : vector<1x128xf32>
    %194 = vector.extract_strided_slice %2 {offsets = [5, 0], sizes = [1, 128], strides = [1, 1]} : vector<8x128xf32> to vector<1x128xf32>
    %195 = arith.mulf %193, %194 : vector<1x128xf32>
    %196 = vector.broadcast %4 : f32 to vector<1x128xf32>
    %197 = arith.mulf %195, %196 : vector<1x128xf32>
    %198 = vector.broadcast %5 : f32 to vector<1x128xf32>
    %199 = arith.addf %197, %198 : vector<1x128xf32>
    %200 = arith.negf %199 : vector<1x128xf32>
    %201 = math.exp %200 : vector<1x128xf32>
    %cst_35 = arith.constant 1.000000e+00 : f32
    %202 = vector.broadcast %cst_35 : f32 to vector<1x128xf32>
    %203 = arith.addf %202, %201 : vector<1x128xf32>
    %204 = arith.divf %202, %203 : vector<1x128xf32>
    %205 = vector.extract_strided_slice %0 {offsets = [6, 0], sizes = [1, 128], strides = [1, 1]} : vector<8x128xi32> to vector<1x128xi32>
    %206 = vector.extract_strided_slice %1 {offsets = [6, 0], sizes = [1, 128], strides = [1, 1]} : vector<8x128xi32> to vector<1x128xi32>
    %c64_i32_36 = arith.constant 64 : i32
    %207 = vector.broadcast %c64_i32_36 : i32 to vector<1x128xi32>
    %208 = arith.addi %206, %207 : vector<1x128xi32>
    %209 = vector.broadcast %205 : vector<1x128xi32> to vector<192x128xi32>
    %210 = arith.cmpi eq, %6, %209 : vector<192x128xi32>
    %211 = vector.broadcast %208 : vector<1x128xi32> to vector<192x128xi32>
    %212 = arith.cmpi eq, %6, %211 : vector<192x128xi32>
    %213 = arith.ori %210, %212 : vector<192x128xi1>
    %214 = arith.extui %213 : vector<192x128xi1> to vector<192x128xi32>
    %215 = arith.sitofp %214 : vector<192x128xi32> to vector<192x128xf32>
    %cst_37 = arith.constant dense<0.000000e+00> : vector<64x128xf32>
    %216 = tpu.matmul %3, %215, %cst_37 {dimension_numbers = #tpu.dot_dimension_numbers<[1], [0], [0], [1], [0, 0, 1, 1], [], []>} : vector<64x192xf32>, vector<192x128xf32>, vector<64x128xf32> -> vector<64x128xf32>
    %217 = vector.extract_strided_slice %216 {offsets = [0, 0], sizes = [32, 128], strides = [1, 1]} : vector<64x128xf32> to vector<32x128xf32>
    %218 = vector.extract_strided_slice %216 {offsets = [32, 0], sizes = [32, 128], strides = [1, 1]} : vector<64x128xf32> to vector<32x128xf32>
    %219 = arith.mulf %217, %218 : vector<32x128xf32>
    %cst_38 = arith.constant dense<0.000000e+00> : vector<128xf32>
    %220 = vector.multi_reduction <add>, %219, %cst_38 [0] : vector<32x128xf32> to vector<128xf32>
    %221 = vector.shape_cast %220 : vector<128xf32> to vector<1x128xf32>
    %222 = arith.negf %221 : vector<1x128xf32>
    %223 = math.exp %222 : vector<1x128xf32>
    %cst_39 = arith.constant 1.000000e+00 : f32
    %224 = vector.broadcast %cst_39 : f32 to vector<1x128xf32>
    %225 = arith.addf %224, %223 : vector<1x128xf32>
    %226 = arith.divf %224, %225 : vector<1x128xf32>
    %227 = vector.extract_strided_slice %2 {offsets = [6, 0], sizes = [1, 128], strides = [1, 1]} : vector<8x128xf32> to vector<1x128xf32>
    %228 = arith.mulf %226, %227 : vector<1x128xf32>
    %229 = vector.broadcast %4 : f32 to vector<1x128xf32>
    %230 = arith.mulf %228, %229 : vector<1x128xf32>
    %231 = vector.broadcast %5 : f32 to vector<1x128xf32>
    %232 = arith.addf %230, %231 : vector<1x128xf32>
    %233 = arith.negf %232 : vector<1x128xf32>
    %234 = math.exp %233 : vector<1x128xf32>
    %cst_40 = arith.constant 1.000000e+00 : f32
    %235 = vector.broadcast %cst_40 : f32 to vector<1x128xf32>
    %236 = arith.addf %235, %234 : vector<1x128xf32>
    %237 = arith.divf %235, %236 : vector<1x128xf32>
    %238 = vector.extract_strided_slice %0 {offsets = [7, 0], sizes = [1, 128], strides = [1, 1]} : vector<8x128xi32> to vector<1x128xi32>
    %239 = vector.extract_strided_slice %1 {offsets = [7, 0], sizes = [1, 128], strides = [1, 1]} : vector<8x128xi32> to vector<1x128xi32>
    %c64_i32_41 = arith.constant 64 : i32
    %240 = vector.broadcast %c64_i32_41 : i32 to vector<1x128xi32>
    %241 = arith.addi %239, %240 : vector<1x128xi32>
    %242 = vector.broadcast %238 : vector<1x128xi32> to vector<192x128xi32>
    %243 = arith.cmpi eq, %6, %242 : vector<192x128xi32>
    %244 = vector.broadcast %241 : vector<1x128xi32> to vector<192x128xi32>
    %245 = arith.cmpi eq, %6, %244 : vector<192x128xi32>
    %246 = arith.ori %243, %245 : vector<192x128xi1>
    %247 = arith.extui %246 : vector<192x128xi1> to vector<192x128xi32>
    %248 = arith.sitofp %247 : vector<192x128xi32> to vector<192x128xf32>
    %cst_42 = arith.constant dense<0.000000e+00> : vector<64x128xf32>
    %249 = tpu.matmul %3, %248, %cst_42 {dimension_numbers = #tpu.dot_dimension_numbers<[1], [0], [0], [1], [0, 0, 1, 1], [], []>} : vector<64x192xf32>, vector<192x128xf32>, vector<64x128xf32> -> vector<64x128xf32>
    %250 = vector.extract_strided_slice %249 {offsets = [0, 0], sizes = [32, 128], strides = [1, 1]} : vector<64x128xf32> to vector<32x128xf32>
    %251 = vector.extract_strided_slice %249 {offsets = [32, 0], sizes = [32, 128], strides = [1, 1]} : vector<64x128xf32> to vector<32x128xf32>
    %252 = arith.mulf %250, %251 : vector<32x128xf32>
    %cst_43 = arith.constant dense<0.000000e+00> : vector<128xf32>
    %253 = vector.multi_reduction <add>, %252, %cst_43 [0] : vector<32x128xf32> to vector<128xf32>
    %254 = vector.shape_cast %253 : vector<128xf32> to vector<1x128xf32>
    %255 = arith.negf %254 : vector<1x128xf32>
    %256 = math.exp %255 : vector<1x128xf32>
    %cst_44 = arith.constant 1.000000e+00 : f32
    %257 = vector.broadcast %cst_44 : f32 to vector<1x128xf32>
    %258 = arith.addf %257, %256 : vector<1x128xf32>
    %259 = arith.divf %257, %258 : vector<1x128xf32>
    %260 = vector.extract_strided_slice %2 {offsets = [7, 0], sizes = [1, 128], strides = [1, 1]} : vector<8x128xf32> to vector<1x128xf32>
    %261 = arith.mulf %259, %260 : vector<1x128xf32>
    %262 = vector.broadcast %4 : f32 to vector<1x128xf32>
    %263 = arith.mulf %261, %262 : vector<1x128xf32>
    %264 = vector.broadcast %5 : f32 to vector<1x128xf32>
    %265 = arith.addf %263, %264 : vector<1x128xf32>
    %266 = arith.negf %265 : vector<1x128xf32>
    %267 = math.exp %266 : vector<1x128xf32>
    %cst_45 = arith.constant 1.000000e+00 : f32
    %268 = vector.broadcast %cst_45 : f32 to vector<1x128xf32>
    %269 = arith.addf %268, %267 : vector<1x128xf32>
    %270 = arith.divf %268, %269 : vector<1x128xf32>
    %271 = tpu.concatenate %39, %72, %105, %138, %171, %204, %237, %270 in 0 : vector<1x128xf32>, vector<1x128xf32>, vector<1x128xf32>, vector<1x128xf32>, vector<1x128xf32>, vector<1x128xf32>, vector<1x128xf32>, vector<1x128xf32> -> vector<8x128xf32>
    %c0_46 = arith.constant 0 : index
    %c0_47 = arith.constant 0 : index
    %272 = vector.load %arg6[%c0_46, %c0_47] : memref<8x128xf32, #tpu.memory_space<vmem>>, vector<8x128xf32>
    tpu.vector_store %arg6[%c0_46, %c0_47], %271 {strides = array<i32>} : memref<8x128xf32, #tpu.memory_space<vmem>>, vector<8x128xf32>,
    return
  }
  func.func @transform_0(%arg0: i32) -> (i32, i32) {
    %c0_i32 = arith.constant 0 : i32
    %c0_i32_0 = arith.constant 0 : i32
    return %arg0, %c0_i32 : i32, i32
  }
  func.func @transform_1(%arg0: i32) -> (i32, i32) {
    %c0_i32 = arith.constant 0 : i32
    %c0_i32_0 = arith.constant 0 : i32
    return %arg0, %c0_i32 : i32, i32
  }
  func.func @transform_2(%arg0: i32) -> (i32, i32) {
    %c0_i32 = arith.constant 0 : i32
    %c0_i32_0 = arith.constant 0 : i32
    return %arg0, %c0_i32 : i32, i32
  }
  func.func @transform_3(%arg0: i32) -> (i32, i32) {
    %c0_i32 = arith.constant 0 : i32
    %c0_i32_0 = arith.constant 0 : i32
    %c0_i32_1 = arith.constant 0 : i32
    return %c0_i32, %c0_i32_0 : i32, i32
  }
  func.func @transform_4(%arg0: i32) -> i32 {
    %c0_i32 = arith.constant 0 : i32
    %c0_i32_0 = arith.constant 0 : i32
    return %c0_i32 : i32
  }
  func.func @transform_5(%arg0: i32) -> (i32, i32) {
    %c0_i32 = arith.constant 0 : i32
    %c0_i32_0 = arith.constant 0 : i32
    return %arg0, %c0_i32 : i32, i32
  }
}

</mosaic_0001>

<bundles_post_ra>
// kernel: tpu_custom_call.1
= control target key start
LH: loop header
LB: loop body
LE: loop exit
PB: predicated region body
PF: predicated region fallthrough
CT: control target
= control target key end

     0   :  { %s5551_s0 = inlined_call_operand.hbm [shape: s32[16,128], index: 0, kind: input, shape index: {}]   ;;  %s5552_s1 = inlined_call_operand.hbm [shape: s32[16,128], index: 1, kind: input, shape index: {}]   ;;  %s5553_s2 = inlined_call_operand.hbm [shape: f32[16,128], index: 2, kind: input, shape index: {}]   ;;  %s5554_s3 = inlined_call_operand.hbm [shape: f32[64,192], index: 3, kind: input, shape index: {}]   ;;  %s5555_s4 = inlined_call_operand.vmem [shape: f32[2], index: 4, kind: input, shape index: {}]   ;;  %s5556_s5 = inlined_call_operand.hbm [shape: f32[16,128], index: 5, kind: output, shape index: {}]  }
   0x1   :  { %5567 = sst [smem:[#allocation20_spill]] %s5552_s1 }
   0x2   :  { %5568 = sst [smem:[#allocation21_spill]] %s5555_s4 }
   0x3   :  { %10 = vsyncpa [#allocation3], 0 }
   0x4   :  { %12 = vsyncpa [#allocation3 + $0x1], 0 }
   0x5   :  { %13 = vsyncpa [#allocation7], 0 }
   0x6   :  { %15 = vsyncpa [#allocation7 + $0x1], 0 }
   0x7   :  { %16 = vsyncpa [#allocation10], 0 }
   0x8   :  { %17 = vsyncpa [#allocation5], 0 }
   0x9   :  { %18 = vsyncpa [#allocation4], 0 }
   0xa   :  { %20 = vsyncpa [#allocation4 + $0x1], 0  ;;  %s3856_s18 = smov 0   ;;  %s3858_s19 = smov 0  }
   0xb   :  { %s3860_s20 = smov 0   ;;  %s3862_s21 = smov 0  }
   0xc LB: > { %s3877_s22 = sadd.s32 1, %s3814_s21   ;;  %s33_s23 = sadd.s32 1, %s3810_s20  ;;  %s3814_s21 = sphi %s3862_s21, %s5593_s21   ;;  %s3810_s20 = sphi %s3860_s20, %s5597_s20   ;;  %s3806_s19 = sphi %s3858_s19, %s5596_s19   ;;  %s3802_s18 = sphi %s3856_s18, %s5595_s18  }
   0xd   : > { %5569 = sst [smem:[#allocation18_spill]] %s3877_s22  ;;  %s30_s24 = ssub.s32 %s3814_s21, %s3877_s22 }
   0xe   : > { %p5557_p0 = scmp.ne.s32.totalorder %s3810_s20, %s3806_s19  ;;  %p31_p1 = scmp.eq.s32.totalorder %s30_s24, 0 }
   0xf   : > { %p41_p2 = scmp.eq.s32.totalorder %s3814_s21, 0  ;;  %p3480_p4 = scmp.lt.s32.totalorder %s3814_s21, 2 }
  0x10   : > { %s3888_s25 = scalar_select %p31_p1, %s3810_s20, %s33_s23  }
  0x11   : > { %p42_p5 = por %p41_p2, %p5557_p0  ;;  %s5558_s26 = sand.u32 1, %s3810_s20  }
  0x12   : > { %5570 = sst [smem:[#allocation19_spill]] %s3888_s25  ;;  %s3896_s27 = sshll.u32 %s5558_s26, 3 }
  0x13   : > { %s3899_s28 = sshll.u32 %s3814_s21, 7  ;;  %p3901_p6 = pnand %p3480_p4, %p42_p5 }
  0x14   : > { %s232_s30 = sand.u32 1, %s3814_s21   ;;  %s5572_s1 = sld [smem:[#allocation20_spill]] }
  0x15   : > { %s5571_s29 = scalar_select %p3901_p6, 1, 0 }
  0x16   : > { %s236_s9 = scalar_lea.vmem [#allocation6], %s3896_s27  ;;  %s3915_s11 = scalar_lea.sflag [#allocation7], %s232_s30 }
  0x17   : > { %s243_s10 = sshll.u32 %s236_s9, 4  ;;  %p3921_p8 = pneg %p3901_p6  ;;  %s3913_s10 = int_to_ptr.vmem [resolvable:$true] %s243_s10 }
  0x1a   : > { %s3910_s8 = scalar_lea.hbm %s5572_s1, %s3899_s28  ;;  %s3608_s16 = scalar_lea.hbm %s5572_s1, 256 }
  0x1b   : > { %s3603_s12 = scalar_lea.hbm %s3910_s8, 128  ;;  %p3609_p11 = scmp.lt.u32.totalorder %s3910_s8, %s5572_s1 }
  0x1c   : > { %p3604_p7 = scmp.ne.s32.totalorder %s3910_s8, %s3603_s12  ;;  %p3610_p12 = scmp.lt.u32.totalorder %s3608_s16, %s3603_s12 }
  0x1d   : > { %p3612_p1 = scmp.lt.u32.totalorder %s3603_s12, %s3910_s8 }
  0x1e   : > { %p3606_p9 = pnand %p3921_p8, %p3604_p7  ;;  %p3611_p13 = por %p3610_p12, %p3609_p11 }
  0x20   : > { %p3607_p10 = pneg %p3606_p9  ;;  %p3613_p2 = por %p3612_p1, %p3611_p13 }
  0x22   : > { %p3614_p4 = pnand %p3613_p2, %p3607_p10 }
  0x24   : > { %3617 = shalt.err (!%p3614_p4)
}
  0x25   : > { %s3618_s24 = scalar_lea.vmem %s3913_s10, 128  ;;  %s3816_s30 = smov [#allocation6]  }
  0x26   : > { %p3619_p5 = scmp.ne.s32.totalorder %s3913_s10, %s3618_s24  ;;  %s3623_s6 = sshll.u32 %s3816_s30, 4  ;;  %s3624_s6 = int_to_ptr.vmem [resolvable:$false] %s3623_s6 }
  0x27   : > { %s3625_s7 = scalar_lea.vmem %s3624_s6, 256  ;;  %p3626_p3 = scmp.lt.s32.totalorder %s3913_s10, %s3624_s6 }
  0x28   : > { %p3621_p7 = pnand %p3619_p5, %p3921_p8  ;;  %p3627_p0 = scmp.lt.s32.totalorder %s3625_s7, %s3618_s24 }
  0x2a   : > { %p3622_p9 = pneg %p3621_p7  ;;  %p3628_p11 = por %p3627_p0, %p3626_p3 }
  0x2c   : > { %p3629_p12 = pnand %p3628_p11, %p3622_p9 }
  0x2e   : > { %3632 = shalt.err (!%p3629_p12)
}
  0x2f   : > { %3470 = dma.hbm_to_vmem [thread:$0]  (!%p3901_p6), %s3910_s8, 128, %s3913_s10, %s3915_s11  }
  0x30   : > { %s3946_s9 = sadd.s32 4294967295, %s3814_s21   ;;  %s2666_s12 = sadd.s32 4294967294, %s3814_s21  }
  0x31   : > { %p46_p0 = scmp.ne.s32.totalorder %s3806_s19, %s3802_s18  ;;  %p5561_p3 = scmp.eq.s32.totalorder %s3946_s9, 0 }
  0x32   : > { %p164_p10 = scmp.eq.s32.totalorder %s3946_s9, 1  ;;  %p170_p13 = scmp.eq.s32.totalorder %s2666_s12, 1 }
  0x33   : > { %p3955_p1 = por %p5561_p3, %p46_p0  ;;  %p2667_p2 = scmp.ge.s32.totalorder %s3814_s21, 1 }
  0x34   : > { %p5575_p4 = scmp.ne.s32.totalorder %s3810_s20, %s3806_s19  ;;  %p3967_p7 = por %p170_p13, %p46_p0 }
  0x35   : > { %s5574_s14 = scalar_select %p3955_p1, 1, 0 }
  0x36   : > { %p3963_p5 = por %p164_p10, %p5575_p4  ;;  %p177_p9 = scmp.lt.s32.totalorder %s3814_s21, 3 }
  0x37   : > { %s5577_s10 = scalar_select %p3967_p7, 1, 0 }
  0x38   : > { %s5576_s8 = scalar_select %p3963_p5, 1, 0 }
  0x39   : > { %p3972_p11 = pnand %p2667_p2, %p177_p9  ;;  %s3817_s16 = smov [#allocation9]  }
  0x3a   : > { %s189_s17 = sshll.u32 %s3817_s16, 4  ;;  %s5579_s4 = sld [smem:[#allocation21_spill]]  ;;  %s3976_s17 = int_to_ptr.vmem [resolvable:$true] %s189_s17 }
  0x3b   : > { %s5578_s15 = scalar_select %p3972_p11, 1, 0 }
  0x3c   : > { %p3457_p12 = pneg %p3972_p11  ;;  %s3995_s16 = scalar_lea.hbm %s5551_s0, %s3899_s28 }
  0x3d   : > { %s218_s26 = scalar_lea.vmem [#allocation2], %s3896_s27  ;;  %s3633_s24 = scalar_lea.hbm %s5554_s3, 2048 }
  0x3e   : > { %p3987_p0 = pnand %p3457_p12, %p5561_p3  ;;  %s3998_s1 = sshll.u32 %s218_s26, 4  ;;  %s226_s1 = int_to_ptr.vmem [resolvable:$true] %s3998_s1 }
  0x3f   : > { %p3634_p10 = scmp.ne.s32.totalorder %s5554_s3, %s3633_s24  ;;  %p3640_p9 = scmp.lt.u32.totalorder %s3633_s24, %s5554_s3 }
  0x40   : > { %s203_s30 = sshll.u32 %s5579_s4, 4  ;;  %p3635_p13 = pneg %p3987_p0  ;;  %s3983_s30 = int_to_ptr.vmem [resolvable:$true] %s203_s30 }
  0x42   : > { %p3636_p2 = pnand %p3635_p13, %p3634_p10 }
  0x44   : > { %p3637_p4 = pneg %p3636_p2 }
  0x46   : > { %p3642_p12 = pnand %p3640_p9, %p3637_p4 }
  0x48   : > { %3645 = shalt.err (!%p3642_p12)
}
  0x49   : > { %s3646_s25 = scalar_lea.vmem %s3976_s17, 2048  ;;  %p3654_p1 = scmp.lt.s32.totalorder %s3976_s17, %s3976_s17 }
  0x4a   : > { %p3647_p3 = scmp.ne.s32.totalorder %s3976_s17, %s3646_s25  ;;  %p3655_p10 = scmp.lt.s32.totalorder %s3646_s25, %s3646_s25 }
  0x4c   : > { %p3649_p7 = pnand %p3647_p3, %p3635_p13  ;;  %p3656_p2 = por %p3655_p10, %p3654_p1 }
  0x4e   : > { %p3650_p5 = pneg %p3649_p7 }
  0x50   : > { %p3657_p11 = pnand %p3656_p2, %p3650_p5 }
  0x52   : > { %3660 = shalt.err (!%p3657_p11)
}
  0x53   : > { %s3818_s4 = smov 256   ;;  %s3819_s22 = smov 16  }
  0x54   : > { %3460 = dma.hbm_to_vmem [thread:$0]  (!%p3987_p0), %s5554_s3, 2048, %s3976_s17, [#allocation10], %s3818_s4, %s3818_s4, %s3819_s22  }
  0x55   : > { %s3661_s24 = scalar_lea.vmem %s3983_s30, 16  ;;  %p3669_p7 = scmp.lt.s32.totalorder %s3983_s30, %s3983_s30 }
  0x56   : > { %p3662_p3 = scmp.ne.s32.totalorder %s3983_s30, %s3661_s24  ;;  %p3670_p11 = scmp.lt.s32.totalorder %s3661_s24, %s3661_s24 }
  0x58   : > { %p3664_p1 = pnand %p3662_p3, %p3635_p13  ;;  %p3671_p4 = por %p3670_p11, %p3669_p7 }
  0x5a   : > { %p3665_p5 = pneg %p3664_p1 }
  0x5c   : > { %p3672_p9 = pnand %p3671_p4, %p3665_p5 }
  0x5e   : > { %3675 = shalt.err (!%p3672_p9)
}
  0x5f   : > { %s3820_s7 = smov [#allocation11]   ;;  %s5581_s17 = sand.u32 1, %s3810_s20  }
  0x60   : > { %3463 = dma.vmem_to_smem (!%p3987_p0), %s3983_s30, 16, %s3820_s7, [#allocation5]  }
  0x61   : > { %s215_s12 = scalar_lea.sflag [#allocation3], %s5581_s17  ;;  %s3676_s25 = scalar_lea.hbm %s3995_s16, 128 }
  0x62   : > { %p3677_p13 = scmp.ne.s32.totalorder %s3995_s16, %s3676_s25  ;;  %s3681_s6 = scalar_lea.hbm %s5551_s0, 256 }
  0x63   : > { %p3682_p2 = scmp.lt.u32.totalorder %s3995_s16, %s5551_s0  ;;  %p3683_p3 = scmp.lt.u32.totalorder %s3681_s6, %s3676_s25 }
  0x64   : > { %p3679_p12 = pnand %p3677_p13, %p3921_p8  ;;  %p3685_p5 = scmp.lt.u32.totalorder %s3676_s25, %s3995_s16 }
  0x65   : > { %p3684_p1 = por %p3683_p3, %p3682_p2 }
  0x66   : > { %p3680_p10 = pneg %p3679_p12 }
  0x67   : > { %p3686_p0 = por %p3685_p5, %p3684_p1 }
  0x69   : > { %p3687_p7 = pnand %p3686_p0, %p3680_p10 }
  0x6b   : > { %3690 = shalt.err (!%p3687_p7)
}
  0x6c   : > { %s3691_s30 = scalar_lea.vmem %s226_s1, 128  ;;  %s3821_s24 = smov [#allocation2]  }
  0x6d   : > { %p3692_p11 = scmp.ne.s32.totalorder %s226_s1, %s3691_s30  ;;  %s3696_s7 = sshll.u32 %s3821_s24, 4  ;;  %s3697_s7 = int_to_ptr.vmem [resolvable:$false] %s3696_s7 }
  0x6e   : > { %s3698_s17 = scalar_lea.vmem %s3697_s7, 256  ;;  %p3699_p13 = scmp.lt.s32.totalorder %s226_s1, %s3697_s7 }
  0x6f   : > { %p3694_p4 = pnand %p3692_p11, %p3921_p8  ;;  %p3700_p12 = scmp.lt.s32.totalorder %s3698_s17, %s3691_s30 }
  0x71   : > { %p3695_p9 = pneg %p3694_p4  ;;  %p3701_p6 = por %p3700_p12, %p3699_p13 }
  0x73   : > { %p3702_p2 = pnand %p3701_p6, %p3695_p9 }
  0x75   : > { %3705 = shalt.err (!%p3702_p2)
}
  0x76   : > { %p5582_p3 = scmp.ne.s32.totalorder %s5571_s29, 0  ;;  %s4061_s22 = scalar_lea.hbm %s5553_s2, %s3899_s28 }
  0x77   : > { %s254_s6 = scalar_lea.vmem [#allocation8], %s3896_s27  ;;  %s3706_s23 = scalar_lea.hbm %s4061_s22, 128 }
  0x78   : > { %3467 = dma.hbm_to_vmem [thread:$0]  (!%p5582_p3), %s3995_s16, 128, %s226_s1, %s215_s12  }
  0x79   : > { %s261_s26 = sshll.u32 %s254_s6, 4  ;;  %p3707_p6 = scmp.ne.s32.totalorder %s4061_s22, %s3706_s23  ;;  %s262_s26 = int_to_ptr.vmem [resolvable:$true] %s261_s26 }
  0x7a   : > { %s3711_s1 = scalar_lea.hbm %s5553_s2, 256  ;;  %p3712_p5 = scmp.lt.u32.totalorder %s4061_s22, %s5553_s2 }
  0x7b   : > { %p3709_p10 = pnand %p3707_p6, %p3921_p8  ;;  %p3713_p0 = scmp.lt.u32.totalorder %s3711_s1, %s3706_s23 }
  0x7c   : > { %p3715_p11 = scmp.lt.u32.totalorder %s3706_s23, %s4061_s22 }
  0x7d   : > { %p3710_p1 = pneg %p3709_p10  ;;  %p3714_p7 = por %p3713_p0, %p3712_p5 }
  0x7f   : > { %p3716_p4 = por %p3715_p11, %p3714_p7 }
  0x81   : > { %p3717_p9 = pnand %p3716_p4, %p3710_p1 }
  0x83   : > { %3720 = shalt.err (!%p3717_p9)
}
  0x84   : > { %s3721_s27 = scalar_lea.vmem %s262_s26, 128  ;;  %s3822_s28 = smov [#allocation8]  }
  0x85   : > { %p3722_p13 = scmp.ne.s32.totalorder %s262_s26, %s3721_s27  ;;  %s3726_s7 = sshll.u32 %s3822_s28, 4  ;;  %s3727_s7 = int_to_ptr.vmem [resolvable:$false] %s3726_s7 }
  0x86   : > { %s3728_s17 = scalar_lea.vmem %s3727_s7, 256  ;;  %p3729_p6 = scmp.lt.s32.totalorder %s262_s26, %s3727_s7 }
  0x87   : > { %p3724_p12 = pnand %p3722_p13, %p3921_p8  ;;  %p3730_p10 = scmp.lt.s32.totalorder %s3728_s17, %s3721_s27 }
  0x89   : > { %p3725_p2 = pneg %p3724_p12  ;;  %p3731_p3 = por %p3730_p10, %p3729_p6 }
  0x8b   : > { %p3732_p0 = pnand %p3731_p3, %p3725_p2 }
  0x8d   : > { %3735 = shalt.err (!%p3732_p0)
}
  0x8e   : > { %p5583_p5 = scmp.ne.s32.totalorder %s5571_s29, 0  ;;  %p5584_p1 = scmp.ne.s32.totalorder %s5578_s15, 0 }
  0x8f   : > { %s4085_s13 = sand.u32 (!%p5584_p1), 1, %s3806_s19   ;;  %p5585_p8 = scmp.ne.s32.totalorder (!%p5584_p1), %s5574_s14, 0 }
  0x90   : > { %3473 = dma.hbm_to_vmem [thread:$0]  (!%p5583_p5), %s4061_s22, 128, %s262_s26, %s3915_s11  }
  0x91   : > { %270 = sbr.rel (%p5584_p1) target bundleno = 794 (0x31a), region = 40  ;;  %s4088_s25 = sshll.u32 (!%p5584_p1), %s4085_s13, 3 }
  0x92   : > { %s273_s4 = scalar_lea.sflag (!%p5584_p1), [#allocation3], %s4085_s13  ;;  %s276_s6 = scalar_lea.vmem (!%p5584_p1), [#allocation2], %s4088_s25 }
  0x98   : > { %3781 = dma.done.wait (%p5585_p8), %s273_s4, 128  }
  0x99   : > { %3783 = vsyncadd (%p5585_p8), %s273_s4, 4294967168  ;;  %s281_s29 = sand.u32 1, %s3946_s9   ;;  %s285_s15 = scalar_lea.vmem [#allocation6], %s4088_s25 }
  0x9a   : > { %s282_s11 = scalar_lea.sflag [#allocation7], %s281_s29 }
  0x9b   : > { %3785 = dma.done.wait (%p5585_p8), %s282_s11, 256  }
  0x9c   : > { %3787 = vsyncadd (%p5585_p8), %s282_s11, 4294967040  ;;  %s294_s22 = scalar_lea.vmem [#allocation8], %s4088_s25  ;;  %p5586_p3 = scmp.eq.s32.totalorder %s3946_s9, 0 }
  0x9e   : > { %3789 = dma.done.wait (%p5586_p3), [#allocation10], 2048   ;;  %p5587_p7 = pmov %p5586_p3 }
  0x9f   : > { %p5588_p11 = pmov %p5586_p3 }
  0xa0   : > { %3791 = vsyncadd (%p5587_p7), [#allocation10], 4294965248 }
  0xa1   : > { %3793 = dma.done.wait (%p5588_p11), [#allocation5], 16   ;;  %p5589_p4 = pmov %p5586_p3 }
  0xa3   : > { %3795 = vsyncadd (%p5589_p4), [#allocation5], 4294967280 }
  0xa4   : > { %307 = sfence }
  0xa5   : > { %v341_v0 = vld [vmem:[%s285_s15] sm:$0xff]  ;;  %v361_v1 = vlaneseq  ;;  %v3823_v3 = vmov 0.0|0.0   ;;  %vm515_vm0 = vcmask 523264   ;;  %v4125_v6 = vld [vmem:[%s276_s6] sm:$0xff]  ;;  %v3824_v16 = vmov 1.0|1.0  }
  0xa6   : > { %v4111_v2 = vld [vmem:[#allocation9 + $0x8] sm:$0xff]  ;;  %3153 = vmatprep.subr.bf16.mxu0 %v3823_v3  ;;  %3189 = vmatprep.subr.bf16.mxu1 %v3823_v3  ;;  %v4117_v5 = vadd.s32 64, %v341_v0  ;;  %v4461_v43 = vld [vmem:[#allocation9] sm:$0xff]  ;;  %v4472_v44 = vld [vmem:[#allocation9 + $0x18] sm:$0xff]  ;;  %s359_s14 = sld [smem:[#allocation11]]  ;;  %s2684_s26 = sld [smem:[#allocation11 + $0x1]] }
  0xa7   : > { %v4115_v4 = vshrl.u32 %v361_v1, 7  ;;  %2733 = vmatprep.mubr.msk.f32.mxu0 %vm515_vm0, %v4111_v2  ;;  %2791 = vmatprep.mubr.msk.f32.mxu1 %vm515_vm0, %v4111_v2  ;;  %v4487_v45 = vld [vmem:[#allocation9 + $0x10] sm:$0xff]  ;;  %v4489_v46 = vld [vmem:[#allocation9 + $0x28] sm:$0xff]  ;;  %v4507_v47 = vld [vmem:[#allocation9 + $0x20] sm:$0xff]  ;;  %s3150_s23 = sshll.u32 %s3946_s9, 7  ;;  %s339_s30 = scalar_lea.vmem [#allocation12], %s4088_s25 }
  0xa8   : > { %v4514_v48 = vld [vmem:[#allocation9 + $0x38] sm:$0xff]  ;;  %v4537_v49 = vld [vmem:[#allocation9 + $0x30] sm:$0xff]  ;;  %v4540_v50 = vld [vmem:[#allocation9 + $0x48] sm:$0xff]  ;;  %s2531_s24 = sshll.u32 %s339_s30, 4  ;;  %s5507_s12 = scalar_lea.hbm %s5556_s5, %s3150_s23  ;;  %s5509_s24 = int_to_ptr.vmem [resolvable:$true] %s2531_s24 }
  0xa9   : > { %v4128_v7 = vadd.s32 8, %v4115_v4  ;;  %v389_v8 = vsub.s32 0, %v4115_v4  ;;  %v677_v9 = vsub.s32 1, %v4115_v4  ;;  %v4145_v14 = vadd.s32 16, %v4115_v4  ;;  %v4557_v51 = vld [vmem:[#allocation9 + $0x40] sm:$0xff]  ;;  %v4565_v52 = vld [vmem:[#allocation9 + $0x58] sm:$0xff] }
  0xaa   : > { %v4160_v15 = vadd.s32 24, %v4115_v4  ;;  %v4177_v17 = vadd.s32 32, %v4115_v4  ;;  %v4185_v18 = vadd.s32 40, %v4115_v4  ;;  %v4203_v19 = vadd.s32 48, %v4115_v4  ;;  %v4588_v53 = vld [vmem:[#allocation9 + $0x50] sm:$0xff]  ;;  %v4592_v54 = vld [vmem:[#allocation9 + $0x68] sm:$0xff] }
  0xab   : > { %v4133_v10 = vrot.slane %v4125_v6, %v389_v8  ;;  %v4136_v11 = vrot.slane %v4117_v5, %v389_v8  ;;  %v4139_v12 = vrot.slane %v4125_v6, %v677_v9  ;;  %v4142_v13 = vrot.slane %v4117_v5, %v677_v9  ;;  %v4608_v55 = vld [vmem:[#allocation9 + $0x60] sm:$0xff]  ;;  %v4622_v56 = vld [vmem:[#allocation9 + $0x78] sm:$0xff]  ;;  %v4631_v57 = vld [vmem:[#allocation9 + $0x70] sm:$0xff]  ;;  %s2518_s27 = scalar_lea.sflag [#allocation4], %s4085_s13  ;;  %s3736_s28 = scalar_lea.vmem %s5509_s24, 128 }
  0xac   : > { %v4211_v20 = vadd.s32 56, %v4115_v4  ;;  %v4229_v21 = vadd.s32 64, %v4115_v4  ;;  %v4237_v22 = vadd.s32 72, %v4115_v4  ;;  %v4255_v23 = vadd.s32 80, %v4115_v4  ;;  %v4788_v62 = vld [vmem:[%s276_s6] sm:$0xff]  ;;  %v4960_v1 = vld [vmem:[#allocation9 + $0x8] sm:$0xff]  ;;  %p3737_p9 = scmp.ne.s32.totalorder %s5509_s24, %s3736_s28 }
  0xad   : > { %vm391_vm1 = vcmp.eq.s32.totalorder %v4115_v4, %v4133_v10  ;;  %vm392_vm2 = vcmp.eq.s32.totalorder %v4128_v7, %v4133_v10  ;;  %vm419_vm3 = vcmp.eq.s32.totalorder %v4115_v4, %v4136_v11  ;;  %vm420_vm4 = vcmp.eq.s32.totalorder %v4128_v7, %v4136_v11  ;;  %p5590_p13 = scmp.ne.s32.totalorder %s5576_s8, 0  ;;  %s3825_s9 = smov [#allocation12]  }
  0xae   : > { %vm443_vm5 = vmor %vm391_vm1, %vm419_vm3  ;;  %vm679_vm6 = vcmp.eq.s32.totalorder %v4115_v4, %v4139_v12  ;;  %vm707_vm7 = vcmp.eq.s32.totalorder %v4115_v4, %v4142_v13  ;;  %vm680_vm9 = vcmp.eq.s32.totalorder %v4128_v7, %v4139_v12  ;;  %vm708_vm10 = vcmp.eq.s32.totalorder %v4128_v7, %v4142_v13  ;;  %s3740_s7 = sshll.u32 %s3825_s9, 4  ;;  %s3741_s7 = int_to_ptr.vmem [resolvable:$false] %s3740_s7 }
  0xaf   : > { %vm444_vm8 = vmor %vm392_vm2, %vm420_vm4  ;;  %vm393_vm13 = vcmp.eq.s32.totalorder %v4145_v14, %v4133_v10  ;;  %vm421_vm14 = vcmp.eq.s32.totalorder %v4145_v14, %v4136_v11  ;;  %vm394_vm1 = vcmp.eq.s32.totalorder %v4160_v15, %v4133_v10  ;;  %vm422_vm2 = vcmp.eq.s32.totalorder %v4160_v15, %v4136_v11  ;;  %p3738_p12 = pnand %p3737_p9, %p5590_p13  ;;  %s3742_s17 = scalar_lea.vmem %s3741_s7, 256 }
  0xb0   : > { %vm3154_vm11 = vmpackc.low %vm444_vm8, %vm443_vm5  ;;  %vm681_vm5 = vcmp.eq.s32.totalorder %v4145_v14, %v4139_v12  ;;  %vm682_vm8 = vcmp.eq.s32.totalorder %v4160_v15, %v4139_v12  ;;  %v4263_v24 = vadd.s32 88, %v4115_v4  ;;  %v4281_v25 = vadd.s32 96, %v4115_v4  ;;  %p3743_p6 = scmp.lt.s32.totalorder %s5509_s24, %s3741_s7  ;;  %p3744_p10 = scmp.lt.s32.totalorder %s3742_s17, %s3736_s28 }
  0xb1   : > { %3155 = vmatpush1.bf16.msk.msra.mxu0 %vm3154_vm11, %v3824_v16  ;;  %vm731_vm12 = vmor %vm679_vm6, %vm707_vm7  ;;  %vm709_vm6 = vcmp.eq.s32.totalorder %v4145_v14, %v4142_v13  ;;  %v4289_v26 = vadd.s32 104, %v4115_v4  ;;  %v4307_v27 = vadd.s32 112, %v4115_v4  ;;  %v4315_v28 = vadd.s32 120, %v4115_v4  ;;  %p3739_p2 = pneg %p3738_p12 }
  0xb2   : > { %vm732_vm15 = vmor %vm680_vm9, %vm708_vm10  ;;  %3156 = vmatprep.subr.bf16.mxu0 %v3823_v3  ;;  %vm710_vm9 = vcmp.eq.s32.totalorder %v4160_v15, %v4142_v13  ;;  %v4333_v29 = vadd.s32 128, %v4115_v4  ;;  %v4341_v30 = vadd.s32 136, %v4115_v4  ;;  %v4359_v31 = vadd.s32 144, %v4115_v4  ;;  %p3745_p0 = por %p3744_p10, %p3743_p6 }
  0xb3   : > { %vm3190_vm3 = vmpackc.low %vm732_vm15, %vm731_vm12  ;;  %vm395_vm12 = vcmp.eq.s32.totalorder %v4177_v17, %v4133_v10  ;;  %vm396_vm15 = vcmp.eq.s32.totalorder %v4185_v18, %v4133_v10  ;;  %v4367_v32 = vadd.s32 152, %v4115_v4  ;;  %v4385_v33 = vadd.s32 160, %v4115_v4 }
  0xb4   : > { %3191 = vmatpush1.bf16.msk.msra.mxu1 %vm3190_vm3, %v3824_v16  ;;  %vm445_vm4 = vmor %vm393_vm13, %vm421_vm14  ;;  %vm423_vm13 = vcmp.eq.s32.totalorder %v4177_v17, %v4136_v11  ;;  %v4393_v34 = vadd.s32 168, %v4115_v4  ;;  %v4411_v35 = vadd.s32 176, %v4115_v4  ;;  %v4419_v36 = vadd.s32 184, %v4115_v4  ;;  %p3746_p5 = pnand %p3745_p0, %p3739_p2 }
  0xb5   : > { %3192 = vmatprep.subr.bf16.mxu1 %v3823_v3  ;;  %vm446_vm7 = vmor %vm394_vm1, %vm422_vm2  ;;  %vm424_vm1 = vcmp.eq.s32.totalorder %v4185_v18, %v4136_v11  ;;  %v938_v37 = vsub.s32 2, %v4115_v4  ;;  %v1199_v38 = vsub.s32 3, %v4115_v4  ;;  %v1460_v58 = vsub.s32 4, %v4115_v4 }
  0xb6   : > { %vm3157_vm10 = vmpackc.low %vm446_vm7, %vm445_vm4  ;;  %vm683_vm4 = vcmp.eq.s32.totalorder %v4177_v17, %v4139_v12  ;;  %vm684_vm7 = vcmp.eq.s32.totalorder %v4185_v18, %v4139_v12  ;;  %v1721_v59 = vsub.s32 5, %v4115_v4 }
  0xb7   : > { %3158 = vmatpush1.bf16.msk.msra.mxu0 %vm3157_vm10, %v3824_v16  ;;  %vm733_vm11 = vmor %vm681_vm5, %vm709_vm6  ;;  %vm711_vm5 = vcmp.eq.s32.totalorder %v4177_v17, %v4142_v13  ;;  %v4439_v39 = vrot.slane %v4125_v6, %v938_v37  ;;  %v4442_v40 = vrot.slane %v4117_v5, %v938_v37  ;;  %v4455_v41 = vrot.slane %v4125_v6, %v1199_v38  ;;  %v5193_v37 = vld [vmem:[#allocation9 + $0x48] sm:$0xff] }
  0xb8   : > { %vm734_vm14 = vmor %vm682_vm8, %vm710_vm9  ;;  %3159 = vmatprep.subr.bf16.mxu0 %v3823_v3  ;;  %vm712_vm8 = vcmp.eq.s32.totalorder %v4185_v18, %v4142_v13  ;;  %v4458_v42 = vrot.slane %v4117_v5, %v1199_v38  ;;  %v4771_v60 = vrot.slane %v4125_v6, %v1460_v58  ;;  %v4774_v61 = vrot.slane %v4117_v5, %v1460_v58  ;;  %v5260_v38 = vld [vmem:[#allocation9 + $0x60] sm:$0xff] }
  0xb9   : > { %vm3193_vm2 = vmpackc.low %vm734_vm14, %vm733_vm11  ;;  %vm397_vm11 = vcmp.eq.s32.totalorder %v4203_v19, %v4133_v10  ;;  %vm398_vm14 = vcmp.eq.s32.totalorder %v4211_v20, %v4133_v10  ;;  %v4791_v63 = vrot.slane %v4788_v62, %v1721_v59  ;;  %v4794_v0 = vrot.slane %v4117_v5, %v1721_v59 }
  0xba   : > { %3194 = vmatpush1.bf16.msk.msra.mxu1 %vm3193_vm2, %v3824_v16  ;;  %vm447_vm3 = vmor %vm395_vm12, %vm423_vm13  ;;  %vm425_vm12 = vcmp.eq.s32.totalorder %v4203_v19, %v4136_v11  ;;  %v2243_v6 = vsub.s32 7, %v4115_v4 }
  0xbb   : > { %3195 = vmatprep.subr.bf16.mxu1 %v3823_v3  ;;  %vm448_vm6 = vmor %vm396_vm15, %vm424_vm1  ;;  %vm426_vm15 = vcmp.eq.s32.totalorder %v4211_v20, %v4136_v11 }
  0xbc   : > { %vm3160_vm9 = vmpackc.low %vm448_vm6, %vm447_vm3  ;;  %vm685_vm3 = vcmp.eq.s32.totalorder %v4203_v19, %v4139_v12  ;;  %vm686_vm6 = vcmp.eq.s32.totalorder %v4211_v20, %v4139_v12 }
  0xbd   : > { %3161 = vmatpush1.bf16.msk.msra.mxu0 %vm3160_vm9, %v3824_v16  ;;  %vm735_vm10 = vmor %vm683_vm4, %vm711_vm5  ;;  %vm713_vm4 = vcmp.eq.s32.totalorder %v4203_v19, %v4142_v13 }
  0xbe   : > { %vm736_vm13 = vmor %vm684_vm7, %vm712_vm8  ;;  %3162 = vmatprep.subr.bf16.mxu0 %v3823_v3  ;;  %vm714_vm7 = vcmp.eq.s32.totalorder %v4211_v20, %v4142_v13 }
  0xbf   : > { %vm3196_vm1 = vmpackc.low %vm736_vm13, %vm735_vm10  ;;  %vm399_vm10 = vcmp.eq.s32.totalorder %v4229_v21, %v4133_v10  ;;  %vm400_vm13 = vcmp.eq.s32.totalorder %v4237_v22, %v4133_v10 }
  0xc0   : > { %3197 = vmatpush1.bf16.msk.msra.mxu1 %vm3196_vm1, %v3824_v16  ;;  %vm449_vm2 = vmor %vm397_vm11, %vm425_vm12  ;;  %vm427_vm11 = vcmp.eq.s32.totalorder %v4229_v21, %v4136_v11 }
  0xc1   : > { %3198 = vmatprep.subr.bf16.mxu1 %v3823_v3  ;;  %vm450_vm5 = vmor %vm398_vm14, %vm426_vm15  ;;  %vm428_vm14 = vcmp.eq.s32.totalorder %v4237_v22, %v4136_v11 }
  0xc2   : > { %vm3163_vm8 = vmpackc.low %vm450_vm5, %vm449_vm2  ;;  %vm687_vm2 = vcmp.eq.s32.totalorder %v4229_v21, %v4139_v12  ;;  %vm688_vm5 = vcmp.eq.s32.totalorder %v4237_v22, %v4139_v12 }
  0xc3   : > { %3164 = vmatpush1.bf16.msk.msra.mxu0 %vm3163_vm8, %v3824_v16  ;;  %vm737_vm9 = vmor %vm685_vm3, %vm713_vm4  ;;  %vm715_vm3 = vcmp.eq.s32.totalorder %v4229_v21, %v4142_v13 }
  0xc4   : > { %vm738_vm12 = vmor %vm686_vm6, %vm714_vm7  ;;  %3165 = vmatprep.subr.bf16.mxu0 %v3823_v3  ;;  %vm716_vm6 = vcmp.eq.s32.totalorder %v4237_v22, %v4142_v13 }
  0xc5   : > { %vm3199_vm15 = vmpackc.low %vm738_vm12, %vm737_vm9  ;;  %vm401_vm9 = vcmp.eq.s32.totalorder %v4255_v23, %v4133_v10  ;;  %vm402_vm12 = vcmp.eq.s32.totalorder %v4263_v24, %v4133_v10 }
  0xc6   : > { %3200 = vmatpush1.bf16.msk.msra.mxu1 %vm3199_vm15, %v3824_v16  ;;  %vm451_vm1 = vmor %vm399_vm10, %vm427_vm11  ;;  %vm429_vm10 = vcmp.eq.s32.totalorder %v4255_v23, %v4136_v11 }
  0xc7   : > { %3201 = vmatprep.subr.bf16.mxu1 %v3823_v3  ;;  %vm452_vm4 = vmor %vm400_vm13, %vm428_vm14  ;;  %vm430_vm13 = vcmp.eq.s32.totalorder %v4263_v24, %v4136_v11 }
  0xc8   : > { %vm3166_vm7 = vmpackc.low %vm452_vm4, %vm451_vm1  ;;  %vm689_vm1 = vcmp.eq.s32.totalorder %v4255_v23, %v4139_v12  ;;  %vm690_vm4 = vcmp.eq.s32.totalorder %v4263_v24, %v4139_v12 }
  0xc9   : > { %3167 = vmatpush1.bf16.msk.msra.mxu0 %vm3166_vm7, %v3824_v16  ;;  %vm739_vm8 = vmor %vm687_vm2, %vm715_vm3  ;;  %vm717_vm2 = vcmp.eq.s32.totalorder %v4255_v23, %v4142_v13 }
  0xca   : > { %vm740_vm11 = vmor %vm688_vm5, %vm716_vm6  ;;  %3168 = vmatprep.subr.bf16.mxu0 %v3823_v3  ;;  %vm718_vm5 = vcmp.eq.s32.totalorder %v4263_v24, %v4142_v13 }
  0xcb   : > { %vm3202_vm14 = vmpackc.low %vm740_vm11, %vm739_vm8  ;;  %vm403_vm8 = vcmp.eq.s32.totalorder %v4281_v25, %v4133_v10  ;;  %vm404_vm11 = vcmp.eq.s32.totalorder %v4289_v26, %v4133_v10 }
  0xcc   : > { %3203 = vmatpush1.bf16.msk.msra.mxu1 %vm3202_vm14, %v3824_v16  ;;  %vm453_vm15 = vmor %vm401_vm9, %vm429_vm10  ;;  %vm431_vm9 = vcmp.eq.s32.totalorder %v4281_v25, %v4136_v11 }
  0xcd   : > { %3204 = vmatprep.subr.bf16.mxu1 %v3823_v3  ;;  %vm454_vm3 = vmor %vm402_vm12, %vm430_vm13  ;;  %vm432_vm12 = vcmp.eq.s32.totalorder %v4289_v26, %v4136_v11 }
  0xce   : > { %vm3169_vm6 = vmpackc.low %vm454_vm3, %vm453_vm15  ;;  %vm691_vm15 = vcmp.eq.s32.totalorder %v4281_v25, %v4139_v12  ;;  %vm692_vm3 = vcmp.eq.s32.totalorder %v4289_v26, %v4139_v12 }
  0xcf   : > { %3170 = vmatpush1.bf16.msk.msra.mxu0 %vm3169_vm6, %v3824_v16  ;;  %vm741_vm7 = vmor %vm689_vm1, %vm717_vm2  ;;  %vm719_vm1 = vcmp.eq.s32.totalorder %v4281_v25, %v4142_v13 }
  0xd0   : > { %vm742_vm10 = vmor %vm690_vm4, %vm718_vm5  ;;  %3171 = vmatprep.subr.bf16.mxu0 %v3823_v3  ;;  %vm720_vm4 = vcmp.eq.s32.totalorder %v4289_v26, %v4142_v13 }
  0xd1   : > { %vm3205_vm13 = vmpackc.low %vm742_vm10, %vm741_vm7  ;;  %vm405_vm7 = vcmp.eq.s32.totalorder %v4307_v27, %v4133_v10  ;;  %vm406_vm10 = vcmp.eq.s32.totalorder %v4315_v28, %v4133_v10 }
  0xd2   : > { %3206 = vmatpush1.bf16.msk.msra.mxu1 %vm3205_vm13, %v3824_v16  ;;  %vm455_vm14 = vmor %vm403_vm8, %vm431_vm9  ;;  %vm433_vm8 = vcmp.eq.s32.totalorder %v4307_v27, %v4136_v11 }
  0xd3   : > { %3207 = vmatprep.subr.bf16.mxu1 %v3823_v3  ;;  %vm456_vm2 = vmor %vm404_vm11, %vm432_vm12  ;;  %vm434_vm11 = vcmp.eq.s32.totalorder %v4315_v28, %v4136_v11 }
  0xd4   : > { %vm3172_vm5 = vmpackc.low %vm456_vm2, %vm455_vm14  ;;  %vm693_vm14 = vcmp.eq.s32.totalorder %v4307_v27, %v4139_v12  ;;  %vm694_vm2 = vcmp.eq.s32.totalorder %v4315_v28, %v4139_v12 }
  0xd5   : > { %3173 = vmatpush1.bf16.msk.msra.mxu0 %vm3172_vm5, %v3824_v16  ;;  %vm743_vm6 = vmor %vm691_vm15, %vm719_vm1  ;;  %vm721_vm15 = vcmp.eq.s32.totalorder %v4307_v27, %v4142_v13 }
  0xd6   : > { %vm744_vm9 = vmor %vm692_vm3, %vm720_vm4  ;;  %3174 = vmatprep.subr.bf16.mxu0 %v3823_v3  ;;  %vm722_vm3 = vcmp.eq.s32.totalorder %v4315_v28, %v4142_v13 }
  0xd7   : > { %vm3208_vm12 = vmpackc.low %vm744_vm9, %vm743_vm6  ;;  %vm407_vm6 = vcmp.eq.s32.totalorder %v4333_v29, %v4133_v10  ;;  %vm408_vm9 = vcmp.eq.s32.totalorder %v4341_v30, %v4133_v10 }
  0xd8   : > { %3209 = vmatpush1.bf16.msk.msra.mxu1 %vm3208_vm12, %v3824_v16  ;;  %vm457_vm13 = vmor %vm405_vm7, %vm433_vm8  ;;  %vm435_vm7 = vcmp.eq.s32.totalorder %v4333_v29, %v4136_v11 }
  0xd9   : > { %3210 = vmatprep.subr.bf16.mxu1 %v3823_v3  ;;  %vm458_vm1 = vmor %vm406_vm10, %vm434_vm11  ;;  %vm436_vm10 = vcmp.eq.s32.totalorder %v4341_v30, %v4136_v11 }
  0xda   : > { %vm3175_vm4 = vmpackc.low %vm458_vm1, %vm457_vm13  ;;  %vm695_vm13 = vcmp.eq.s32.totalorder %v4333_v29, %v4139_v12  ;;  %vm696_vm1 = vcmp.eq.s32.totalorder %v4341_v30, %v4139_v12 }
  0xdb   : > { %3176 = vmatpush1.bf16.msk.msra.mxu0 %vm3175_vm4, %v3824_v16  ;;  %vm745_vm5 = vmor %vm693_vm14, %vm721_vm15  ;;  %vm723_vm14 = vcmp.eq.s32.totalorder %v4333_v29, %v4142_v13 }
  0xdc   : > { %vm746_vm8 = vmor %vm694_vm2, %vm722_vm3  ;;  %3177 = vmatprep.subr.bf16.mxu0 %v3823_v3  ;;  %vm724_vm2 = vcmp.eq.s32.totalorder %v4341_v30, %v4142_v13 }
  0xdd   : > { %vm3211_vm11 = vmpackc.low %vm746_vm8, %vm745_vm5  ;;  %vm409_vm5 = vcmp.eq.s32.totalorder %v4359_v31, %v4133_v10  ;;  %vm410_vm8 = vcmp.eq.s32.totalorder %v4367_v32, %v4133_v10 }
  0xde   : > { %3212 = vmatpush1.bf16.msk.msra.mxu1 %vm3211_vm11, %v3824_v16  ;;  %vm459_vm12 = vmor %vm407_vm6, %vm435_vm7  ;;  %vm437_vm6 = vcmp.eq.s32.totalorder %v4359_v31, %v4136_v11 }
  0xdf   : > { %3213 = vmatprep.subr.bf16.mxu1 %v3823_v3  ;;  %vm460_vm15 = vmor %vm408_vm9, %vm436_vm10  ;;  %vm438_vm9 = vcmp.eq.s32.totalorder %v4367_v32, %v4136_v11 }
  0xe0   : > { %vm3178_vm3 = vmpackc.low %vm460_vm15, %vm459_vm12  ;;  %vm697_vm12 = vcmp.eq.s32.totalorder %v4359_v31, %v4139_v12  ;;  %vm698_vm15 = vcmp.eq.s32.totalorder %v4367_v32, %v4139_v12 }
  0xe1   : > { %3179 = vmatpush1.bf16.msk.msra.mxu0 %vm3178_vm3, %v3824_v16  ;;  %vm747_vm4 = vmor %vm695_vm13, %vm723_vm14  ;;  %vm725_vm13 = vcmp.eq.s32.totalorder %v4359_v31, %v4142_v13 }
  0xe2   : > { %vm748_vm7 = vmor %vm696_vm1, %vm724_vm2  ;;  %3180 = vmatprep.subr.bf16.mxu0 %v3823_v3  ;;  %vm726_vm1 = vcmp.eq.s32.totalorder %v4367_v32, %v4142_v13 }
  0xe3   : > { %vm3214_vm10 = vmpackc.low %vm748_vm7, %vm747_vm4  ;;  %vm411_vm4 = vcmp.eq.s32.totalorder %v4385_v33, %v4133_v10  ;;  %vm412_vm7 = vcmp.eq.s32.totalorder %v4393_v34, %v4133_v10 }
  0xe4   : > { %3215 = vmatpush1.bf16.msk.msra.mxu1 %vm3214_vm10, %v3824_v16  ;;  %vm461_vm11 = vmor %vm409_vm5, %vm437_vm6  ;;  %vm439_vm5 = vcmp.eq.s32.totalorder %v4385_v33, %v4136_v11 }
  0xe5   : > { %3216 = vmatprep.subr.bf16.mxu1 %v3823_v3  ;;  %vm462_vm14 = vmor %vm410_vm8, %vm438_vm9  ;;  %vm440_vm8 = vcmp.eq.s32.totalorder %v4393_v34, %v4136_v11 }
  0xe6   : > { %vm3181_vm2 = vmpackc.low %vm462_vm14, %vm461_vm11  ;;  %vm699_vm11 = vcmp.eq.s32.totalorder %v4385_v33, %v4139_v12  ;;  %vm700_vm14 = vcmp.eq.s32.totalorder %v4393_v34, %v4139_v12 }
  0xe7   : > { %3182 = vmatpush1.bf16.msk.msra.mxu0 %vm3181_vm2, %v3824_v16  ;;  %vm749_vm3 = vmor %vm697_vm12, %vm725_vm13  ;;  %vm727_vm12 = vcmp.eq.s32.totalorder %v4385_v33, %v4142_v13 }
  0xe8   : > { %vm750_vm6 = vmor %vm698_vm15, %vm726_vm1  ;;  %3183 = vmatprep.subr.bf16.mxu0 %v3823_v3  ;;  %vm728_vm15 = vcmp.eq.s32.totalorder %v4393_v34, %v4142_v13 }
  0xe9   : > { %vm3217_vm9 = vmpackc.low %vm750_vm6, %vm749_vm3  ;;  %vm413_vm3 = vcmp.eq.s32.totalorder %v4411_v35, %v4133_v10  ;;  %vm414_vm6 = vcmp.eq.s32.totalorder %v4419_v36, %v4133_v10  ;;  %v5095_v10 = vrot.slane %v4788_v62, %v2243_v6 }
  0xea   : > { %3218 = vmatpush1.bf16.msk.msra.mxu1 %vm3217_vm9, %v3824_v16  ;;  %vm463_vm10 = vmor %vm411_vm4, %vm439_vm5  ;;  %vm441_vm4 = vcmp.eq.s32.totalorder %v4411_v35, %v4136_v11 }
  0xeb   : > { %3219 = vmatprep.subr.bf16.mxu1 %v3823_v3  ;;  %vm464_vm13 = vmor %vm412_vm7, %vm440_vm8  ;;  %vm442_vm7 = vcmp.eq.s32.totalorder %v4419_v36, %v4136_v11  ;;  %v5098_v11 = vrot.slane %v4117_v5, %v2243_v6 }
  0xec   : > { %vm3184_vm1 = vmpackc.low %vm464_vm13, %vm463_vm10  ;;  %vm701_vm10 = vcmp.eq.s32.totalorder %v4411_v35, %v4139_v12  ;;  %vm702_vm13 = vcmp.eq.s32.totalorder %v4419_v36, %v4139_v12  ;;  %v5123_v12 = vld [vmem:[#allocation9 + $0x18] sm:$0xff] }
  0xed   : > { %3185 = vmatpush1.bf16.msk.msra.mxu0 %vm3184_vm1, %v3824_v16  ;;  %vm751_vm2 = vmor %vm699_vm11, %vm727_vm12  ;;  %vm729_vm11 = vcmp.eq.s32.totalorder %v4411_v35, %v4142_v13 }
  0xee   : > { %vm752_vm5 = vmor %vm700_vm14, %vm728_vm15  ;;  %3186 = vmatprep.subr.bf16.mxu0 %v3823_v3  ;;  %vm730_vm14 = vcmp.eq.s32.totalorder %v4419_v36, %v4142_v13  ;;  %v5160_v13 = vld [vmem:[#allocation9 + $0x20] sm:$0xff] }
  0xef   : > { %vm3220_vm8 = vmpackc.low %vm752_vm5, %vm751_vm2  ;;  %vm940_vm2 = vcmp.eq.s32.totalorder %v4115_v4, %v4439_v39  ;;  %vm941_vm5 = vcmp.eq.s32.totalorder %v4128_v7, %v4439_v39 }
  0xf0   : > { %3221 = vmatpush1.bf16.msk.msra.mxu1 %vm3220_vm8, %v3824_v16  ;;  %vm465_vm9 = vmor %vm413_vm3, %vm441_vm4  ;;  %vm968_vm3 = vcmp.eq.s32.totalorder %v4115_v4, %v4442_v40 }
  0xf1   : > { %3222 = vmatprep.subr.bf16.mxu1 %v3823_v3  ;;  %vm466_vm12 = vmor %vm414_vm6, %vm442_vm7  ;;  %vm969_vm6 = vcmp.eq.s32.totalorder %v4128_v7, %v4442_v40 }
  0xf2   : > { %vm3187_vm15 = vmpackc.low %vm466_vm12, %vm465_vm9  ;;  %vm1201_vm9 = vcmp.eq.s32.totalorder %v4115_v4, %v4455_v41  ;;  %vm1202_vm12 = vcmp.eq.s32.totalorder %v4128_v7, %v4455_v41 }
  0xf3   : > { %3188 = vmatpush1.bf16.msk.msra.mxu0 %vm3187_vm15, %v3824_v16  ;;  %vm753_vm1 = vmor %vm701_vm10, %vm729_vm11  ;;  %vm1229_vm10 = vcmp.eq.s32.totalorder %v4115_v4, %v4458_v42 }
  0xf4   : > { %vm754_vm4 = vmor %vm702_vm13, %vm730_vm14  ;;  %3225 = vmatprep.subr.bf16.mxu0 %v3823_v3  ;;  %vm1230_vm13 = vcmp.eq.s32.totalorder %v4128_v7, %v4458_v42 }
  0xf5   : > { %vm3223_vm7 = vmpackc.low %vm754_vm4, %vm753_vm1  ;;  %vm942_vm1 = vcmp.eq.s32.totalorder %v4145_v14, %v4439_v39  ;;  %vm943_vm4 = vcmp.eq.s32.totalorder %v4160_v15, %v4439_v39 }
  0xf6   : > { %3224 = vmatpush1.bf16.msk.msra.mxu1 %vm3223_vm7, %v3824_v16  ;;  %605 = vmatmul.mubr.f32.vlgmr.msra.gmra.mrb[0].mxu0 %v4461_v43  ;;  %vm992_vm8 = vmor %vm940_vm2, %vm968_vm3  ;;  %vm970_vm2 = vcmp.eq.s32.totalorder %v4145_v14, %v4442_v40 }
  0xf7   : > { %3261 = vmatprep.subr.bf16.mxu1 %v3823_v3  ;;  %vm993_vm11 = vmor %vm941_vm5, %vm969_vm6  ;;  %2734 = vmatprep.mubr.msk.f32.mxu0 %vm515_vm0, %v4472_v44  ;;  %vm971_vm5 = vcmp.eq.s32.totalorder %v4160_v15, %v4442_v40 }
  0xf8   : > { %vm3226_vm14 = vmpackc.low %vm993_vm11, %vm992_vm8  ;;  %vm1203_vm8 = vcmp.eq.s32.totalorder %v4145_v14, %v4455_v41  ;;  %vm1204_vm11 = vcmp.eq.s32.totalorder %v4160_v15, %v4455_v41 }
  0xf9   : > { %868 = vmatmul.mubr.f32.vlgmr.msra.gmra.mrb[0].mxu1 %v4461_v43  ;;  %3227 = vmatpush1.bf16.msk.msra.mxu0 %vm3226_vm14, %v3824_v16  ;;  %vm1253_vm15 = vmor %vm1201_vm9, %vm1229_vm10  ;;  %vm1231_vm9 = vcmp.eq.s32.totalorder %v4145_v14, %v4458_v42 }
  0xfa   : > { %vm1254_vm3 = vmor %vm1202_vm12, %vm1230_vm13  ;;  %2792 = vmatprep.mubr.msk.f32.mxu1 %vm515_vm0, %v4472_v44  ;;  %610 = vmatmul.mubr.f32.gmra.mrb[2].mxu0 %v4487_v45  ;;  %vm1232_vm12 = vcmp.eq.s32.totalorder %v4160_v15, %v4458_v42 }
  0xfb   : > { %vm3262_vm6 = vmpackc.low %vm1254_vm3, %vm1253_vm15  ;;  %3228 = vmatprep.subr.bf16.mxu0 %v3823_v3  ;;  %2735 = vmatprep.mubr.msk.f32.mxu0 %vm515_vm0, %v4489_v46  ;;  %vm944_vm15 = vcmp.eq.s32.totalorder %v4177_v17, %v4439_v39  ;;  %vm945_vm3 = vcmp.eq.s32.totalorder %v4185_v18, %v4439_v39 }
  0xfc   : > { %3263 = vmatpush1.bf16.msk.msra.mxu1 %vm3262_vm6, %v3824_v16  ;;  %vm994_vm7 = vmor %vm942_vm1, %vm970_vm2  ;;  %vm972_vm1 = vcmp.eq.s32.totalorder %v4177_v17, %v4442_v40 }
  0xfd   : > { %873 = vmatmul.mubr.f32.gmra.mrb[2].mxu1 %v4487_v45  ;;  %3264 = vmatprep.subr.bf16.mxu1 %v3823_v3  ;;  %vm995_vm10 = vmor %vm943_vm4, %vm971_vm5  ;;  %vm973_vm4 = vcmp.eq.s32.totalorder %v4185_v18, %v4442_v40 }
  0xfe   : > { %vm3229_vm13 = vmpackc.low %vm995_vm10, %vm994_vm7  ;;  %2793 = vmatprep.mubr.msk.f32.mxu1 %vm515_vm0, %v4489_v46  ;;  %615 = vmatmul.mubr.f32.gmra.mrb[4].mxu0 %v4507_v47  ;;  %vm1205_vm7 = vcmp.eq.s32.totalorder %v4177_v17, %v4455_v41  ;;  %vm1206_vm10 = vcmp.eq.s32.totalorder %v4185_v18, %v4455_v41 }
  0xff   : > { %3230 = vmatpush1.bf16.msk.msra.mxu0 %vm3229_vm13, %v3824_v16  ;;  %vm1255_vm14 = vmor %vm1203_vm8, %vm1231_vm9  ;;  %2736 = vmatprep.mubr.msk.f32.mxu0 %vm515_vm0, %v4514_v48  ;;  %vm1233_vm8 = vcmp.eq.s32.totalorder %v4177_v17, %v4458_v42 }
 0x100   : > { %vm1256_vm2 = vmor %vm1204_vm11, %vm1232_vm12  ;;  %3231 = vmatprep.subr.bf16.mxu0 %v3823_v3  ;;  %vm1234_vm11 = vcmp.eq.s32.totalorder %v4185_v18, %v4458_v42 }
 0x101   : > { %vm3265_vm5 = vmpackc.low %vm1256_vm2, %vm1255_vm14  ;;  %878 = vmatmul.mubr.f32.gmra.mrb[4].mxu1 %v4507_v47  ;;  %vm946_vm14 = vcmp.eq.s32.totalorder %v4203_v19, %v4439_v39  ;;  %vm947_vm2 = vcmp.eq.s32.totalorder %v4211_v20, %v4439_v39 }
 0x102   : > { %3266 = vmatpush1.bf16.msk.msra.mxu1 %vm3265_vm5, %v3824_v16  ;;  %vm996_vm6 = vmor %vm944_vm15, %vm972_vm1  ;;  %2794 = vmatprep.mubr.msk.f32.mxu1 %vm515_vm0, %v4514_v48  ;;  %vm974_vm15 = vcmp.eq.s32.totalorder %v4203_v19, %v4442_v40 }
 0x103   : > { %3267 = vmatprep.subr.bf16.mxu1 %v3823_v3  ;;  %vm997_vm9 = vmor %vm945_vm3, %vm973_vm4  ;;  %620 = vmatmul.mubr.f32.gmra.mrb[6].mxu0 %v4537_v49  ;;  %vm975_vm3 = vcmp.eq.s32.totalorder %v4211_v20, %v4442_v40 }
 0x104   : > { %vm3232_vm12 = vmpackc.low %vm997_vm9, %vm996_vm6  ;;  %2737 = vmatprep.mubr.msk.f32.mxu0 %vm515_vm0, %v4540_v50  ;;  %vm1207_vm6 = vcmp.eq.s32.totalorder %v4203_v19, %v4455_v41  ;;  %vm1208_vm9 = vcmp.eq.s32.totalorder %v4211_v20, %v4455_v41 }
 0x105   : > { %3233 = vmatpush1.bf16.msk.msra.mxu0 %vm3232_vm12, %v3824_v16  ;;  %vm1257_vm13 = vmor %vm1205_vm7, %vm1233_vm8  ;;  %883 = vmatmul.mubr.f32.gmra.mrb[6].mxu1 %v4537_v49  ;;  %vm1235_vm7 = vcmp.eq.s32.totalorder %v4203_v19, %v4458_v42 }
 0x106   : > { %vm1258_vm1 = vmor %vm1206_vm10, %vm1234_vm11  ;;  %3234 = vmatprep.subr.bf16.mxu0 %v3823_v3  ;;  %2795 = vmatprep.mubr.msk.f32.mxu1 %vm515_vm0, %v4540_v50  ;;  %vm1236_vm10 = vcmp.eq.s32.totalorder %v4211_v20, %v4458_v42 }
 0x107   : > { %vm3268_vm4 = vmpackc.low %vm1258_vm1, %vm1257_vm13  ;;  %625 = vmatmul.mubr.f32.gmra.mrb[8].mxu0 %v4557_v51  ;;  %vm948_vm13 = vcmp.eq.s32.totalorder %v4229_v21, %v4439_v39  ;;  %vm949_vm1 = vcmp.eq.s32.totalorder %v4237_v22, %v4439_v39 }
 0x108   : > { %3269 = vmatpush1.bf16.msk.msra.mxu1 %vm3268_vm4, %v3824_v16  ;;  %vm998_vm5 = vmor %vm946_vm14, %vm974_vm15  ;;  %2738 = vmatprep.mubr.msk.f32.mxu0 %vm515_vm0, %v4565_v52  ;;  %vm976_vm14 = vcmp.eq.s32.totalorder %v4229_v21, %v4442_v40 }
 0x109   : > { %3270 = vmatprep.subr.bf16.mxu1 %v3823_v3  ;;  %vm999_vm8 = vmor %vm947_vm2, %vm975_vm3  ;;  %888 = vmatmul.mubr.f32.gmra.mrb[8].mxu1 %v4557_v51  ;;  %vm977_vm2 = vcmp.eq.s32.totalorder %v4237_v22, %v4442_v40 }
 0x10a   : > { %vm3235_vm11 = vmpackc.low %vm999_vm8, %vm998_vm5  ;;  %2796 = vmatprep.mubr.msk.f32.mxu1 %vm515_vm0, %v4565_v52  ;;  %vm1209_vm5 = vcmp.eq.s32.totalorder %v4229_v21, %v4455_v41  ;;  %vm1210_vm8 = vcmp.eq.s32.totalorder %v4237_v22, %v4455_v41 }
 0x10b   : > { %3236 = vmatpush1.bf16.msk.msra.mxu0 %vm3235_vm11, %v3824_v16  ;;  %vm1259_vm12 = vmor %vm1207_vm6, %vm1235_vm7  ;;  %vm1237_vm6 = vcmp.eq.s32.totalorder %v4229_v21, %v4458_v42 }
 0x10c   : > { %vm1260_vm15 = vmor %vm1208_vm9, %vm1236_vm10  ;;  %3237 = vmatprep.subr.bf16.mxu0 %v3823_v3  ;;  %630 = vmatmul.mubr.f32.gmra.mrb[10].mxu0 %v4588_v53  ;;  %vm1238_vm9 = vcmp.eq.s32.totalorder %v4237_v22, %v4458_v42 }
 0x10d   : > { %vm3271_vm3 = vmpackc.low %vm1260_vm15, %vm1259_vm12  ;;  %893 = vmatmul.mubr.f32.gmra.mrb[10].mxu1 %v4588_v53  ;;  %2739 = vmatprep.mubr.msk.f32.mxu0 %vm515_vm0, %v4592_v54  ;;  %vm950_vm12 = vcmp.eq.s32.totalorder %v4255_v23, %v4439_v39  ;;  %vm951_vm15 = vcmp.eq.s32.totalorder %v4263_v24, %v4439_v39 }
 0x10e   : > { %3272 = vmatpush1.bf16.msk.msra.mxu1 %vm3271_vm3, %v3824_v16  ;;  %vm1000_vm4 = vmor %vm948_vm13, %vm976_vm14  ;;  %2797 = vmatprep.mubr.msk.f32.mxu1 %vm515_vm0, %v4592_v54  ;;  %vm978_vm13 = vcmp.eq.s32.totalorder %v4255_v23, %v4442_v40 }
 0x10f   : > { %3273 = vmatprep.subr.bf16.mxu1 %v3823_v3  ;;  %vm1001_vm7 = vmor %vm949_vm1, %vm977_vm2  ;;  %vm979_vm1 = vcmp.eq.s32.totalorder %v4263_v24, %v4442_v40 }
 0x110   : > { %vm3238_vm10 = vmpackc.low %vm1001_vm7, %vm1000_vm4  ;;  %635 = vmatmul.mubr.f32.gmra.mrb[12].mxu0 %v4608_v55  ;;  %vm1211_vm4 = vcmp.eq.s32.totalorder %v4255_v23, %v4455_v41  ;;  %vm1212_vm7 = vcmp.eq.s32.totalorder %v4263_v24, %v4455_v41 }
 0x111   : > { %3239 = vmatpush1.bf16.msk.msra.mxu0 %vm3238_vm10, %v3824_v16  ;;  %vm1261_vm11 = vmor %vm1209_vm5, %vm1237_vm6  ;;  %898 = vmatmul.mubr.f32.gmra.mrb[12].mxu1 %v4608_v55  ;;  %vm1239_vm5 = vcmp.eq.s32.totalorder %v4255_v23, %v4458_v42 }
 0x112   : > { %vm1262_vm14 = vmor %vm1210_vm8, %vm1238_vm9  ;;  %3240 = vmatprep.subr.bf16.mxu0 %v3823_v3  ;;  %2740 = vmatprep.mubr.msk.f32.mxu0 %vm515_vm0, %v4622_v56  ;;  %vm1240_vm8 = vcmp.eq.s32.totalorder %v4263_v24, %v4458_v42 }
 0x113   : > { %vm3274_vm2 = vmpackc.low %vm1262_vm14, %vm1261_vm11  ;;  %2798 = vmatprep.mubr.msk.f32.mxu1 %vm515_vm0, %v4622_v56  ;;  %vm952_vm11 = vcmp.eq.s32.totalorder %v4281_v25, %v4439_v39  ;;  %vm953_vm14 = vcmp.eq.s32.totalorder %v4289_v26, %v4439_v39 }
 0x114   : > { %3275 = vmatpush1.bf16.msk.msra.mxu1 %vm3274_vm2, %v3824_v16  ;;  %vm1002_vm3 = vmor %vm950_vm12, %vm978_vm13  ;;  %640 = vmatmul.mubr.f32.gmra.mrb[14].mxu0 %v4631_v57  ;;  %vm980_vm12 = vcmp.eq.s32.totalorder %v4281_v25, %v4442_v40 }
 0x115   : > { %3276 = vmatprep.subr.bf16.mxu1 %v3823_v3  ;;  %vm1003_vm6 = vmor %vm951_vm15, %vm979_vm1  ;;  %903 = vmatmul.mubr.f32.gmra.mrb[14].mxu1 %v4631_v57  ;;  %vm981_vm15 = vcmp.eq.s32.totalorder %v4289_v26, %v4442_v40 }
 0x116   : > { %vm3241_vm9 = vmpackc.low %vm1003_vm6, %vm1002_vm3  ;;  %2849 = vmatprep.mubr.msk.f32.mxu0 %vm515_vm0, %v4111_v2  ;;  %2907 = vmatprep.mubr.msk.f32.mxu1 %vm515_vm0, %v4111_v2  ;;  %vm1213_vm3 = vcmp.eq.s32.totalorder %v4281_v25, %v4455_v41  ;;  %vm1214_vm6 = vcmp.eq.s32.totalorder %v4289_v26, %v4455_v41  ;;  %v1982_v2 = vsub.s32 6, %v4115_v4 }
 0x117   : > { %3242 = vmatpush1.bf16.msk.msra.mxu0 %vm3241_vm9, %v3824_v16  ;;  %vm1263_vm10 = vmor %vm1211_vm4, %vm1239_vm5  ;;  %vm1241_vm4 = vcmp.eq.s32.totalorder %v4281_v25, %v4458_v42 }
 0x118   : > { %vm1264_vm13 = vmor %vm1212_vm7, %vm1240_vm8  ;;  %3243 = vmatprep.subr.bf16.mxu0 %v3823_v3  ;;  %vm1242_vm7 = vcmp.eq.s32.totalorder %v4289_v26, %v4458_v42  ;;  %v5079_v8 = vrot.slane %v4788_v62, %v1982_v2  ;;  %v5082_v9 = vrot.slane %v4117_v5, %v1982_v2  ;;  %v5111_v5 = vld [vmem:[#allocation9] sm:$0xff] }
 0x119   : > { %vm3277_vm1 = vmpackc.low %vm1264_vm13, %vm1263_vm10  ;;  %vm954_vm10 = vcmp.eq.s32.totalorder %v4307_v27, %v4439_v39  ;;  %vm955_vm13 = vcmp.eq.s32.totalorder %v4315_v28, %v4439_v39 }
 0x11a   : > { %3278 = vmatpush1.bf16.msk.msra.mxu1 %vm3277_vm1, %v3824_v16  ;;  %vm1004_vm2 = vmor %vm952_vm11, %vm980_vm12  ;;  %vm982_vm11 = vcmp.eq.s32.totalorder %v4307_v27, %v4442_v40 }
 0x11b   : > { %3279 = vmatprep.subr.bf16.mxu1 %v3823_v3  ;;  %vm1005_vm5 = vmor %vm953_vm14, %vm981_vm15  ;;  %vm983_vm14 = vcmp.eq.s32.totalorder %v4315_v28, %v4442_v40 }
 0x11c   : > { %vm3244_vm8 = vmpackc.low %vm1005_vm5, %vm1004_vm2  ;;  %vm1215_vm2 = vcmp.eq.s32.totalorder %v4307_v27, %v4455_v41  ;;  %vm1216_vm5 = vcmp.eq.s32.totalorder %v4315_v28, %v4455_v41 }
 0x11d   : > { %3245 = vmatpush1.bf16.msk.msra.mxu0 %vm3244_vm8, %v3824_v16  ;;  %vm1265_vm9 = vmor %vm1213_vm3, %vm1241_vm4  ;;  %vm1243_vm3 = vcmp.eq.s32.totalorder %v4307_v27, %v4458_v42 }
 0x11e   : > { %vm1266_vm12 = vmor %vm1214_vm6, %vm1242_vm7  ;;  %3246 = vmatprep.subr.bf16.mxu0 %v3823_v3  ;;  %vm1244_vm6 = vcmp.eq.s32.totalorder %v4315_v28, %v4458_v42 }
 0x11f   : > { %vm3280_vm15 = vmpackc.low %vm1266_vm12, %vm1265_vm9  ;;  %vm956_vm9 = vcmp.eq.s32.totalorder %v4333_v29, %v4439_v39  ;;  %vm957_vm12 = vcmp.eq.s32.totalorder %v4341_v30, %v4439_v39 }
 0x120   : > { %3281 = vmatpush1.bf16.msk.msra.mxu1 %vm3280_vm15, %v3824_v16  ;;  %vm1006_vm1 = vmor %vm954_vm10, %vm982_vm11  ;;  %vm984_vm10 = vcmp.eq.s32.totalorder %v4333_v29, %v4442_v40 }
 0x121   : > { %3282 = vmatprep.subr.bf16.mxu1 %v3823_v3  ;;  %vm1007_vm4 = vmor %vm955_vm13, %vm983_vm14  ;;  %vm985_vm13 = vcmp.eq.s32.totalorder %v4341_v30, %v4442_v40 }
 0x122   : > { %vm3247_vm7 = vmpackc.low %vm1007_vm4, %vm1006_vm1  ;;  %vm1217_vm1 = vcmp.eq.s32.totalorder %v4333_v29, %v4455_v41  ;;  %vm1218_vm4 = vcmp.eq.s32.totalorder %v4341_v30, %v4455_v41 }
 0x123   : > { %3248 = vmatpush1.bf16.msk.msra.mxu0 %vm3247_vm7, %v3824_v16  ;;  %vm1267_vm8 = vmor %vm1215_vm2, %vm1243_vm3  ;;  %vm1245_vm2 = vcmp.eq.s32.totalorder %v4333_v29, %v4458_v42 }
 0x124   : > { %vm1268_vm11 = vmor %vm1216_vm5, %vm1244_vm6  ;;  %3249 = vmatprep.subr.bf16.mxu0 %v3823_v3  ;;  %vm1246_vm5 = vcmp.eq.s32.totalorder %v4341_v30, %v4458_v42 }
 0x125   : > { %vm3283_vm14 = vmpackc.low %vm1268_vm11, %vm1267_vm8  ;;  %vm958_vm8 = vcmp.eq.s32.totalorder %v4359_v31, %v4439_v39  ;;  %vm959_vm11 = vcmp.eq.s32.totalorder %v4367_v32, %v4439_v39 }
 0x126   : > { %3284 = vmatpush1.bf16.msk.msra.mxu1 %vm3283_vm14, %v3824_v16  ;;  %vm1008_vm15 = vmor %vm956_vm9, %vm984_vm10  ;;  %vm986_vm9 = vcmp.eq.s32.totalorder %v4359_v31, %v4442_v40 }
 0x127   : > { %3285 = vmatprep.subr.bf16.mxu1 %v3823_v3  ;;  %vm1009_vm3 = vmor %vm957_vm12, %vm985_vm13  ;;  %vm987_vm12 = vcmp.eq.s32.totalorder %v4367_v32, %v4442_v40 }
 0x128   : > { %vm3250_vm6 = vmpackc.low %vm1009_vm3, %vm1008_vm15  ;;  %vm1219_vm15 = vcmp.eq.s32.totalorder %v4359_v31, %v4455_v41  ;;  %vm1220_vm3 = vcmp.eq.s32.totalorder %v4367_v32, %v4455_v41 }
 0x129   : > { %3251 = vmatpush1.bf16.msk.msra.mxu0 %vm3250_vm6, %v3824_v16  ;;  %vm1269_vm7 = vmor %vm1217_vm1, %vm1245_vm2  ;;  %vm1247_vm1 = vcmp.eq.s32.totalorder %v4359_v31, %v4458_v42 }
 0x12a   : > { %vm1270_vm10 = vmor %vm1218_vm4, %vm1246_vm5  ;;  %3252 = vmatprep.subr.bf16.mxu0 %v3823_v3  ;;  %vm1248_vm4 = vcmp.eq.s32.totalorder %v4367_v32, %v4458_v42 }
 0x12b   : > { %vm3286_vm13 = vmpackc.low %vm1270_vm10, %vm1269_vm7  ;;  %vm960_vm7 = vcmp.eq.s32.totalorder %v4385_v33, %v4439_v39  ;;  %vm961_vm10 = vcmp.eq.s32.totalorder %v4393_v34, %v4439_v39 }
 0x12c   : > { %3287 = vmatpush1.bf16.msk.msra.mxu1 %vm3286_vm13, %v3824_v16  ;;  %vm1010_vm14 = vmor %vm958_vm8, %vm986_vm9  ;;  %vm988_vm8 = vcmp.eq.s32.totalorder %v4385_v33, %v4442_v40 }
 0x12d   : > { %3288 = vmatprep.subr.bf16.mxu1 %v3823_v3  ;;  %vm1011_vm2 = vmor %vm959_vm11, %vm987_vm12  ;;  %vm989_vm11 = vcmp.eq.s32.totalorder %v4393_v34, %v4442_v40 }
 0x12e   : > { %vm3253_vm5 = vmpackc.low %vm1011_vm2, %vm1010_vm14  ;;  %vm1221_vm14 = vcmp.eq.s32.totalorder %v4385_v33, %v4455_v41  ;;  %vm1222_vm2 = vcmp.eq.s32.totalorder %v4393_v34, %v4455_v41 }
 0x12f   : > { %3254 = vmatpush1.bf16.msk.msra.mxu0 %vm3253_vm5, %v3824_v16  ;;  %vm1271_vm6 = vmor %vm1219_vm15, %vm1247_vm1  ;;  %vm1249_vm15 = vcmp.eq.s32.totalorder %v4385_v33, %v4458_v42 }
 0x130   : > { %vm1272_vm9 = vmor %vm1220_vm3, %vm1248_vm4  ;;  %3255 = vmatprep.subr.bf16.mxu0 %v3823_v3  ;;  %vm1250_vm3 = vcmp.eq.s32.totalorder %v4393_v34, %v4458_v42 }
 0x131   : > { %vm3289_vm12 = vmpackc.low %vm1272_vm9, %vm1271_vm6  ;;  %vm962_vm6 = vcmp.eq.s32.totalorder %v4411_v35, %v4439_v39  ;;  %vm963_vm9 = vcmp.eq.s32.totalorder %v4419_v36, %v4439_v39 }
 0x132   : > { %3290 = vmatpush1.bf16.msk.msra.mxu1 %vm3289_vm12, %v3824_v16  ;;  %vm1012_vm13 = vmor %vm960_vm7, %vm988_vm8  ;;  %vm990_vm7 = vcmp.eq.s32.totalorder %v4411_v35, %v4442_v40 }
 0x133   : > { %3291 = vmatprep.subr.bf16.mxu1 %v3823_v3  ;;  %vm1013_vm1 = vmor %vm961_vm10, %vm989_vm11  ;;  %vm991_vm10 = vcmp.eq.s32.totalorder %v4419_v36, %v4442_v40 }
 0x134   : > { %vm3256_vm4 = vmpackc.low %vm1013_vm1, %vm1012_vm13  ;;  %vm1223_vm13 = vcmp.eq.s32.totalorder %v4411_v35, %v4455_v41  ;;  %vm1224_vm1 = vcmp.eq.s32.totalorder %v4419_v36, %v4455_v41 }
 0x135   : > { %3257 = vmatpush1.bf16.msk.msra.mxu0 %vm3256_vm4, %v3824_v16  ;;  %vm1273_vm5 = vmor %vm1221_vm14, %vm1249_vm15  ;;  %vm1251_vm14 = vcmp.eq.s32.totalorder %v4411_v35, %v4458_v42 }
 0x136   : > { %vm1274_vm8 = vmor %vm1222_vm2, %vm1250_vm3  ;;  %3258 = vmatprep.subr.bf16.mxu0 %v3823_v3  ;;  %vm1252_vm2 = vcmp.eq.s32.totalorder %v4419_v36, %v4458_v42 }
 0x137   : > { %vm3292_vm11 = vmpackc.low %vm1274_vm8, %vm1273_vm5  ;;  %vm1462_vm5 = vcmp.eq.s32.totalorder %v4115_v4, %v4771_v60  ;;  %vm1463_vm8 = vcmp.eq.s32.totalorder %v4128_v7, %v4771_v60 }
 0x138   : > { %3293 = vmatpush1.bf16.msk.msra.mxu1 %vm3292_vm11, %v3824_v16  ;;  %vm1014_vm12 = vmor %vm962_vm6, %vm990_vm7  ;;  %vm1490_vm6 = vcmp.eq.s32.totalorder %v4115_v4, %v4774_v61 }
 0x139   : > { %3294 = vmatprep.subr.bf16.mxu1 %v3823_v3  ;;  %vm1015_vm15 = vmor %vm963_vm9, %vm991_vm10  ;;  %vm1491_vm9 = vcmp.eq.s32.totalorder %v4128_v7, %v4774_v61 }
 0x13a   : > { %vm3259_vm3 = vmpackc.low %vm1015_vm15, %vm1014_vm12  ;;  %vm1723_vm12 = vcmp.eq.s32.totalorder %v4115_v4, %v4791_v63  ;;  %vm1724_vm15 = vcmp.eq.s32.totalorder %v4128_v7, %v4791_v63 }
 0x13b   : > { %3260 = vmatpush1.bf16.msk.msra.mxu0 %vm3259_vm3, %v3824_v16  ;;  %vm1275_vm4 = vmor %vm1223_vm13, %vm1251_vm14  ;;  %vm1751_vm13 = vcmp.eq.s32.totalorder %v4115_v4, %v4794_v0 }
 0x13c   : > { %vm1276_vm7 = vmor %vm1224_vm1, %vm1252_vm2  ;;  %3297 = vmatprep.subr.bf16.mxu0 %v3823_v3  ;;  %vm1752_vm1 = vcmp.eq.s32.totalorder %v4128_v7, %v4794_v0 }
 0x13d   : > { %vm3295_vm10 = vmpackc.low %vm1276_vm7, %vm1275_vm4  ;;  %vm1464_vm4 = vcmp.eq.s32.totalorder %v4145_v14, %v4771_v60  ;;  %vm1465_vm7 = vcmp.eq.s32.totalorder %v4160_v15, %v4771_v60 }
 0x13e   : > { %3296 = vmatpush1.bf16.msk.msra.mxu1 %vm3295_vm10, %v3824_v16  ;;  %1129 = vmatmul.mubr.f32.vlgmr.msra.gmra.mrb[16].mxu0 %v4461_v43  ;;  %vm1514_vm11 = vmor %vm1462_vm5, %vm1490_vm6  ;;  %vm1492_vm5 = vcmp.eq.s32.totalorder %v4145_v14, %v4774_v61 }
 0x13f   : > { %3333 = vmatprep.subr.bf16.mxu1 %v3823_v3  ;;  %vm1515_vm14 = vmor %vm1463_vm8, %vm1491_vm9  ;;  %2850 = vmatprep.mubr.msk.f32.mxu0 %vm515_vm0, %v4472_v44  ;;  %vm1493_vm8 = vcmp.eq.s32.totalorder %v4160_v15, %v4774_v61 }
 0x140   : > { %vm3298_vm2 = vmpackc.low %vm1515_vm14, %vm1514_vm11  ;;  %vm1725_vm11 = vcmp.eq.s32.totalorder %v4145_v14, %v4791_v63  ;;  %vm1726_vm14 = vcmp.eq.s32.totalorder %v4160_v15, %v4791_v63 }
 0x141   : > { %1390 = vmatmul.mubr.f32.vlgmr.msra.gmra.mrb[16].mxu1 %v4461_v43  ;;  %3299 = vmatpush1.bf16.msk.msra.mxu0 %vm3298_vm2, %v3824_v16  ;;  %vm1775_vm3 = vmor %vm1723_vm12, %vm1751_vm13  ;;  %vm1753_vm12 = vcmp.eq.s32.totalorder %v4145_v14, %v4794_v0 }
 0x142   : > { %vm1776_vm6 = vmor %vm1724_vm15, %vm1752_vm1  ;;  %2908 = vmatprep.mubr.msk.f32.mxu1 %vm515_vm0, %v4472_v44  ;;  %1134 = vmatmul.mubr.f32.gmra.mrb[18].mxu0 %v4487_v45  ;;  %vm1754_vm15 = vcmp.eq.s32.totalorder %v4160_v15, %v4794_v0 }
 0x143   : > { %vm3334_vm9 = vmpackc.low %vm1776_vm6, %vm1775_vm3  ;;  %3300 = vmatprep.subr.bf16.mxu0 %v3823_v3  ;;  %2851 = vmatprep.mubr.msk.f32.mxu0 %vm515_vm0, %v4489_v46  ;;  %vm1466_vm3 = vcmp.eq.s32.totalorder %v4177_v17, %v4771_v60  ;;  %vm1467_vm6 = vcmp.eq.s32.totalorder %v4185_v18, %v4771_v60 }
 0x144   : > { %3335 = vmatpush1.bf16.msk.msra.mxu1 %vm3334_vm9, %v3824_v16  ;;  %vm1516_vm10 = vmor %vm1464_vm4, %vm1492_vm5  ;;  %vm1494_vm4 = vcmp.eq.s32.totalorder %v4177_v17, %v4774_v61 }
 0x145   : > { %1395 = vmatmul.mubr.f32.gmra.mrb[18].mxu1 %v4487_v45  ;;  %3336 = vmatprep.subr.bf16.mxu1 %v3823_v3  ;;  %vm1517_vm13 = vmor %vm1465_vm7, %vm1493_vm8  ;;  %vm1495_vm7 = vcmp.eq.s32.totalorder %v4185_v18, %v4774_v61 }
 0x146   : > { %vm3301_vm1 = vmpackc.low %vm1517_vm13, %vm1516_vm10  ;;  %2909 = vmatprep.mubr.msk.f32.mxu1 %vm515_vm0, %v4489_v46  ;;  %1139 = vmatmul.mubr.f32.gmra.mrb[20].mxu0 %v4507_v47  ;;  %vm1727_vm10 = vcmp.eq.s32.totalorder %v4177_v17, %v4791_v63  ;;  %vm1728_vm13 = vcmp.eq.s32.totalorder %v4185_v18, %v4791_v63 }
 0x147   : > { %3302 = vmatpush1.bf16.msk.msra.mxu0 %vm3301_vm1, %v3824_v16  ;;  %vm1777_vm2 = vmor %vm1725_vm11, %vm1753_vm12  ;;  %2852 = vmatprep.mubr.msk.f32.mxu0 %vm515_vm0, %v4514_v48  ;;  %vm1755_vm11 = vcmp.eq.s32.totalorder %v4177_v17, %v4794_v0 }
 0x148   : > { %vm1778_vm5 = vmor %vm1726_vm14, %vm1754_vm15  ;;  %3303 = vmatprep.subr.bf16.mxu0 %v3823_v3  ;;  %vm1756_vm14 = vcmp.eq.s32.totalorder %v4185_v18, %v4794_v0 }
 0x149   : > { %vm3337_vm8 = vmpackc.low %vm1778_vm5, %vm1777_vm2  ;;  %1400 = vmatmul.mubr.f32.gmra.mrb[20].mxu1 %v4507_v47  ;;  %vm1468_vm2 = vcmp.eq.s32.totalorder %v4203_v19, %v4771_v60  ;;  %vm1469_vm5 = vcmp.eq.s32.totalorder %v4211_v20, %v4771_v60 }
 0x14a   : > { %3338 = vmatpush1.bf16.msk.msra.mxu1 %vm3337_vm8, %v3824_v16  ;;  %vm1518_vm9 = vmor %vm1466_vm3, %vm1494_vm4  ;;  %2910 = vmatprep.mubr.msk.f32.mxu1 %vm515_vm0, %v4514_v48  ;;  %vm1496_vm3 = vcmp.eq.s32.totalorder %v4203_v19, %v4774_v61 }
 0x14b   : > { %3339 = vmatprep.subr.bf16.mxu1 %v3823_v3  ;;  %vm1519_vm12 = vmor %vm1467_vm6, %vm1495_vm7  ;;  %1144 = vmatmul.mubr.f32.gmra.mrb[22].mxu0 %v4537_v49  ;;  %vm1497_vm6 = vcmp.eq.s32.totalorder %v4211_v20, %v4774_v61 }
 0x14c   : > { %vm3304_vm15 = vmpackc.low %vm1519_vm12, %vm1518_vm9  ;;  %2853 = vmatprep.mubr.msk.f32.mxu0 %vm515_vm0, %v4540_v50  ;;  %vm1729_vm9 = vcmp.eq.s32.totalorder %v4203_v19, %v4791_v63  ;;  %vm1730_vm12 = vcmp.eq.s32.totalorder %v4211_v20, %v4791_v63 }
 0x14d   : > { %3305 = vmatpush1.bf16.msk.msra.mxu0 %vm3304_vm15, %v3824_v16  ;;  %vm1779_vm1 = vmor %vm1727_vm10, %vm1755_vm11  ;;  %1405 = vmatmul.mubr.f32.gmra.mrb[22].mxu1 %v4537_v49  ;;  %vm1757_vm10 = vcmp.eq.s32.totalorder %v4203_v19, %v4794_v0 }
 0x14e   : > { %vm1780_vm4 = vmor %vm1728_vm13, %vm1756_vm14  ;;  %3306 = vmatprep.subr.bf16.mxu0 %v3823_v3  ;;  %2911 = vmatprep.mubr.msk.f32.mxu1 %vm515_vm0, %v4540_v50  ;;  %vm1758_vm13 = vcmp.eq.s32.totalorder %v4211_v20, %v4794_v0 }
 0x14f   : > { %vm3340_vm7 = vmpackc.low %vm1780_vm4, %vm1779_vm1  ;;  %1149 = vmatmul.mubr.f32.gmra.mrb[24].mxu0 %v4557_v51  ;;  %vm1470_vm1 = vcmp.eq.s32.totalorder %v4229_v21, %v4771_v60  ;;  %vm1471_vm4 = vcmp.eq.s32.totalorder %v4237_v22, %v4771_v60 }
 0x150   : > { %3341 = vmatpush1.bf16.msk.msra.mxu1 %vm3340_vm7, %v3824_v16  ;;  %vm1520_vm8 = vmor %vm1468_vm2, %vm1496_vm3  ;;  %2854 = vmatprep.mubr.msk.f32.mxu0 %vm515_vm0, %v4565_v52  ;;  %vm1498_vm2 = vcmp.eq.s32.totalorder %v4229_v21, %v4774_v61 }
 0x151   : > { %3342 = vmatprep.subr.bf16.mxu1 %v3823_v3  ;;  %vm1521_vm11 = vmor %vm1469_vm5, %vm1497_vm6  ;;  %1410 = vmatmul.mubr.f32.gmra.mrb[24].mxu1 %v4557_v51  ;;  %vm1499_vm5 = vcmp.eq.s32.totalorder %v4237_v22, %v4774_v61 }
 0x152   : > { %vm3307_vm14 = vmpackc.low %vm1521_vm11, %vm1520_vm8  ;;  %2912 = vmatprep.mubr.msk.f32.mxu1 %vm515_vm0, %v4565_v52  ;;  %vm1731_vm8 = vcmp.eq.s32.totalorder %v4229_v21, %v4791_v63  ;;  %vm1732_vm11 = vcmp.eq.s32.totalorder %v4237_v22, %v4791_v63 }
 0x153   : > { %3308 = vmatpush1.bf16.msk.msra.mxu0 %vm3307_vm14, %v3824_v16  ;;  %vm1781_vm15 = vmor %vm1729_vm9, %vm1757_vm10  ;;  %vm1759_vm9 = vcmp.eq.s32.totalorder %v4229_v21, %v4794_v0 }
 0x154   : > { %vm1782_vm3 = vmor %vm1730_vm12, %vm1758_vm13  ;;  %3309 = vmatprep.subr.bf16.mxu0 %v3823_v3  ;;  %1154 = vmatmul.mubr.f32.gmra.mrb[26].mxu0 %v4588_v53  ;;  %vm1760_vm12 = vcmp.eq.s32.totalorder %v4237_v22, %v4794_v0 }
 0x155   : > { %vm3343_vm6 = vmpackc.low %vm1782_vm3, %vm1781_vm15  ;;  %1415 = vmatmul.mubr.f32.gmra.mrb[26].mxu1 %v4588_v53  ;;  %2855 = vmatprep.mubr.msk.f32.mxu0 %vm515_vm0, %v4592_v54  ;;  %vm1472_vm15 = vcmp.eq.s32.totalorder %v4255_v23, %v4771_v60  ;;  %vm1473_vm3 = vcmp.eq.s32.totalorder %v4263_v24, %v4771_v60 }
 0x156   : > { %3344 = vmatpush1.bf16.msk.msra.mxu1 %vm3343_vm6, %v3824_v16  ;;  %vm1522_vm7 = vmor %vm1470_vm1, %vm1498_vm2  ;;  %2913 = vmatprep.mubr.msk.f32.mxu1 %vm515_vm0, %v4592_v54  ;;  %vm1500_vm1 = vcmp.eq.s32.totalorder %v4255_v23, %v4774_v61 }
 0x157   : > { %3345 = vmatprep.subr.bf16.mxu1 %v3823_v3  ;;  %vm1523_vm10 = vmor %vm1471_vm4, %vm1499_vm5  ;;  %vm1501_vm4 = vcmp.eq.s32.totalorder %v4263_v24, %v4774_v61 }
 0x158   : > { %vm3310_vm13 = vmpackc.low %vm1523_vm10, %vm1522_vm7  ;;  %1159 = vmatmul.mubr.f32.gmra.mrb[28].mxu0 %v4608_v55  ;;  %vm1733_vm7 = vcmp.eq.s32.totalorder %v4255_v23, %v4791_v63  ;;  %vm1734_vm10 = vcmp.eq.s32.totalorder %v4263_v24, %v4791_v63 }
 0x159   : > { %3311 = vmatpush1.bf16.msk.msra.mxu0 %vm3310_vm13, %v3824_v16  ;;  %vm1783_vm14 = vmor %vm1731_vm8, %vm1759_vm9  ;;  %1420 = vmatmul.mubr.f32.gmra.mrb[28].mxu1 %v4608_v55  ;;  %vm1761_vm8 = vcmp.eq.s32.totalorder %v4255_v23, %v4794_v0 }
 0x15a   : > { %vm1784_vm2 = vmor %vm1732_vm11, %vm1760_vm12  ;;  %3312 = vmatprep.subr.bf16.mxu0 %v3823_v3  ;;  %2856 = vmatprep.mubr.msk.f32.mxu0 %vm515_vm0, %v4622_v56  ;;  %vm1762_vm11 = vcmp.eq.s32.totalorder %v4263_v24, %v4794_v0 }
 0x15b   : > { %vm3346_vm5 = vmpackc.low %vm1784_vm2, %vm1783_vm14  ;;  %2914 = vmatprep.mubr.msk.f32.mxu1 %vm515_vm0, %v4622_v56  ;;  %vm1474_vm14 = vcmp.eq.s32.totalorder %v4281_v25, %v4771_v60  ;;  %vm1475_vm2 = vcmp.eq.s32.totalorder %v4289_v26, %v4771_v60 }
 0x15c   : > { %3347 = vmatpush1.bf16.msk.msra.mxu1 %vm3346_vm5, %v3824_v16  ;;  %vm1524_vm6 = vmor %vm1472_vm15, %vm1500_vm1  ;;  %1164 = vmatmul.mubr.f32.gmra.mrb[30].mxu0 %v4631_v57  ;;  %vm1502_vm15 = vcmp.eq.s32.totalorder %v4281_v25, %v4774_v61 }
 0x15d   : > { %3348 = vmatprep.subr.bf16.mxu1 %v3823_v3  ;;  %vm1525_vm9 = vmor %vm1473_vm3, %vm1501_vm4  ;;  %1425 = vmatmul.mubr.f32.gmra.mrb[30].mxu1 %v4631_v57  ;;  %vm1503_vm3 = vcmp.eq.s32.totalorder %v4289_v26, %v4774_v61 }
 0x15e   : > { %vm3313_vm12 = vmpackc.low %vm1525_vm9, %vm1524_vm6  ;;  %2965 = vmatprep.mubr.msk.f32.mxu0 %vm515_vm0, %v4960_v1  ;;  %3023 = vmatprep.mubr.msk.f32.mxu1 %vm515_vm0, %v4960_v1  ;;  %vm1735_vm6 = vcmp.eq.s32.totalorder %v4281_v25, %v4791_v63  ;;  %vm1736_vm9 = vcmp.eq.s32.totalorder %v4289_v26, %v4791_v63 }
 0x15f   : > { %3314 = vmatpush1.bf16.msk.msra.mxu0 %vm3313_vm12, %v3824_v16  ;;  %vm1785_vm13 = vmor %vm1733_vm7, %vm1761_vm8  ;;  %vm1763_vm7 = vcmp.eq.s32.totalorder %v4281_v25, %v4794_v0 }
 0x160   : > { %vm1786_vm1 = vmor %vm1734_vm10, %vm1762_vm11  ;;  %3315 = vmatprep.subr.bf16.mxu0 %v3823_v3  ;;  %vm1764_vm10 = vcmp.eq.s32.totalorder %v4289_v26, %v4794_v0 }
 0x161   : > { %vm3349_vm4 = vmpackc.low %vm1786_vm1, %vm1785_vm13  ;;  %vm1476_vm13 = vcmp.eq.s32.totalorder %v4307_v27, %v4771_v60  ;;  %vm1477_vm1 = vcmp.eq.s32.totalorder %v4315_v28, %v4771_v60 }
 0x162   : > { %3350 = vmatpush1.bf16.msk.msra.mxu1 %vm3349_vm4, %v3824_v16  ;;  %vm1526_vm5 = vmor %vm1474_vm14, %vm1502_vm15  ;;  %vm1504_vm14 = vcmp.eq.s32.totalorder %v4307_v27, %v4774_v61 }
 0x163   : > { %3351 = vmatprep.subr.bf16.mxu1 %v3823_v3  ;;  %vm1527_vm8 = vmor %vm1475_vm2, %vm1503_vm3  ;;  %vm1505_vm2 = vcmp.eq.s32.totalorder %v4315_v28, %v4774_v61 }
 0x164   : > { %vm3316_vm11 = vmpackc.low %vm1527_vm8, %vm1526_vm5  ;;  %vm1737_vm5 = vcmp.eq.s32.totalorder %v4307_v27, %v4791_v63  ;;  %vm1738_vm8 = vcmp.eq.s32.totalorder %v4315_v28, %v4791_v63 }
 0x165   : > { %3317 = vmatpush1.bf16.msk.msra.mxu0 %vm3316_vm11, %v3824_v16  ;;  %vm1787_vm12 = vmor %vm1735_vm6, %vm1763_vm7  ;;  %vm1765_vm6 = vcmp.eq.s32.totalorder %v4307_v27, %v4794_v0 }
 0x166   : > { %vm1788_vm15 = vmor %vm1736_vm9, %vm1764_vm10  ;;  %3318 = vmatprep.subr.bf16.mxu0 %v3823_v3  ;;  %vm1766_vm9 = vcmp.eq.s32.totalorder %v4315_v28, %v4794_v0 }
 0x167   : > { %vm3352_vm3 = vmpackc.low %vm1788_vm15, %vm1787_vm12  ;;  %vm1478_vm12 = vcmp.eq.s32.totalorder %v4333_v29, %v4771_v60  ;;  %vm1479_vm15 = vcmp.eq.s32.totalorder %v4341_v30, %v4771_v60 }
 0x168   : > { %3353 = vmatpush1.bf16.msk.msra.mxu1 %vm3352_vm3, %v3824_v16  ;;  %vm1528_vm4 = vmor %vm1476_vm13, %vm1504_vm14  ;;  %vm1506_vm13 = vcmp.eq.s32.totalorder %v4333_v29, %v4774_v61 }
 0x169   : > { %3354 = vmatprep.subr.bf16.mxu1 %v3823_v3  ;;  %vm1529_vm7 = vmor %vm1477_vm1, %vm1505_vm2  ;;  %vm1507_vm1 = vcmp.eq.s32.totalorder %v4341_v30, %v4774_v61 }
 0x16a   : > { %vm3319_vm10 = vmpackc.low %vm1529_vm7, %vm1528_vm4  ;;  %vm1739_vm4 = vcmp.eq.s32.totalorder %v4333_v29, %v4791_v63  ;;  %vm1740_vm7 = vcmp.eq.s32.totalorder %v4341_v30, %v4791_v63 }
 0x16b   : > { %3320 = vmatpush1.bf16.msk.msra.mxu0 %vm3319_vm10, %v3824_v16  ;;  %vm1789_vm11 = vmor %vm1737_vm5, %vm1765_vm6  ;;  %vm1767_vm5 = vcmp.eq.s32.totalorder %v4333_v29, %v4794_v0 }
 0x16c   : > { %vm1790_vm14 = vmor %vm1738_vm8, %vm1766_vm9  ;;  %3321 = vmatprep.subr.bf16.mxu0 %v3823_v3  ;;  %vm1768_vm8 = vcmp.eq.s32.totalorder %v4341_v30, %v4794_v0 }
 0x16d   : > { %vm3355_vm2 = vmpackc.low %vm1790_vm14, %vm1789_vm11  ;;  %vm1480_vm11 = vcmp.eq.s32.totalorder %v4359_v31, %v4771_v60  ;;  %vm1481_vm14 = vcmp.eq.s32.totalorder %v4367_v32, %v4771_v60 }
 0x16e   : > { %3356 = vmatpush1.bf16.msk.msra.mxu1 %vm3355_vm2, %v3824_v16  ;;  %vm1530_vm3 = vmor %vm1478_vm12, %vm1506_vm13  ;;  %vm1508_vm12 = vcmp.eq.s32.totalorder %v4359_v31, %v4774_v61 }
 0x16f   : > { %3357 = vmatprep.subr.bf16.mxu1 %v3823_v3  ;;  %vm1531_vm6 = vmor %vm1479_vm15, %vm1507_vm1  ;;  %vm1509_vm15 = vcmp.eq.s32.totalorder %v4367_v32, %v4774_v61 }
 0x170   : > { %vm3322_vm9 = vmpackc.low %vm1531_vm6, %vm1530_vm3  ;;  %vm1741_vm3 = vcmp.eq.s32.totalorder %v4359_v31, %v4791_v63  ;;  %vm1742_vm6 = vcmp.eq.s32.totalorder %v4367_v32, %v4791_v63 }
 0x171   : > { %3323 = vmatpush1.bf16.msk.msra.mxu0 %vm3322_vm9, %v3824_v16  ;;  %vm1791_vm10 = vmor %vm1739_vm4, %vm1767_vm5  ;;  %vm1769_vm4 = vcmp.eq.s32.totalorder %v4359_v31, %v4794_v0 }
 0x172   : > { %vm1792_vm13 = vmor %vm1740_vm7, %vm1768_vm8  ;;  %3324 = vmatprep.subr.bf16.mxu0 %v3823_v3  ;;  %vm1770_vm7 = vcmp.eq.s32.totalorder %v4367_v32, %v4794_v0 }
 0x173   : > { %vm3358_vm1 = vmpackc.low %vm1792_vm13, %vm1791_vm10  ;;  %vm1482_vm10 = vcmp.eq.s32.totalorder %v4385_v33, %v4771_v60  ;;  %vm1483_vm13 = vcmp.eq.s32.totalorder %v4393_v34, %v4771_v60 }
 0x174   : > { %3359 = vmatpush1.bf16.msk.msra.mxu1 %vm3358_vm1, %v3824_v16  ;;  %vm1532_vm2 = vmor %vm1480_vm11, %vm1508_vm12  ;;  %vm1510_vm11 = vcmp.eq.s32.totalorder %v4385_v33, %v4774_v61 }
 0x175   : > { %3360 = vmatprep.subr.bf16.mxu1 %v3823_v3  ;;  %vm1533_vm5 = vmor %vm1481_vm14, %vm1509_vm15  ;;  %vm1511_vm14 = vcmp.eq.s32.totalorder %v4393_v34, %v4774_v61 }
 0x176   : > { %vm3325_vm8 = vmpackc.low %vm1533_vm5, %vm1532_vm2  ;;  %vm1743_vm2 = vcmp.eq.s32.totalorder %v4385_v33, %v4791_v63  ;;  %vm1744_vm5 = vcmp.eq.s32.totalorder %v4393_v34, %v4791_v63 }
 0x177   : > { %3326 = vmatpush1.bf16.msk.msra.mxu0 %vm3325_vm8, %v3824_v16  ;;  %vm1793_vm9 = vmor %vm1741_vm3, %vm1769_vm4  ;;  %vm1771_vm3 = vcmp.eq.s32.totalorder %v4385_v33, %v4794_v0 }
 0x178   : > { %vm1794_vm12 = vmor %vm1742_vm6, %vm1770_vm7  ;;  %3327 = vmatprep.subr.bf16.mxu0 %v3823_v3  ;;  %vm1772_vm6 = vcmp.eq.s32.totalorder %v4393_v34, %v4794_v0 }
 0x179   : > { %vm3361_vm15 = vmpackc.low %vm1794_vm12, %vm1793_vm9  ;;  %vm1484_vm9 = vcmp.eq.s32.totalorder %v4411_v35, %v4771_v60  ;;  %vm1485_vm12 = vcmp.eq.s32.totalorder %v4419_v36, %v4771_v60 }
 0x17a   : > { %3362 = vmatpush1.bf16.msk.msra.mxu1 %vm3361_vm15, %v3824_v16  ;;  %vm1534_vm1 = vmor %vm1482_vm10, %vm1510_vm11  ;;  %vm1512_vm10 = vcmp.eq.s32.totalorder %v4411_v35, %v4774_v61 }
 0x17b   : > { %3363 = vmatprep.subr.bf16.mxu1 %v3823_v3  ;;  %vm1535_vm4 = vmor %vm1483_vm13, %vm1511_vm14  ;;  %vm1513_vm13 = vcmp.eq.s32.totalorder %v4419_v36, %v4774_v61 }
 0x17c   : > { %vm3328_vm7 = vmpackc.low %vm1535_vm4, %vm1534_vm1  ;;  %vm1745_vm1 = vcmp.eq.s32.totalorder %v4411_v35, %v4791_v63  ;;  %vm1746_vm4 = vcmp.eq.s32.totalorder %v4419_v36, %v4791_v63 }
 0x17d   : > { %3329 = vmatpush1.bf16.msk.msra.mxu0 %vm3328_vm7, %v3824_v16  ;;  %vm1795_vm8 = vmor %vm1743_vm2, %vm1771_vm3  ;;  %vm1773_vm2 = vcmp.eq.s32.totalorder %v4411_v35, %v4794_v0 }
 0x17e   : > { %vm1796_vm11 = vmor %vm1744_vm5, %vm1772_vm6  ;;  %3330 = vmatprep.subr.bf16.mxu0 %v3823_v3  ;;  %vm1774_vm5 = vcmp.eq.s32.totalorder %v4419_v36, %v4794_v0 }
 0x17f   : > { %vm3364_vm14 = vmpackc.low %vm1796_vm11, %vm1795_vm8  ;;  %vm1984_vm8 = vcmp.eq.s32.totalorder %v4115_v4, %v5079_v8  ;;  %vm1985_vm11 = vcmp.eq.s32.totalorder %v4128_v7, %v5079_v8 }
 0x180   : > { %3365 = vmatpush1.bf16.msk.msra.mxu1 %vm3364_vm14, %v3824_v16  ;;  %vm1536_vm15 = vmor %vm1484_vm9, %vm1512_vm10  ;;  %vm2012_vm9 = vcmp.eq.s32.totalorder %v4115_v4, %v5082_v9 }
 0x181   : > { %3366 = vmatprep.subr.bf16.mxu1 %v3823_v3  ;;  %vm1537_vm3 = vmor %vm1485_vm12, %vm1513_vm13  ;;  %vm2013_vm12 = vcmp.eq.s32.totalorder %v4128_v7, %v5082_v9 }
 0x182   : > { %vm3331_vm6 = vmpackc.low %vm1537_vm3, %vm1536_vm15  ;;  %vm2245_vm15 = vcmp.eq.s32.totalorder %v4115_v4, %v5095_v10  ;;  %vm2246_vm3 = vcmp.eq.s32.totalorder %v4128_v7, %v5095_v10 }
 0x183   : > { %3332 = vmatpush1.bf16.msk.msra.mxu0 %vm3331_vm6, %v3824_v16  ;;  %vm1797_vm7 = vmor %vm1745_vm1, %vm1773_vm2  ;;  %vm2273_vm1 = vcmp.eq.s32.totalorder %v4115_v4, %v5098_v11  ;;  %v5135_v4 = vld [vmem:[#allocation9 + $0x10] sm:$0xff] }
 0x184   : > { %vm1798_vm10 = vmor %vm1746_vm4, %vm1774_vm5  ;;  %3369 = vmatprep.subr.bf16.mxu0 %v3823_v3  ;;  %vm2274_vm4 = vcmp.eq.s32.totalorder %v4128_v7, %v5098_v11  ;;  %v5143_v7 = vld [vmem:[#allocation9 + $0x28] sm:$0xff] }
 0x185   : > { %vm3367_vm13 = vmpackc.low %vm1798_vm10, %vm1797_vm7  ;;  %vm1986_vm7 = vcmp.eq.s32.totalorder %v4145_v14, %v5079_v8  ;;  %vm1987_vm10 = vcmp.eq.s32.totalorder %v4160_v15, %v5079_v8 }
 0x186   : > { %3368 = vmatpush1.bf16.msk.msra.mxu1 %vm3367_vm13, %v3824_v16  ;;  %1651 = vmatmul.mubr.f32.vlgmr.msra.gmra.mrb[32].mxu0 %v5111_v5  ;;  %vm2036_vm14 = vmor %vm1984_vm8, %vm2012_vm9  ;;  %vm2014_vm8 = vcmp.eq.s32.totalorder %v4145_v14, %v5082_v9 }
 0x187   : > { %3405 = vmatprep.subr.bf16.mxu1 %v3823_v3  ;;  %vm2037_vm2 = vmor %vm1985_vm11, %vm2013_vm12  ;;  %2966 = vmatprep.mubr.msk.f32.mxu0 %vm515_vm0, %v5123_v12  ;;  %vm2015_vm11 = vcmp.eq.s32.totalorder %v4160_v15, %v5082_v9 }
 0x188   : > { %vm3370_vm5 = vmpackc.low %vm2037_vm2, %vm2036_vm14  ;;  %vm2247_vm14 = vcmp.eq.s32.totalorder %v4145_v14, %v5095_v10  ;;  %vm2248_vm2 = vcmp.eq.s32.totalorder %v4160_v15, %v5095_v10 }
 0x189   : > { %1912 = vmatmul.mubr.f32.vlgmr.msra.gmra.mrb[32].mxu1 %v5111_v5  ;;  %3371 = vmatpush1.bf16.msk.msra.mxu0 %vm3370_vm5, %v3824_v16  ;;  %vm2297_vm6 = vmor %vm2245_vm15, %vm2273_vm1  ;;  %vm2275_vm15 = vcmp.eq.s32.totalorder %v4145_v14, %v5098_v11  ;;  %v5168_v14 = vld [vmem:[#allocation9 + $0x38] sm:$0xff] }
 0x18a   : > { %vm2298_vm9 = vmor %vm2246_vm3, %vm2274_vm4  ;;  %3024 = vmatprep.mubr.msk.f32.mxu1 %vm515_vm0, %v5123_v12  ;;  %1656 = vmatmul.mubr.f32.gmra.mrb[34].mxu0 %v5135_v4  ;;  %vm2276_vm3 = vcmp.eq.s32.totalorder %v4160_v15, %v5098_v11  ;;  %v5190_v15 = vld [vmem:[#allocation9 + $0x30] sm:$0xff] }
 0x18b   : > { %vm3406_vm12 = vmpackc.low %vm2298_vm9, %vm2297_vm6  ;;  %3372 = vmatprep.subr.bf16.mxu0 %v3823_v3  ;;  %2967 = vmatprep.mubr.msk.f32.mxu0 %vm515_vm0, %v5143_v7  ;;  %vm1988_vm6 = vcmp.eq.s32.totalorder %v4177_v17, %v5079_v8  ;;  %vm1989_vm9 = vcmp.eq.s32.totalorder %v4185_v18, %v5079_v8 }
 0x18c   : > { %3407 = vmatpush1.bf16.msk.msra.mxu1 %vm3406_vm12, %v3824_v16  ;;  %vm2038_vm13 = vmor %vm1986_vm7, %vm2014_vm8  ;;  %vm2016_vm7 = vcmp.eq.s32.totalorder %v4177_v17, %v5082_v9 }
 0x18d   : > { %1917 = vmatmul.mubr.f32.gmra.mrb[34].mxu1 %v5135_v4  ;;  %3408 = vmatprep.subr.bf16.mxu1 %v3823_v3  ;;  %vm2039_vm1 = vmor %vm1987_vm10, %vm2015_vm11  ;;  %vm2017_vm10 = vcmp.eq.s32.totalorder %v4185_v18, %v5082_v9 }
 0x18e   : > { %vm3373_vm4 = vmpackc.low %vm2039_vm1, %vm2038_vm13  ;;  %3025 = vmatprep.mubr.msk.f32.mxu1 %vm515_vm0, %v5143_v7  ;;  %1661 = vmatmul.mubr.f32.gmra.mrb[36].mxu0 %v5160_v13  ;;  %vm2249_vm13 = vcmp.eq.s32.totalorder %v4177_v17, %v5095_v10  ;;  %vm2250_vm1 = vcmp.eq.s32.totalorder %v4185_v18, %v5095_v10 }
 0x18f   : > { %3374 = vmatpush1.bf16.msk.msra.mxu0 %vm3373_vm4, %v3824_v16  ;;  %vm2299_vm5 = vmor %vm2247_vm14, %vm2275_vm15  ;;  %2968 = vmatprep.mubr.msk.f32.mxu0 %vm515_vm0, %v5168_v14  ;;  %vm2277_vm14 = vcmp.eq.s32.totalorder %v4177_v17, %v5098_v11  ;;  %v5210_v17 = vld [vmem:[#allocation9 + $0x40] sm:$0xff] }
 0x190   : > { %vm2300_vm8 = vmor %vm2248_vm2, %vm2276_vm3  ;;  %3375 = vmatprep.subr.bf16.mxu0 %v3823_v3  ;;  %vm2278_vm2 = vcmp.eq.s32.totalorder %v4185_v18, %v5098_v11  ;;  %v5218_v18 = vld [vmem:[#allocation9 + $0x58] sm:$0xff] }
 0x191   : > { %vm3409_vm11 = vmpackc.low %vm2300_vm8, %vm2299_vm5  ;;  %1922 = vmatmul.mubr.f32.gmra.mrb[36].mxu1 %v5160_v13  ;;  %vm1990_vm5 = vcmp.eq.s32.totalorder %v4203_v19, %v5079_v8  ;;  %vm1991_vm8 = vcmp.eq.s32.totalorder %v4211_v20, %v5079_v8 }
 0x192   : > { %3410 = vmatpush1.bf16.msk.msra.mxu1 %vm3409_vm11, %v3824_v16  ;;  %vm2040_vm12 = vmor %vm1988_vm6, %vm2016_vm7  ;;  %3026 = vmatprep.mubr.msk.f32.mxu1 %vm515_vm0, %v5168_v14  ;;  %vm2018_vm6 = vcmp.eq.s32.totalorder %v4203_v19, %v5082_v9 }
 0x193   : > { %3411 = vmatprep.subr.bf16.mxu1 %v3823_v3  ;;  %vm2041_vm15 = vmor %vm1989_vm9, %vm2017_vm10  ;;  %1666 = vmatmul.mubr.f32.gmra.mrb[38].mxu0 %v5190_v15  ;;  %vm2019_vm9 = vcmp.eq.s32.totalorder %v4211_v20, %v5082_v9 }
 0x194   : > { %vm3376_vm3 = vmpackc.low %vm2041_vm15, %vm2040_vm12  ;;  %2969 = vmatprep.mubr.msk.f32.mxu0 %vm515_vm0, %v5193_v37  ;;  %vm2251_vm12 = vcmp.eq.s32.totalorder %v4203_v19, %v5095_v10  ;;  %vm2252_vm15 = vcmp.eq.s32.totalorder %v4211_v20, %v5095_v10 }
 0x195   : > { %3377 = vmatpush1.bf16.msk.msra.mxu0 %vm3376_vm3, %v3824_v16  ;;  %vm2301_vm4 = vmor %vm2249_vm13, %vm2277_vm14  ;;  %1927 = vmatmul.mubr.f32.gmra.mrb[38].mxu1 %v5190_v15  ;;  %vm2279_vm13 = vcmp.eq.s32.totalorder %v4203_v19, %v5098_v11  ;;  %v5240_v19 = vld [vmem:[#allocation9 + $0x50] sm:$0xff] }
 0x196   : > { %vm2302_vm7 = vmor %vm2250_vm1, %vm2278_vm2  ;;  %3378 = vmatprep.subr.bf16.mxu0 %v3823_v3  ;;  %3027 = vmatprep.mubr.msk.f32.mxu1 %vm515_vm0, %v5193_v37  ;;  %vm2280_vm1 = vcmp.eq.s32.totalorder %v4211_v20, %v5098_v11  ;;  %v5244_v20 = vld [vmem:[#allocation9 + $0x68] sm:$0xff] }
 0x197   : > { %vm3412_vm10 = vmpackc.low %vm2302_vm7, %vm2301_vm4  ;;  %1671 = vmatmul.mubr.f32.gmra.mrb[40].mxu0 %v5210_v17  ;;  %vm1992_vm4 = vcmp.eq.s32.totalorder %v4229_v21, %v5079_v8  ;;  %vm1993_vm7 = vcmp.eq.s32.totalorder %v4237_v22, %v5079_v8 }
 0x198   : > { %3413 = vmatpush1.bf16.msk.msra.mxu1 %vm3412_vm10, %v3824_v16  ;;  %vm2042_vm11 = vmor %vm1990_vm5, %vm2018_vm6  ;;  %2970 = vmatprep.mubr.msk.f32.mxu0 %vm515_vm0, %v5218_v18  ;;  %vm2020_vm5 = vcmp.eq.s32.totalorder %v4229_v21, %v5082_v9 }
 0x199   : > { %3414 = vmatprep.subr.bf16.mxu1 %v3823_v3  ;;  %vm2043_vm14 = vmor %vm1991_vm8, %vm2019_vm9  ;;  %1932 = vmatmul.mubr.f32.gmra.mrb[40].mxu1 %v5210_v17  ;;  %vm2021_vm8 = vcmp.eq.s32.totalorder %v4237_v22, %v5082_v9 }
 0x19a   : > { %vm3379_vm2 = vmpackc.low %vm2043_vm14, %vm2042_vm11  ;;  %3028 = vmatprep.mubr.msk.f32.mxu1 %vm515_vm0, %v5218_v18  ;;  %vm2253_vm11 = vcmp.eq.s32.totalorder %v4229_v21, %v5095_v10  ;;  %vm2254_vm14 = vcmp.eq.s32.totalorder %v4237_v22, %v5095_v10 }
 0x19b   : > { %3380 = vmatpush1.bf16.msk.msra.mxu0 %vm3379_vm2, %v3824_v16  ;;  %vm2303_vm3 = vmor %vm2251_vm12, %vm2279_vm13  ;;  %vm2281_vm12 = vcmp.eq.s32.totalorder %v4229_v21, %v5098_v11  ;;  %v5274_v21 = vld [vmem:[#allocation9 + $0x78] sm:$0xff] }
 0x19c   : > { %vm2304_vm6 = vmor %vm2252_vm15, %vm2280_vm1  ;;  %3381 = vmatprep.subr.bf16.mxu0 %v3823_v3  ;;  %1676 = vmatmul.mubr.f32.gmra.mrb[42].mxu0 %v5240_v19  ;;  %vm2282_vm15 = vcmp.eq.s32.totalorder %v4237_v22, %v5098_v11  ;;  %v5285_v22 = vld [vmem:[#allocation9 + $0x70] sm:$0xff] }
 0x19d   : > { %vm3415_vm9 = vmpackc.low %vm2304_vm6, %vm2303_vm3  ;;  %1937 = vmatmul.mubr.f32.gmra.mrb[42].mxu1 %v5240_v19  ;;  %2971 = vmatprep.mubr.msk.f32.mxu0 %vm515_vm0, %v5244_v20  ;;  %vm1994_vm3 = vcmp.eq.s32.totalorder %v4255_v23, %v5079_v8  ;;  %vm1995_vm6 = vcmp.eq.s32.totalorder %v4263_v24, %v5079_v8 }
 0x19e   : > { %3416 = vmatpush1.bf16.msk.msra.mxu1 %vm3415_vm9, %v3824_v16  ;;  %vm2044_vm10 = vmor %vm1992_vm4, %vm2020_vm5  ;;  %3029 = vmatprep.mubr.msk.f32.mxu1 %vm515_vm0, %v5244_v20  ;;  %vm2022_vm4 = vcmp.eq.s32.totalorder %v4255_v23, %v5082_v9 }
 0x19f   : > { %3417 = vmatprep.subr.bf16.mxu1 %v3823_v3  ;;  %vm2045_vm13 = vmor %vm1993_vm7, %vm2021_vm8  ;;  %vm2023_vm7 = vcmp.eq.s32.totalorder %v4263_v24, %v5082_v9 }
 0x1a0   : > { %vm3382_vm1 = vmpackc.low %vm2045_vm13, %vm2044_vm10  ;;  %1681 = vmatmul.mubr.f32.gmra.mrb[44].mxu0 %v5260_v38  ;;  %vm2255_vm10 = vcmp.eq.s32.totalorder %v4255_v23, %v5095_v10  ;;  %vm2256_vm13 = vcmp.eq.s32.totalorder %v4263_v24, %v5095_v10 }
 0x1a1   : > { %3383 = vmatpush1.bf16.msk.msra.mxu0 %vm3382_vm1, %v3824_v16  ;;  %vm2305_vm2 = vmor %vm2253_vm11, %vm2281_vm12  ;;  %1942 = vmatmul.mubr.f32.gmra.mrb[44].mxu1 %v5260_v38  ;;  %vm2283_vm11 = vcmp.eq.s32.totalorder %v4255_v23, %v5098_v11 }
 0x1a2   : > { %vm2306_vm5 = vmor %vm2254_vm14, %vm2282_vm15  ;;  %3384 = vmatprep.subr.bf16.mxu0 %v3823_v3  ;;  %2972 = vmatprep.mubr.msk.f32.mxu0 %vm515_vm0, %v5274_v21  ;;  %vm2284_vm14 = vcmp.eq.s32.totalorder %v4263_v24, %v5098_v11 }
 0x1a3   : > { %vm3418_vm8 = vmpackc.low %vm2306_vm5, %vm2305_vm2  ;;  %3030 = vmatprep.mubr.msk.f32.mxu1 %vm515_vm0, %v5274_v21  ;;  %vm1996_vm2 = vcmp.eq.s32.totalorder %v4281_v25, %v5079_v8  ;;  %vm1997_vm5 = vcmp.eq.s32.totalorder %v4289_v26, %v5079_v8 }
 0x1a4   : > { %3419 = vmatpush1.bf16.msk.msra.mxu1 %vm3418_vm8, %v3824_v16  ;;  %vm2046_vm9 = vmor %vm1994_vm3, %vm2022_vm4  ;;  %1686 = vmatmul.mubr.f32.gmra.mrb[46].mxu0 %v5285_v22  ;;  %vm2024_vm3 = vcmp.eq.s32.totalorder %v4281_v25, %v5082_v9 }
 0x1a5   : > { %3420 = vmatprep.subr.bf16.mxu1 %v3823_v3  ;;  %vm2047_vm12 = vmor %vm1995_vm6, %vm2023_vm7  ;;  %1947 = vmatmul.mubr.f32.gmra.mrb[46].mxu1 %v5285_v22  ;;  %vm2025_vm6 = vcmp.eq.s32.totalorder %v4289_v26, %v5082_v9 }
 0x1a6   : > { %vm3385_vm15 = vmpackc.low %vm2047_vm12, %vm2046_vm9  ;;  %3081 = vmatprep.mubr.msk.f32.mxu0 %vm515_vm0, %v4960_v1  ;;  %3139 = vmatprep.mubr.msk.f32.mxu1 %vm515_vm0, %v4960_v1  ;;  %vm2257_vm9 = vcmp.eq.s32.totalorder %v4281_v25, %v5095_v10  ;;  %vm2258_vm12 = vcmp.eq.s32.totalorder %v4289_v26, %v5095_v10 }
 0x1a7   : > { %3386 = vmatpush1.bf16.msk.msra.mxu0 %vm3385_vm15, %v3824_v16  ;;  %vm2307_vm1 = vmor %vm2255_vm10, %vm2283_vm11  ;;  %vm2285_vm10 = vcmp.eq.s32.totalorder %v4281_v25, %v5098_v11 }
 0x1a8   : > { %vm2308_vm4 = vmor %vm2256_vm13, %vm2284_vm14  ;;  %3387 = vmatprep.subr.bf16.mxu0 %v3823_v3  ;;  %vm2286_vm13 = vcmp.eq.s32.totalorder %v4289_v26, %v5098_v11 }
 0x1a9   : > { %vm3421_vm7 = vmpackc.low %vm2308_vm4, %vm2307_vm1  ;;  %vm1998_vm1 = vcmp.eq.s32.totalorder %v4307_v27, %v5079_v8  ;;  %vm1999_vm4 = vcmp.eq.s32.totalorder %v4315_v28, %v5079_v8 }
 0x1aa   : > { %3422 = vmatpush1.bf16.msk.msra.mxu1 %vm3421_vm7, %v3824_v16  ;;  %vm2048_vm8 = vmor %vm1996_vm2, %vm2024_vm3  ;;  %vm2026_vm2 = vcmp.eq.s32.totalorder %v4307_v27, %v5082_v9 }
 0x1ab   : > { %3423 = vmatprep.subr.bf16.mxu1 %v3823_v3  ;;  %vm2049_vm11 = vmor %vm1997_vm5, %vm2025_vm6  ;;  %vm2027_vm5 = vcmp.eq.s32.totalorder %v4315_v28, %v5082_v9 }
 0x1ac   : > { %vm3388_vm14 = vmpackc.low %vm2049_vm11, %vm2048_vm8  ;;  %vm2259_vm8 = vcmp.eq.s32.totalorder %v4307_v27, %v5095_v10  ;;  %vm2260_vm11 = vcmp.eq.s32.totalorder %v4315_v28, %v5095_v10 }
 0x1ad   : > { %3389 = vmatpush1.bf16.msk.msra.mxu0 %vm3388_vm14, %v3824_v16  ;;  %vm2309_vm15 = vmor %vm2257_vm9, %vm2285_vm10  ;;  %vm2287_vm9 = vcmp.eq.s32.totalorder %v4307_v27, %v5098_v11 }
 0x1ae   : > { %vm2310_vm3 = vmor %vm2258_vm12, %vm2286_vm13  ;;  %3390 = vmatprep.subr.bf16.mxu0 %v3823_v3  ;;  %vm2288_vm12 = vcmp.eq.s32.totalorder %v4315_v28, %v5098_v11 }
 0x1af   : > { %vm3424_vm6 = vmpackc.low %vm2310_vm3, %vm2309_vm15  ;;  %vm2000_vm15 = vcmp.eq.s32.totalorder %v4333_v29, %v5079_v8  ;;  %vm2001_vm3 = vcmp.eq.s32.totalorder %v4341_v30, %v5079_v8 }
 0x1b0   : > { %3425 = vmatpush1.bf16.msk.msra.mxu1 %vm3424_vm6, %v3824_v16  ;;  %vm2050_vm7 = vmor %vm1998_vm1, %vm2026_vm2  ;;  %vm2028_vm1 = vcmp.eq.s32.totalorder %v4333_v29, %v5082_v9 }
 0x1b1   : > { %3426 = vmatprep.subr.bf16.mxu1 %v3823_v3  ;;  %vm2051_vm10 = vmor %vm1999_vm4, %vm2027_vm5  ;;  %vm2029_vm4 = vcmp.eq.s32.totalorder %v4341_v30, %v5082_v9 }
 0x1b2   : > { %vm3391_vm13 = vmpackc.low %vm2051_vm10, %vm2050_vm7  ;;  %vm2261_vm7 = vcmp.eq.s32.totalorder %v4333_v29, %v5095_v10  ;;  %vm2262_vm10 = vcmp.eq.s32.totalorder %v4341_v30, %v5095_v10 }
 0x1b3   : > { %3392 = vmatpush1.bf16.msk.msra.mxu0 %vm3391_vm13, %v3824_v16  ;;  %vm2311_vm14 = vmor %vm2259_vm8, %vm2287_vm9  ;;  %vm2289_vm8 = vcmp.eq.s32.totalorder %v4333_v29, %v5098_v11 }
 0x1b4   : > { %vm2312_vm2 = vmor %vm2260_vm11, %vm2288_vm12  ;;  %3393 = vmatprep.subr.bf16.mxu0 %v3823_v3  ;;  %vm2290_vm11 = vcmp.eq.s32.totalorder %v4341_v30, %v5098_v11 }
 0x1b5   : > { %vm3427_vm5 = vmpackc.low %vm2312_vm2, %vm2311_vm14  ;;  %vm2002_vm14 = vcmp.eq.s32.totalorder %v4359_v31, %v5079_v8  ;;  %vm2003_vm2 = vcmp.eq.s32.totalorder %v4367_v32, %v5079_v8 }
 0x1b6   : > { %3428 = vmatpush1.bf16.msk.msra.mxu1 %vm3427_vm5, %v3824_v16  ;;  %vm2052_vm6 = vmor %vm2000_vm15, %vm2028_vm1  ;;  %vm2030_vm15 = vcmp.eq.s32.totalorder %v4359_v31, %v5082_v9 }
 0x1b7   : > { %3429 = vmatprep.subr.bf16.mxu1 %v3823_v3  ;;  %vm2053_vm9 = vmor %vm2001_vm3, %vm2029_vm4  ;;  %vm2031_vm3 = vcmp.eq.s32.totalorder %v4367_v32, %v5082_v9 }
 0x1b8   : > { %vm3394_vm12 = vmpackc.low %vm2053_vm9, %vm2052_vm6  ;;  %vm2263_vm6 = vcmp.eq.s32.totalorder %v4359_v31, %v5095_v10  ;;  %vm2264_vm9 = vcmp.eq.s32.totalorder %v4367_v32, %v5095_v10 }
 0x1b9   : > { %3395 = vmatpush1.bf16.msk.msra.mxu0 %vm3394_vm12, %v3824_v16  ;;  %vm2313_vm13 = vmor %vm2261_vm7, %vm2289_vm8  ;;  %vm2291_vm7 = vcmp.eq.s32.totalorder %v4359_v31, %v5098_v11 }
 0x1ba   : > { %vm2314_vm1 = vmor %vm2262_vm10, %vm2290_vm11  ;;  %3396 = vmatprep.subr.bf16.mxu0 %v3823_v3  ;;  %vm2292_vm10 = vcmp.eq.s32.totalorder %v4367_v32, %v5098_v11 }
 0x1bb   : > { %vm3430_vm4 = vmpackc.low %vm2314_vm1, %vm2313_vm13  ;;  %vm2004_vm13 = vcmp.eq.s32.totalorder %v4385_v33, %v5079_v8  ;;  %vm2005_vm1 = vcmp.eq.s32.totalorder %v4393_v34, %v5079_v8 }
 0x1bc   : > { %3431 = vmatpush1.bf16.msk.msra.mxu1 %vm3430_vm4, %v3824_v16  ;;  %vm2054_vm5 = vmor %vm2002_vm14, %vm2030_vm15  ;;  %vm2032_vm14 = vcmp.eq.s32.totalorder %v4385_v33, %v5082_v9 }
 0x1bd   : > { %3432 = vmatprep.subr.bf16.mxu1 %v3823_v3  ;;  %vm2055_vm8 = vmor %vm2003_vm2, %vm2031_vm3  ;;  %vm2033_vm2 = vcmp.eq.s32.totalorder %v4393_v34, %v5082_v9 }
 0x1be   : > { %vm3397_vm11 = vmpackc.low %vm2055_vm8, %vm2054_vm5  ;;  %vm2265_vm5 = vcmp.eq.s32.totalorder %v4385_v33, %v5095_v10  ;;  %vm2266_vm8 = vcmp.eq.s32.totalorder %v4393_v34, %v5095_v10 }
 0x1bf   : > { %3398 = vmatpush1.bf16.msk.msra.mxu0 %vm3397_vm11, %v3824_v16  ;;  %vm2315_vm12 = vmor %vm2263_vm6, %vm2291_vm7  ;;  %vm2293_vm6 = vcmp.eq.s32.totalorder %v4385_v33, %v5098_v11 }
 0x1c0   : > { %vm2316_vm15 = vmor %vm2264_vm9, %vm2292_vm10  ;;  %3399 = vmatprep.subr.bf16.mxu0 %v3823_v3  ;;  %vm2294_vm9 = vcmp.eq.s32.totalorder %v4393_v34, %v5098_v11 }
 0x1c1   : > { %vm3433_vm3 = vmpackc.low %vm2316_vm15, %vm2315_vm12  ;;  %vm2006_vm12 = vcmp.eq.s32.totalorder %v4411_v35, %v5079_v8  ;;  %vm2007_vm15 = vcmp.eq.s32.totalorder %v4419_v36, %v5079_v8 }
 0x1c2   : > { %3434 = vmatpush1.bf16.msk.msra.mxu1 %vm3433_vm3, %v3824_v16  ;;  %vm2056_vm4 = vmor %vm2004_vm13, %vm2032_vm14  ;;  %vm2034_vm13 = vcmp.eq.s32.totalorder %v4411_v35, %v5082_v9 }
 0x1c3   : > { %3435 = vmatprep.subr.bf16.mxu1 %v3823_v3  ;;  %vm2057_vm7 = vmor %vm2005_vm1, %vm2033_vm2  ;;  %vm2035_vm1 = vcmp.eq.s32.totalorder %v4419_v36, %v5082_v9 }
 0x1c4   : > { %vm3400_vm10 = vmpackc.low %vm2057_vm7, %vm2056_vm4  ;;  %vm2267_vm4 = vcmp.eq.s32.totalorder %v4411_v35, %v5095_v10  ;;  %vm2268_vm7 = vcmp.eq.s32.totalorder %v4419_v36, %v5095_v10 }
 0x1c5   : > { %3401 = vmatpush1.bf16.msk.msra.mxu0 %vm3400_vm10, %v3824_v16  ;;  %vm2317_vm11 = vmor %vm2265_vm5, %vm2293_vm6  ;;  %vm2295_vm5 = vcmp.eq.s32.totalorder %v4411_v35, %v5098_v11 }
 0x1c6   : > { %vm2318_vm14 = vmor %vm2266_vm8, %vm2294_vm9  ;;  %3402 = vmatprep.subr.bf16.mxu0 %v3823_v3  ;;  %vm2296_vm8 = vcmp.eq.s32.totalorder %v4419_v36, %v5098_v11 }
 0x1c7   : > { %vm3436_vm2 = vmpackc.low %vm2318_vm14, %vm2317_vm11  ;;  %vm2506_vm14 = vcmask 1042432  }
 0x1c8   : > { %3437 = vmatpush1.bf16.msk.msra.mxu1 %vm3436_vm2, %v3824_v16  ;;  %vm2058_vm3 = vmor %vm2006_vm12, %vm2034_vm13  ;;  %vm2504_vm13 = vcmask 1041408   ;;  %vm2512_vm2 = vcmask 1045504  }
 0x1c9   : > { %3438 = vmatprep.subr.bf16.mxu1 %v3823_v3  ;;  %vm2059_vm6 = vmor %vm2007_vm15, %vm2035_vm1  ;;  %v606_v23 = vpop.f32.mrb[0].mxu0  ;;  %vm2508_vm15 = vcmask 1043456   ;;  %vm2510_vm1 = vcmask 1044480  }
 0x1ca   : > { %vm3403_vm9 = vmpackc.low %vm2059_vm6, %vm2058_vm3  ;;  %v608_v24 = vpop.f32.mrb[1].mxu0  ;;  %vm2514_vm3 = vcmask 1046528  }
 0x1cb   : > { %3404 = vmatpush1.bf16.msk.msra.mxu0 %vm3403_vm9, %v3824_v16  ;;  %vm2319_vm10 = vmor %vm2267_vm4, %vm2295_vm5 }
 0x1cc   : > { %vm2320_vm11 = vmor %vm2268_vm7, %vm2296_vm8  ;;  %v869_v25 = vpop.f32.mrb[0].mxu1 }
 0x1cd   : > { %vm3439_vm12 = vmpackc.low %vm2320_vm11, %vm2319_vm10  ;;  %v871_v26 = vpop.f32.mrb[1].mxu1  ;;  %v611_v27 = vpop.f32.mrb[2].mxu0 }
 0x1ce   : > { %3440 = vmatpush1.bf16.msk.msra.mxu1 %vm3439_vm12, %v3824_v16  ;;  %2173 = vmatmul.mubr.f32.vlgmr.msra.gmra.mrb[48].mxu0 %v5111_v5  ;;  %v613_v3 = vpop.f32.mrb[3].mxu0 }
 0x1cf   : > { %3082 = vmatprep.mubr.msk.f32.mxu0 %vm515_vm0, %v5123_v12 }
 0x1d0   : > { %v874_v28 = vpop.f32.mrb[2].mxu1 }
 0x1d1   : > { %2434 = vmatmul.mubr.f32.vlgmr.msra.gmra.mrb[48].mxu1 %v5111_v5  ;;  %v876_v29 = vpop.f32.mrb[3].mxu1  ;;  %v616_v30 = vpop.f32.mrb[4].mxu0 }
 0x1d2   : > { %3140 = vmatprep.mubr.msk.f32.mxu1 %vm515_vm0, %v5123_v12  ;;  %2178 = vmatmul.mubr.f32.gmra.mrb[50].mxu0 %v5135_v4  ;;  %v618_v31 = vpop.f32.mrb[5].mxu0  ;;  %v5471_v29 = vstv %s2684_s26 }
 0x1d3   : > { %3083 = vmatprep.mubr.msk.f32.mxu0 %vm515_vm0, %v5143_v7 }
 0x1d4   : > { %v879_v16 = vpop.f32.mrb[4].mxu1 }
 0x1d5   : > { %2439 = vmatmul.mubr.f32.gmra.mrb[50].mxu1 %v5135_v4  ;;  %v881_v32 = vpop.f32.mrb[5].mxu1 }
 0x1d6   : > { %3141 = vmatprep.mubr.msk.f32.mxu1 %vm515_vm0, %v5143_v7  ;;  %2183 = vmatmul.mubr.f32.gmra.mrb[52].mxu0 %v5160_v13  ;;  %v621_v33 = vpop.f32.mrb[6].mxu0 }
 0x1d7   : > { %3084 = vmatprep.mubr.msk.f32.mxu0 %vm515_vm0, %v5168_v14  ;;  %v623_v34 = vpop.f32.mrb[7].mxu0 }
 0x1d8   : > { %v884_v35 = vpop.f32.mrb[6].mxu1 }
 0x1d9   : > { %2444 = vmatmul.mubr.f32.gmra.mrb[52].mxu1 %v5160_v13  ;;  %v886_v36 = vpop.f32.mrb[7].mxu1 }
 0x1da   : > { %3142 = vmatprep.mubr.msk.f32.mxu1 %vm515_vm0, %v5168_v14  ;;  %2188 = vmatmul.mubr.f32.gmra.mrb[54].mxu0 %v5190_v15  ;;  %v626_v39 = vpop.f32.mrb[8].mxu0 }
 0x1db   : > { %3085 = vmatprep.mubr.msk.f32.mxu0 %vm515_vm0, %v5193_v37  ;;  %v645_v40 = vmul.f32 %v626_v39, %v606_v23  ;;  %v628_v41 = vpop.f32.mrb[9].mxu0  ;;  %v5466_v23 = vld [vmem:[%s294_s22] sm:$0xff] }
 0x1dc   : > { %v889_v42 = vpop.f32.mrb[8].mxu1 }
 0x1dd   : > { %2449 = vmatmul.mubr.f32.gmra.mrb[54].mxu1 %v5190_v15  ;;  %v908_v43 = vmul.f32 %v889_v42, %v869_v25  ;;  %v891_v44 = vpop.f32.mrb[9].mxu1  ;;  %v5468_v25 = vstv %s359_s14 }
 0x1de   : > { %3143 = vmatprep.mubr.msk.f32.mxu1 %vm515_vm0, %v5193_v37  ;;  %2193 = vmatmul.mubr.f32.gmra.mrb[56].mxu0 %v5210_v17 }
 0x1df   : > { %3086 = vmatprep.mubr.msk.f32.mxu0 %vm515_vm0, %v5218_v18  ;;  %v631_v45 = vpop.f32.mrb[10].mxu0 }
 0x1e0   : > { %v646_v46 = vmul.f32 %v631_v45, %v611_v27  ;;  %v894_v47 = vpop.f32.mrb[10].mxu1  ;;  %v633_v48 = vpop.f32.mrb[11].mxu0 }
 0x1e1   : > { %2454 = vmatmul.mubr.f32.gmra.mrb[56].mxu1 %v5210_v17  ;;  %v909_v49 = vmul.f32 %v894_v47, %v874_v28  ;;  %v896_v50 = vpop.f32.mrb[11].mxu1 }
 0x1e2   : > { %3144 = vmatprep.mubr.msk.f32.mxu1 %vm515_vm0, %v5218_v18  ;;  %2198 = vmatmul.mubr.f32.gmra.mrb[58].mxu0 %v5240_v19  ;;  %v649_v51 = vadd.f32 %v646_v46, %v645_v40 }
 0x1e3   : > { %3087 = vmatprep.mubr.msk.f32.mxu0 %vm515_vm0, %v5244_v20  ;;  %v912_v52 = vadd.f32 %v909_v49, %v908_v43  ;;  %v636_v53 = vpop.f32.mrb[12].mxu0 }
 0x1e4   : > { %v647_v54 = vmul.f32 %v636_v53, %v616_v30  ;;  %v899_v55 = vpop.f32.mrb[12].mxu1  ;;  %v638_v56 = vpop.f32.mrb[13].mxu0 }
 0x1e5   : > { %2459 = vmatmul.mubr.f32.gmra.mrb[58].mxu1 %v5240_v19  ;;  %v910_v57 = vmul.f32 %v899_v55, %v879_v16  ;;  %v901_v58 = vpop.f32.mrb[13].mxu1 }
 0x1e6   : > { %3145 = vmatprep.mubr.msk.f32.mxu1 %vm515_vm0, %v5244_v20  ;;  %2203 = vmatmul.mubr.f32.gmra.mrb[60].mxu0 %v5260_v38  ;;  %v650_v59 = vadd.f32 %v649_v51, %v647_v54 }
 0x1e7   : > { %3088 = vmatprep.mubr.msk.f32.mxu0 %vm515_vm0, %v5274_v21  ;;  %v913_v60 = vadd.f32 %v912_v52, %v910_v57  ;;  %v641_v61 = vpop.f32.mrb[14].mxu0 }
 0x1e8   : > { %v648_v62 = vmul.f32 %v641_v61, %v621_v33  ;;  %v904_v63 = vpop.f32.mrb[14].mxu1  ;;  %v643_v0 = vpop.f32.mrb[15].mxu0 }
 0x1e9   : > { %2464 = vmatmul.mubr.f32.gmra.mrb[60].mxu1 %v5260_v38  ;;  %v911_v1 = vmul.f32 %v904_v63, %v884_v35  ;;  %v906_v2 = vpop.f32.mrb[15].mxu1 }
 0x1ea   : > { %3146 = vmatprep.mubr.msk.f32.mxu1 %vm515_vm0, %v5274_v21  ;;  %2208 = vmatmul.mubr.f32.gmra.mrb[62].mxu0 %v5285_v22  ;;  %v651_v6 = vadd.f32 %v650_v59, %v648_v62  ;;  %vm2502_vm0 = vcmask 1040384  }
 0x1eb   : > { %v914_v8 = vadd.f32 %v913_v60, %v911_v1 }
 0x1ec   : > { %v652_v9 = vrot.slane %v651_v6, 4 }
 0x1ed   : > { %2469 = vmatmul.mubr.f32.gmra.mrb[62].mxu1 %v5285_v22  ;;  %v915_v10 = vrot.slane %v914_v8, 4 }
 0x1ee   : > { %v653_v11 = vadd.f32 %v652_v9, %v651_v6 }
 0x1ef   : > { %v916_v5 = vadd.f32 %v915_v10, %v914_v8 }
 0x1f0   : > { %v654_v12 = vrot.slane %v653_v11, 2 }
 0x1f1   : > { %v917_v4 = vrot.slane %v916_v5, 2 }
 0x1f2   : > { %v655_v7 = vadd.f32 %v654_v12, %v653_v11 }
 0x1f3   : > { %v918_v13 = vadd.f32 %v917_v4, %v916_v5 }
 0x1f4   : > { %v656_v14 = vrot.slane %v655_v7, 1 }
 0x1f5   : > { %v919_v15 = vrot.slane %v918_v13, 1 }
 0x1f6   : > { %v657_v37 = vadd.f32 %v656_v14, %v655_v7 }
 0x1f7   : > { %v920_v17 = vadd.f32 %v919_v15, %v918_v13 }
 0x1f8   : > { %v2741_v18 = vmul.f32 -1.442695, %v657_v37 }
 0x1f9   : > { %v2799_v19 = vmul.f32 -1.442695, %v920_v17 }
 0x1fa   : > { %3522 = vpow2.f32 %v2741_v18 }
 0x1fb   : > { %3524 = vpow2.f32 %v2799_v19 }
 0x204   : > { %v3523_v20 = vpop.eup %3522 }
 0x205   : > { %v3525_v38 = vpop.eup %3524  ;;  %v661_v21 = vadd.f32 1.0, %v3523_v20 }
 0x206   : > { %v924_v22 = vadd.f32 1.0, %v3525_v38 }
 0x207   : > { %3526 = vrcp.f32 %v661_v21 }
 0x208   : > { %3528 = vrcp.f32 %v924_v22 }
 0x211   : > { %v3527_v24 = vpop.eup %3526  ;;  %v1130_v26 = vpop.f32.mrb[16].mxu0 }
 0x212   : > { %v3529_v27 = vpop.eup %3528  ;;  %v664_v3 = vmul.f32 %v3527_v24, %v5466_v23  ;;  %v1132_v28 = vpop.f32.mrb[17].mxu0 }
 0x213   : > { %v927_v30 = vmul.f32 %v3529_v27, %v5466_v23 }
 0x214   : > { %v666_v31 = vmul.f32 %v5468_v25, %v664_v3  ;;  %v1391_v16 = vpop.f32.mrb[16].mxu1 }
 0x215   : > { %v928_v32 = vmul.f32 %v927_v30, %v5468_v25  ;;  %v1393_v33 = vpop.f32.mrb[17].mxu1  ;;  %v1135_v34 = vpop.f32.mrb[18].mxu0 }
 0x216   : > { %v668_v35 = vadd.f32 %v5471_v29, %v666_v31  ;;  %v1137_v36 = vpop.f32.mrb[19].mxu0 }
 0x217   : > { %v929_v39 = vadd.f32 %v928_v32, %v5471_v29 }
 0x218   : > { %v2742_v40 = vmul.f32 -1.442695, %v668_v35  ;;  %v1396_v41 = vpop.f32.mrb[18].mxu1 }
 0x219   : > { %v2800_v42 = vmul.f32 -1.442695, %v929_v39  ;;  %v1398_v43 = vpop.f32.mrb[19].mxu1  ;;  %v1140_v44 = vpop.f32.mrb[20].mxu0 }
 0x21a   : > { %3530 = vpow2.f32 %v2742_v40  ;;  %v1142_v45 = vpop.f32.mrb[21].mxu0 }
 0x21b   : > { %3532 = vpow2.f32 %v2800_v42 }
 0x21c   : > { %v1401_v46 = vpop.f32.mrb[20].mxu1 }
 0x21d   : > { %v1403_v47 = vpop.f32.mrb[21].mxu1 }
 0x21e   : > { %v1145_v48 = vpop.f32.mrb[22].mxu0 }
 0x21f   : > { %v1147_v49 = vpop.f32.mrb[23].mxu0 }
 0x220   : > { %v1406_v50 = vpop.f32.mrb[22].mxu1 }
 0x221   : > { %v1408_v51 = vpop.f32.mrb[23].mxu1 }
 0x222   : > { %v1150_v52 = vpop.f32.mrb[24].mxu0 }
 0x223   : > { %v1169_v53 = vmul.f32 %v1150_v52, %v1130_v26  ;;  %v1152_v54 = vpop.f32.mrb[25].mxu0 }
 0x224   : > { %v3531_v55 = vpop.eup %3530  ;;  %v1411_v56 = vpop.f32.mrb[24].mxu1 }
 0x225   : > { %v3533_v57 = vpop.eup %3532  ;;  %v672_v58 = vadd.f32 1.0, %v3531_v55  ;;  %v1430_v59 = vmul.f32 %v1411_v56, %v1391_v16  ;;  %v1413_v60 = vpop.f32.mrb[25].mxu1 }
 0x226   : > { %v933_v61 = vadd.f32 1.0, %v3533_v57 }
 0x227   : > { %3534 = vrcp.f32 %v672_v58  ;;  %v1155_v62 = vpop.f32.mrb[26].mxu0 }
 0x228   : > { %3536 = vrcp.f32 %v933_v61  ;;  %v1170_v63 = vmul.f32 %v1155_v62, %v1135_v34  ;;  %v1416_v0 = vpop.f32.mrb[26].mxu1  ;;  %v1157_v1 = vpop.f32.mrb[27].mxu0 }
 0x229   : > { %v1431_v2 = vmul.f32 %v1416_v0, %v1396_v41  ;;  %v1418_v6 = vpop.f32.mrb[27].mxu1 }
 0x22a   : > { %v1173_v8 = vadd.f32 %v1170_v63, %v1169_v53 }
 0x22b   : > { %v1434_v9 = vadd.f32 %v1431_v2, %v1430_v59  ;;  %v1160_v10 = vpop.f32.mrb[28].mxu0 }
 0x22c   : > { %v1171_v11 = vmul.f32 %v1160_v10, %v1140_v44  ;;  %v1421_v5 = vpop.f32.mrb[28].mxu1  ;;  %v1162_v12 = vpop.f32.mrb[29].mxu0 }
 0x22d   : > { %v1432_v4 = vmul.f32 %v1421_v5, %v1401_v46  ;;  %v1423_v7 = vpop.f32.mrb[29].mxu1 }
 0x22e   : > { %v1174_v13 = vadd.f32 %v1173_v8, %v1171_v11 }
 0x22f   : > { %v1435_v14 = vadd.f32 %v1434_v9, %v1432_v4  ;;  %v1165_v15 = vpop.f32.mrb[30].mxu0 }
 0x230   : > { %v1172_v37 = vmul.f32 %v1165_v15, %v1145_v48  ;;  %v1426_v17 = vpop.f32.mrb[30].mxu1  ;;  %v1167_v18 = vpop.f32.mrb[31].mxu0 }
 0x231   : > { %v3535_v19 = vpop.eup %3534  ;;  %v1433_v20 = vmul.f32 %v1426_v17, %v1406_v50  ;;  %v1428_v38 = vpop.f32.mrb[31].mxu1 }
 0x232   : > { %v3537_v21 = vpop.eup %3536  ;;  %v1175_v22 = vadd.f32 %v1174_v13, %v1172_v37 }
 0x233   : > { %v1436_v24 = vadd.f32 %v1435_v14, %v1433_v20  ;;  %v5478_v26 = vsel %vm2502_vm0, %v3535_v19, %v3537_v21 }
 0x234   : > { %v1176_v27 = vrot.slane %v1175_v22, 4 }
 0x235   : > { %v1437_v3 = vrot.slane %v1436_v24, 4 }
 0x236   : > { %v1177_v28 = vadd.f32 %v1176_v27, %v1175_v22 }
 0x237   : > { %v1438_v30 = vadd.f32 %v1437_v3, %v1436_v24 }
 0x238   : > { %v1178_v31 = vrot.slane %v1177_v28, 2 }
 0x239   : > { %v1439_v16 = vrot.slane %v1438_v30, 2 }
 0x23a   : > { %v1179_v32 = vadd.f32 %v1178_v31, %v1177_v28 }
 0x23b   : > { %v1440_v33 = vadd.f32 %v1439_v16, %v1438_v30 }
 0x23c   : > { %v1180_v34 = vrot.slane %v1179_v32, 1 }
 0x23d   : > { %v1441_v35 = vrot.slane %v1440_v33, 1 }
 0x23e   : > { %v1181_v36 = vadd.f32 %v1180_v34, %v1179_v32 }
 0x23f   : > { %v1442_v39 = vadd.f32 %v1441_v35, %v1440_v33 }
 0x240   : > { %v2857_v40 = vmul.f32 -1.442695, %v1181_v36 }
 0x241   : > { %v2915_v41 = vmul.f32 -1.442695, %v1442_v39 }
 0x242   : > { %3538 = vpow2.f32 %v2857_v40 }
 0x243   : > { %3540 = vpow2.f32 %v2915_v41 }
 0x24c   : > { %v3539_v42 = vpop.eup %3538 }
 0x24d   : > { %v3541_v43 = vpop.eup %3540  ;;  %v1185_v44 = vadd.f32 1.0, %v3539_v42 }
 0x24e   : > { %v1446_v45 = vadd.f32 1.0, %v3541_v43 }
 0x24f   : > { %3542 = vrcp.f32 %v1185_v44 }
 0x250   : > { %3544 = vrcp.f32 %v1446_v45 }
 0x259   : > { %v3543_v46 = vpop.eup %3542  ;;  %v1652_v47 = vpop.f32.mrb[32].mxu0 }
 0x25a   : > { %v3545_v48 = vpop.eup %3544  ;;  %v1188_v49 = vmul.f32 %v3543_v46, %v5466_v23  ;;  %v1654_v50 = vpop.f32.mrb[33].mxu0 }
 0x25b   : > { %v1449_v51 = vmul.f32 %v3545_v48, %v5466_v23 }
 0x25c   : > { %v1189_v52 = vmul.f32 %v1188_v49, %v5468_v25  ;;  %v1913_v53 = vpop.f32.mrb[32].mxu1 }
 0x25d   : > { %v1450_v54 = vmul.f32 %v1449_v51, %v5468_v25  ;;  %v1915_v55 = vpop.f32.mrb[33].mxu1  ;;  %v1657_v56 = vpop.f32.mrb[34].mxu0 }
 0x25e   : > { %v1190_v57 = vadd.f32 %v1189_v52, %v5471_v29  ;;  %v1659_v58 = vpop.f32.mrb[35].mxu0 }
 0x25f   : > { %v1451_v59 = vadd.f32 %v1450_v54, %v5471_v29 }
 0x260   : > { %v2858_v60 = vmul.f32 -1.442695, %v1190_v57  ;;  %v1918_v61 = vpop.f32.mrb[34].mxu1 }
 0x261   : > { %v2916_v62 = vmul.f32 -1.442695, %v1451_v59  ;;  %v1920_v63 = vpop.f32.mrb[35].mxu1  ;;  %v1662_v0 = vpop.f32.mrb[36].mxu0 }
 0x262   : > { %3546 = vpow2.f32 %v2858_v60  ;;  %v1664_v1 = vpop.f32.mrb[37].mxu0 }
 0x263   : > { %3548 = vpow2.f32 %v2916_v62 }
 0x264   : > { %v1923_v2 = vpop.f32.mrb[36].mxu1 }
 0x265   : > { %v1925_v6 = vpop.f32.mrb[37].mxu1 }
 0x266   : > { %v1667_v8 = vpop.f32.mrb[38].mxu0 }
 0x267   : > { %v1669_v9 = vpop.f32.mrb[39].mxu0 }
 0x268   : > { %v1928_v10 = vpop.f32.mrb[38].mxu1 }
 0x269   : > { %v1930_v11 = vpop.f32.mrb[39].mxu1 }
 0x26a   : > { %v1672_v5 = vpop.f32.mrb[40].mxu0 }
 0x26b   : > { %v1691_v12 = vmul.f32 %v1672_v5, %v1652_v47  ;;  %v1674_v4 = vpop.f32.mrb[41].mxu0 }
 0x26c   : > { %v3547_v7 = vpop.eup %3546  ;;  %v1933_v13 = vpop.f32.mrb[40].mxu1 }
 0x26d   : > { %v3549_v14 = vpop.eup %3548  ;;  %v1194_v15 = vadd.f32 1.0, %v3547_v7  ;;  %v1952_v37 = vmul.f32 %v1933_v13, %v1913_v53  ;;  %v1935_v17 = vpop.f32.mrb[41].mxu1 }
 0x26e   : > { %v1455_v18 = vadd.f32 1.0, %v3549_v14 }
 0x26f   : > { %3550 = vrcp.f32 %v1194_v15  ;;  %v1677_v19 = vpop.f32.mrb[42].mxu0 }
 0x270   : > { %3552 = vrcp.f32 %v1455_v18  ;;  %v1692_v20 = vmul.f32 %v1677_v19, %v1657_v56  ;;  %v1938_v38 = vpop.f32.mrb[42].mxu1  ;;  %v1679_v21 = vpop.f32.mrb[43].mxu0 }
 0x271   : > { %v1953_v22 = vmul.f32 %v1938_v38, %v1918_v61  ;;  %v1940_v24 = vpop.f32.mrb[43].mxu1 }
 0x272   : > { %v1695_v27 = vadd.f32 %v1692_v20, %v1691_v12 }
 0x273   : > { %v1956_v3 = vadd.f32 %v1953_v22, %v1952_v37  ;;  %v1682_v28 = vpop.f32.mrb[44].mxu0 }
 0x274   : > { %v1693_v30 = vmul.f32 %v1682_v28, %v1662_v0  ;;  %v1943_v31 = vpop.f32.mrb[44].mxu1  ;;  %v1684_v16 = vpop.f32.mrb[45].mxu0 }
 0x275   : > { %v1954_v32 = vmul.f32 %v1943_v31, %v1923_v2  ;;  %v1945_v33 = vpop.f32.mrb[45].mxu1 }
 0x276   : > { %v1696_v34 = vadd.f32 %v1695_v27, %v1693_v30 }
 0x277   : > { %v1957_v35 = vadd.f32 %v1956_v3, %v1954_v32  ;;  %v1687_v36 = vpop.f32.mrb[46].mxu0 }
 0x278   : > { %v1694_v39 = vmul.f32 %v1687_v36, %v1667_v8  ;;  %v1948_v40 = vpop.f32.mrb[46].mxu1  ;;  %v1689_v41 = vpop.f32.mrb[47].mxu0 }
 0x279   : > { %v3551_v42 = vpop.eup %3550  ;;  %v1955_v43 = vmul.f32 %v1948_v40, %v1928_v10  ;;  %v1950_v44 = vpop.f32.mrb[47].mxu1 }
 0x27a   : > { %v3553_v45 = vpop.eup %3552  ;;  %v1697_v46 = vadd.f32 %v1696_v34, %v1694_v39  ;;  %v2505_v47 = vsel %vm2504_vm13, %v5478_v26, %v3551_v42 }
 0x27b   : > { %v1958_v48 = vadd.f32 %v1957_v35, %v1955_v43  ;;  %v5487_v49 = vsel %vm2506_vm14, %v2505_v47, %v3553_v45 }
 0x27c   : > { %v1698_v50 = vrot.slane %v1697_v46, 4 }
 0x27d   : > { %v1959_v51 = vrot.slane %v1958_v48, 4 }
 0x27e   : > { %v1699_v52 = vadd.f32 %v1698_v50, %v1697_v46 }
 0x27f   : > { %v1960_v53 = vadd.f32 %v1959_v51, %v1958_v48 }
 0x280   : > { %v1700_v54 = vrot.slane %v1699_v52, 2 }
 0x281   : > { %v1961_v55 = vrot.slane %v1960_v53, 2 }
 0x282   : > { %v1701_v56 = vadd.f32 %v1700_v54, %v1699_v52 }
 0x283   : > { %v1962_v57 = vadd.f32 %v1961_v55, %v1960_v53 }
 0x284   : > { %v1702_v58 = vrot.slane %v1701_v56, 1 }
 0x285   : > { %v1963_v59 = vrot.slane %v1962_v57, 1 }
 0x286   : > { %v1703_v60 = vadd.f32 %v1702_v58, %v1701_v56 }
 0x287   : > { %v1964_v61 = vadd.f32 %v1963_v59, %v1962_v57 }
 0x288   : > { %v2973_v62 = vmul.f32 -1.442695, %v1703_v60 }
 0x289   : > { %v3031_v63 = vmul.f32 -1.442695, %v1964_v61 }
 0x28a   : > { %3554 = vpow2.f32 %v2973_v62 }
 0x28b   : > { %3556 = vpow2.f32 %v3031_v63 }
 0x294   : > { %v3555_v26 = vpop.eup %3554 }
 0x295   : > { %v3557_v0 = vpop.eup %3556  ;;  %v1707_v1 = vadd.f32 1.0, %v3555_v26 }
 0x296   : > { %v1968_v2 = vadd.f32 1.0, %v3557_v0 }
 0x297   : > { %3558 = vrcp.f32 %v1707_v1 }
 0x298   : > { %3560 = vrcp.f32 %v1968_v2 }
 0x2a1   : > { %v3559_v6 = vpop.eup %3558  ;;  %v2174_v8 = vpop.f32.mrb[48].mxu0 }
 0x2a2   : > { %v3561_v9 = vpop.eup %3560  ;;  %v1710_v10 = vmul.f32 %v3559_v6, %v5466_v23  ;;  %v2176_v11 = vpop.f32.mrb[49].mxu0 }
 0x2a3   : > { %v1971_v5 = vmul.f32 %v3561_v9, %v5466_v23 }
 0x2a4   : > { %v1711_v12 = vmul.f32 %v1710_v10, %v5468_v25  ;;  %v2435_v4 = vpop.f32.mrb[48].mxu1 }
 0x2a5   : > { %v1972_v7 = vmul.f32 %v1971_v5, %v5468_v25  ;;  %v2437_v13 = vpop.f32.mrb[49].mxu1  ;;  %v2179_v14 = vpop.f32.mrb[50].mxu0 }
 0x2a6   : > { %v1712_v15 = vadd.f32 %v1711_v12, %v5471_v29  ;;  %v2181_v37 = vpop.f32.mrb[51].mxu0 }
 0x2a7   : > { %v1973_v17 = vadd.f32 %v1972_v7, %v5471_v29 }
 0x2a8   : > { %v2974_v18 = vmul.f32 -1.442695, %v1712_v15  ;;  %v2440_v19 = vpop.f32.mrb[50].mxu1 }
 0x2a9   : > { %v3032_v20 = vmul.f32 -1.442695, %v1973_v17  ;;  %v2442_v38 = vpop.f32.mrb[51].mxu1  ;;  %v2184_v21 = vpop.f32.mrb[52].mxu0 }
 0x2aa   : > { %3562 = vpow2.f32 %v2974_v18  ;;  %v2186_v22 = vpop.f32.mrb[53].mxu0 }
 0x2ab   : > { %3564 = vpow2.f32 %v3032_v20 }
 0x2ac   : > { %v2445_v24 = vpop.f32.mrb[52].mxu1 }
 0x2ad   : > { %v2447_v27 = vpop.f32.mrb[53].mxu1  ;;  %v2189_v3 = vpop.f32.mrb[54].mxu0 }
 0x2ae   : > { %v2191_v28 = vpop.f32.mrb[55].mxu0 }
 0x2b0   : > { %v2450_v30 = vpop.f32.mrb[54].mxu1 }
 0x2b1   : > { %v2452_v31 = vpop.f32.mrb[55].mxu1  ;;  %v2194_v16 = vpop.f32.mrb[56].mxu0 }
 0x2b2   : > { %v2213_v32 = vmul.f32 %v2194_v16, %v2174_v8  ;;  %v2196_v33 = vpop.f32.mrb[57].mxu0 }
 0x2b4   : > { %v3563_v34 = vpop.eup %3562  ;;  %v2455_v35 = vpop.f32.mrb[56].mxu1 }
 0x2b5   : > { %v3565_v36 = vpop.eup %3564  ;;  %v1716_v39 = vadd.f32 1.0, %v3563_v34  ;;  %v2474_v40 = vmul.f32 %v2455_v35, %v2435_v4  ;;  %v2457_v41 = vpop.f32.mrb[57].mxu1 }
 0x2b6   : > { %v2199_v42 = vpop.f32.mrb[58].mxu0  ;;  %v1977_v43 = vadd.f32 1.0, %v3565_v36 }
 0x2b7   : > { %v2214_v44 = vmul.f32 %v2199_v42, %v2179_v14  ;;  %v2201_v45 = vpop.f32.mrb[59].mxu0  ;;  %3566 = vrcp.f32 %v1716_v39 }
 0x2b8   : > { %3568 = vrcp.f32 %v1977_v43  ;;  %v2460_v47 = vpop.f32.mrb[58].mxu1 }
 0x2b9   : > { %v2217_v46 = vadd.f32 %v2214_v44, %v2213_v32  ;;  %v2475_v48 = vmul.f32 %v2460_v47, %v2440_v19  ;;  %v2462_v50 = vpop.f32.mrb[59].mxu1  ;;  %v2204_v51 = vpop.f32.mrb[60].mxu0 }
 0x2ba   : > { %v2215_v52 = vmul.f32 %v2204_v51, %v2184_v21  ;;  %v2206_v53 = vpop.f32.mrb[61].mxu0 }
 0x2bb   : > { %v2478_v54 = vadd.f32 %v2475_v48, %v2474_v40 }
 0x2bc   : > { %v2218_v55 = vadd.f32 %v2217_v46, %v2215_v52  ;;  %v2465_v56 = vpop.f32.mrb[60].mxu1 }
 0x2bd   : > { %v2476_v57 = vmul.f32 %v2465_v56, %v2445_v24  ;;  %v2467_v58 = vpop.f32.mrb[61].mxu1  ;;  %v2209_v59 = vpop.f32.mrb[62].mxu0 }
 0x2be   : > { %v2216_v60 = vmul.f32 %v2209_v59, %v2189_v3  ;;  %v2211_v61 = vpop.f32.mrb[63].mxu0 }
 0x2bf   : > { %v2479_v62 = vadd.f32 %v2478_v54, %v2476_v57 }
 0x2c0   : > { %v2219_v63 = vadd.f32 %v2218_v55, %v2216_v60  ;;  %v2470_v26 = vpop.f32.mrb[62].mxu1 }
 0x2c1   : > { %v3567_v0 = vpop.eup %3566  ;;  %v2477_v1 = vmul.f32 %v2470_v26, %v2450_v30  ;;  %v2472_v2 = vpop.f32.mrb[63].mxu1 }
 0x2c2   : > { %v3569_v6 = vpop.eup %3568  ;;  %v2220_v8 = vrot.slane %v2219_v63, 4  ;;  %v2509_v9 = vsel %vm2508_vm15, %v5487_v49, %v3567_v0 }
 0x2c3   : > { %v2480_v10 = vadd.f32 %v2479_v62, %v2477_v1  ;;  %v2511_v11 = vsel %vm2510_vm1, %v2509_v9, %v3569_v6 }
 0x2c4   : > { %v2221_v5 = vadd.f32 %v2220_v8, %v2219_v63 }
 0x2c5   : > { %v2481_v12 = vrot.slane %v2480_v10, 4 }
 0x2c6   : > { %v2222_v4 = vrot.slane %v2221_v5, 2 }
 0x2c7   : > { %v2482_v7 = vadd.f32 %v2481_v12, %v2480_v10 }
 0x2c8   : > { %v2223_v13 = vadd.f32 %v2222_v4, %v2221_v5 }
 0x2c9   : > { %v2483_v14 = vrot.slane %v2482_v7, 2 }
 0x2ca   : > { %v2224_v15 = vrot.slane %v2223_v13, 1 }
 0x2cb   : > { %v2484_v37 = vadd.f32 %v2483_v14, %v2482_v7 }
 0x2cc   : > { %v2225_v17 = vadd.f32 %v2224_v15, %v2223_v13 }
 0x2cd   : > { %v2485_v18 = vrot.slane %v2484_v37, 1 }
 0x2ce   : > { %v3089_v19 = vmul.f32 -1.442695, %v2225_v17 }
 0x2cf   : > { %v2486_v20 = vadd.f32 %v2485_v18, %v2484_v37 }
 0x2d0   : > { %3570 = vpow2.f32 %v3089_v19 }
 0x2d1   : > { %v3147_v38 = vmul.f32 -1.442695, %v2486_v20 }
 0x2d3   : > { %3572 = vpow2.f32 %v3147_v38 }
 0x2da   : > { %v3571_v21 = vpop.eup %3570 }
 0x2db   : > { %v2229_v22 = vadd.f32 1.0, %v3571_v21 }
 0x2dd   : > { %v3573_v49 = vpop.eup %3572  ;;  %3574 = vrcp.f32 %v2229_v22 }
 0x2de   : > { %v2490_v24 = vadd.f32 1.0, %v3573_v49 }
 0x2e0   : > { %3576 = vrcp.f32 %v2490_v24 }
 0x2e7   : > { %v3575_v27 = vpop.eup %3574 }
 0x2e8   : > { %v2232_v3 = vmul.f32 %v3575_v27, %v5466_v23 }
 0x2ea   : > { %v3577_v28 = vpop.eup %3576  ;;  %v2233_v30 = vmul.f32 %v2232_v3, %v5468_v25 }
 0x2eb   : > { %v2493_v31 = vmul.f32 %v3577_v28, %v5466_v23 }
 0x2ec   : > { %v2234_v16 = vadd.f32 %v2233_v30, %v5471_v29 }
 0x2ed   : > { %v2494_v32 = vmul.f32 %v2493_v31, %v5468_v25 }
 0x2ee   : > { %v3090_v33 = vmul.f32 -1.442695, %v2234_v16 }
 0x2ef   : > { %v2495_v34 = vadd.f32 %v2494_v32, %v5471_v29 }
 0x2f0   : > { %3578 = vpow2.f32 %v3090_v33 }
 0x2f1   : > { %v3148_v35 = vmul.f32 -1.442695, %v2495_v34 }
 0x2f3   : > { %3580 = vpow2.f32 %v3148_v35 }
 0x2fa   : > { %v3579_v36 = vpop.eup %3578 }
 0x2fb   : > { %v2238_v39 = vadd.f32 1.0, %v3579_v36 }
 0x2fd   : > { %v3581_v40 = vpop.eup %3580  ;;  %3582 = vrcp.f32 %v2238_v39 }
 0x2fe   : > { %v2499_v41 = vadd.f32 1.0, %v3581_v40 }
 0x300   : > { %3584 = vrcp.f32 %v2499_v41 }
 0x307   : > { %v3583_v23 = vpop.eup %3582 }
 0x308   : > { %v2513_v25 = vsel %vm2512_vm2, %v2511_v11, %v3583_v23 }
 0x30a   : > { %v3585_v42 = vpop.eup %3584 }
 0x30b   : > { %v2515_v29 = vsel %vm2514_vm3, %v2513_v25, %v3585_v42 }
 0x30c   : > { %2516 = vst [vmem:[%s339_s30] sm:$0xff] %v2515_v29 }
 0x30d   : > { %3749 = shalt.err (!%p3746_p5)
}
 0x30e   : > { %s3750_s13 = scalar_lea.hbm %s5507_s12, 128  ;;  %s3754_s6 = scalar_lea.hbm %s5556_s5, 256 }
 0x30f   : > { %p3751_p1 = scmp.ne.s32.totalorder %s5507_s12, %s3750_s13  ;;  %p3755_p7 = scmp.lt.u32.totalorder %s5507_s12, %s5556_s5 }
 0x310   : > { %p3756_p11 = scmp.lt.u32.totalorder %s3754_s6, %s3750_s13  ;;  %p3758_p9 = scmp.lt.u32.totalorder %s3750_s13, %s5507_s12 }
 0x311   : > { %p3752_p8 = pnand %p3751_p1, %p5590_p13 }
 0x312   : > { %p3757_p4 = por %p3756_p11, %p3755_p7 }
 0x313   : > { %p3753_p3 = pneg %p3752_p8 }
 0x314   : > { %p3759_p12 = por %p3758_p9, %p3757_p4 }
 0x316   : > { %p3760_p2 = pnand %p3759_p12, %p3753_p3 }
 0x318   : > { %3763 = shalt.err (!%p3760_p2)
}
 0x319   : > { %3455 = dma.vmem_to_hbm [thread:$0]  (%p5590_p13), %s5509_s24, 128, %s5507_s12, %s2518_s27  }
 0x31a PF: > { %s2543_s15 = sand.u32 1, %s3802_s18   ;;  %p5591_p6 = scmp.ne.s32.totalorder %s5577_s10, 0 }
 0x31b   : > { %p5592_p10 = scmp.ge.s32.totalorder %s3814_s21, 2  ;;  %s2544_s22 = scalar_lea.sflag [#allocation4], %s2543_s15 }
 0x31d   : > { %p3475_p0 = pnand %p5592_p10, %p5591_p6 }
 0x31f   : > { %3797 = dma.done.wait (!%p3475_p0), %s2544_s22, 128  }
 0x320   : > { %3799 = vsyncadd (!%p3475_p0), %s2544_s22, 4294967168  ;;  %s5593_s21 = sld [smem:[#allocation18_spill]]  ;;  %s5594_s14 = sld [smem:[#allocation19_spill]] }
 0x321   : > { %s5595_s18 = smov %s3806_s19  ;;  %s5596_s19 = smov %s3810_s20 }
 0x326   : > { %p23_p5 = scmp.ge.s32.totalorder %s5593_s21, 4   ;;  %s5597_s20 = smov %s5594_s14 }
 0x328   :  { %25 = sbr.rel (!%p23_p5) target bundleno = 12 (0xc), region = 118 }
 0x32f   :  { %2549 = vsyncpa [#allocation3], 1 }
 0x330   :  { %2551 = vsyncpa [#allocation3 + $0x1], 1 }
 0x331   :  { %2552 = vsyncpa [#allocation7], 1 }
 0x332   :  { %2554 = vsyncpa [#allocation7 + $0x1], 1 }
 0x333   :  { %2555 = vsyncpa [#allocation10], 1 }
 0x334   :  { %2556 = vsyncpa [#allocation4], 1 }
 0x335   :  { %2558 = vsyncpa [#allocation4 + $0x1], 1 }
 0x336   :  { %2559 = vsyncpa [#allocation5], 1 }
 0x337   :  { %2561 = vsyncpa [#allocation5 + $0x1], 1 }

</bundles_post_ra>
